<compile_context>
chip_gen: v6e
topology: v6e:2x2x1
jax: 0.10.0
libtpu: 0.0.40
codegen_flags: <defaults>
</compile_context>

<pallas_src>
import jax
import jax.numpy as jnp
from jax import lax
from jax.experimental import pallas as pl
from jax.experimental.pallas import tpu as pltpu


# ---------------------------------------------------------------------------
# Fused Conv2d(k=5, stride=1, pad=2) + MaxPool2d(2) kernel
# ---------------------------------------------------------------------------
def _conv_pool_kernel(x_ref, w_ref, b_ref, o_ref):
    """One batch element.

    x_ref: (1, 4, P, K)  parity-grouped im2col patches; group g = 2*dh + dw holds
                         the patch of conv-output position (2*ho+dh, 2*wo+dw) at
                         flattened pooled row ho*Wo + wo.  K = 25*Cin (lane-dense).
    w_ref: (K, Cout)     conv weights, row order (kh, kw, cin).
    b_ref: (1, Cout)
    o_ref: (1, P, Cout)  pooled NHWC output, P = Ho*Wo (row-major ho, wo).
    """
    w = w_ref[...]
    # 4 deep-K matmuls, max-pooled in registers (statically unrolled).
    m = jnp.dot(x_ref[0, 0], w, preferred_element_type=jnp.float32)
    for g in range(1, 4):
        m = jnp.maximum(m, jnp.dot(x_ref[0, g], w,
                                   preferred_element_type=jnp.float32))
    o_ref[0] = m + b_ref[...]


def conv5x5_pool2(x_nhwc, w_oihw, bias):
    """Conv2d(Cin,Cout,5,padding=2) + MaxPool2d(2) on NHWC input -> NHWC output."""
    N, H, W, Cin = x_nhwc.shape
    Cout = w_oihw.shape[0]
    Ho, Wo = H // 2, W // 2
    P = Ho * Wo
    K = 25 * Cin

    # im2col in the wrapper (single XLA pass): features ordered (kh, kw, cin).
    xp = jnp.pad(x_nhwc.astype(jnp.float32), ((0, 0), (2, 2), (2, 2), (0, 0)))
    cols = [xp[:, kh:kh + H, kw:kw + W, :] for kh in range(5) for kw in range(5)]
    patches = jnp.concatenate(cols, axis=-1)                          # (N, H, W, K)

    # Group by pool parity so the kernel's max-pool is just an elementwise max.
    patches = patches.reshape(N, Ho, 2, Wo, 2, K)
    patches = jnp.transpose(patches, (0, 2, 4, 1, 3, 5)).reshape(N, 4, P, K)

    # Weights: (Cout, Cin, 5, 5) -> (kh, kw, cin, cout) -> (K, Cout); matches the
    # (kh, kw, cin) feature order of the patches.
    wmat = jnp.transpose(w_oihw, (2, 3, 1, 0)).reshape(K, Cout).astype(jnp.float32)
    b2 = bias.reshape(1, Cout).astype(jnp.float32)

    out = pl.pallas_call(
        _conv_pool_kernel,
        out_shape=jax.ShapeDtypeStruct((N, P, Cout), jnp.float32),
        grid=(N,),
        in_specs=[
            pl.BlockSpec((1, 4, P, K), lambda n: (n, 0, 0, 0)),
            pl.BlockSpec((K, Cout), lambda n: (0, 0)),
            pl.BlockSpec((1, Cout), lambda n: (0, 0)),
        ],
        out_specs=pl.BlockSpec((1, P, Cout), lambda n: (n, 0, 0)),
        compiler_params=pltpu.CompilerParams(
            dimension_semantics=("parallel",),   # batch elems independent (v7x: 2 TCs)
        ),
    )(patches, wmat, b2)
    return out.reshape(N, Ho, Wo, Cout)


# ---------------------------------------------------------------------------
# Fused FC head: Linear(1024,64) -> Linear(64,10)
# ---------------------------------------------------------------------------
def _mlp_kernel(x_ref, w1_ref, b1_ref, w2_ref, b2_ref, o_ref):
    h = jnp.dot(x_ref[...], w1_ref[...], preferred_element_type=jnp.float32) + b1_ref[...]
    o_ref[...] = jnp.dot(h, w2_ref[...], preferred_element_type=jnp.float32) + b2_ref[...]


def linear_head(x, w1_km, b1, w2_km, b2):
    """x: (N, F) NHWC-flattened features; w1_km: (F, H1); w2_km: (H1, O)."""
    N, F = x.shape
    H1 = w1_km.shape[1]
    O = w2_km.shape[1]
    return pl.pallas_call(
        _mlp_kernel,
        out_shape=jax.ShapeDtypeStruct((N, O), jnp.float32),
        grid=(1,),
        in_specs=[
            pl.BlockSpec((N, F), lambda i: (0, 0)),
            pl.BlockSpec((F, H1), lambda i: (0, 0)),
            pl.BlockSpec((1, H1), lambda i: (0, 0)),
            pl.BlockSpec((H1, O), lambda i: (0, 0)),
            pl.BlockSpec((1, O), lambda i: (0, 0)),
        ],
        out_specs=pl.BlockSpec((N, O), lambda i: (0, 0)),
    )(x.astype(jnp.float32), w1_km.astype(jnp.float32),
      b1.reshape(1, -1).astype(jnp.float32),
      w2_km.astype(jnp.float32), b2.reshape(1, -1).astype(jnp.float32))


# ---------------------------------------------------------------------------
# Full forward pass
# ---------------------------------------------------------------------------
def tudui_forward(params, x_nchw):
    x = jnp.transpose(x_nchw, (0, 2, 3, 1))                          # NCHW -> NHWC
    x = conv5x5_pool2(x, params["conv1_w"], params["conv1_b"])       # (N,16,16,32)
    x = conv5x5_pool2(x, params["conv2_w"], params["conv2_b"])       # (N, 8, 8,32)
    x = conv5x5_pool2(x, params["conv3_w"], params["conv3_b"])       # (N, 4, 4,64)

    N, Hh, Ww, C = x.shape
    feat = x.reshape(N, Hh * Ww * C)                                  # NHWC flatten (h,w,c)

    # PyTorch's Flatten on NCHW flattens in (c,h,w) order -> fold that permutation
    # into fc1's columns instead of transposing the activations.
    w1 = params["fc1_w"]                                              # (64, 1024) = (out, c*h*w)
    w1_km = jnp.transpose(w1.reshape(-1, C, Hh, Ww), (2, 3, 1, 0)).reshape(Hh * Ww * C, -1)
    w2_km = params["fc2_w"].T                                         # (64, 10)
    return linear_head(feat, w1_km, params["fc1_b"], w2_km, params["fc2_b"])


# ---------------------------------------------------------------------------
# Pure-JAX reference (PyTorch semantics) for correctness checking
# ---------------------------------------------------------------------------
def tudui_reference(params, x_nchw):
    def conv(x, w, b):
        y = lax.conv_general_dilated(x, w, (1, 1), [(2, 2), (2, 2)],
                                     dimension_numbers=("NCHW", "OIHW", "NCHW"))
        return y + b.reshape(1, -1, 1, 1)

    def pool(x):
        return lax.reduce_window(x, -jnp.inf, lax.max,
                                 (1, 1, 2, 2), (1, 1, 2, 2), "VALID")

    x = pool(conv(x_nchw, params["conv1_w"], params["conv1_b"]))
    x = pool(conv(x, params["conv2_w"], params["conv2_b"]))
    x = pool(conv(x, params["conv3_w"], params["conv3_b"]))
    x = x.reshape(x.shape[0], -1)
    x = x @ params["fc1_w"].T + params["fc1_b"]
    return x @ params["fc2_w"].T + params["fc2_b"]


def init_params(key):
    """Deterministic synthetic parameters (PyTorch-default-style uniform init)."""
    def conv_init(k, cout, cin, ksz):
        bound = 1.0 / (cin * ksz * ksz) ** 0.5
        kw, kb = jax.random.split(k)
        w = jax.random.uniform(kw, (cout, cin, ksz, ksz), jnp.float32, -bound, bound)
        b = jax.random.uniform(kb, (cout,), jnp.float32, -bound, bound)
        return w, b

    def lin_init(k, cout, cin):
        bound = 1.0 / cin ** 0.5
        kw, kb = jax.random.split(k)
        w = jax.random.uniform(kw, (cout, cin), jnp.float32, -bound, bound)
        b = jax.random.uniform(kb, (cout,), jnp.float32, -bound, bound)
        return w, b

    k = jax.random.split(key, 5)
    p = {}
    p["conv1_w"], p["conv1_b"] = conv_init(k[0], 32, 3, 5)
    p["conv2_w"], p["conv2_b"] = conv_init(k[1], 32, 32, 5)
    p["conv3_w"], p["conv3_b"] = conv_init(k[2], 64, 32, 5)
    p["fc1_w"], p["fc1_b"] = lin_init(k[3], 64, 1024)
    p["fc2_w"], p["fc2_b"] = lin_init(k[4], 10, 64)
    return p


if __name__ == "__main__":
    root = jax.random.PRNGKey(0)
    kp, kx = jax.random.split(root)
    params = init_params(kp)
    # Input must be 32x32 spatial so that 64*4*4 == 1024 matches Linear(1024, 64).
    x = jax.random.normal(kx, (2, 3, 32, 32), jnp.float32)   # NCHW, like PyTorch

    out = jax.jit(tudui_forward)(params, x)
    out = jax.block_until_ready(out)
    assert out.shape == (2, 10), out.shape

    ref = tudui_reference(params, x)
    if not bool(jnp.allclose(out, ref, rtol=2e-3, atol=2e-3)):
        raise AssertionError("Pallas output does not match the JAX reference")
    print("KERNEL_OK")
</pallas_src>

<mosaic_0001>
module attributes {stable_mosaic.version = 11 : i64} {
  func.func @_conv_pool_kernel(%arg0: i32, %arg1: memref<1x4x256x75xf32, #tpu.memory_space<vmem>>, %arg2: memref<75x32xf32, #tpu.memory_space<vmem>>, %arg3: memref<1x32xf32, #tpu.memory_space<vmem>>, %arg4: memref<1x256x32xf32, #tpu.memory_space<vmem>>) attributes {dimension_semantics = [#tpu.dimension_semantics<parallel>], iteration_bounds = array<i64: 2>, scalar_prefetch = 0 : i64, scratch_operands = 0 : i64, tpu.core_type = #tpu.core_type<tc>, window_params = [{transform_indices = @transform_0, window_bounds = array<i64: 1, 4, 256, 75>}, {pipeline_mode = #tpu.pipeline_mode<synchronous>, transform_indices = @transform_1, window_bounds = array<i64: 75, 32>}, {pipeline_mode = #tpu.pipeline_mode<synchronous>, transform_indices = @transform_2, window_bounds = array<i64: 1, 32>}, {transform_indices = @transform_3, window_bounds = array<i64: 1, 256, 32>}]} {
    %c0 = arith.constant 0 : index
    %c0_0 = arith.constant 0 : index
    %0 = vector.load %arg2[%c0, %c0_0] : memref<75x32xf32, #tpu.memory_space<vmem>>, vector<75x32xf32>
    %c0_1 = arith.constant 0 : index
    %c0_2 = arith.constant 0 : index
    %c0_3 = arith.constant 0 : index
    %c0_4 = arith.constant 0 : index
    %1 = vector.load %arg1[%c0_1, %c0_2, %c0_3, %c0_4] : memref<1x4x256x75xf32, #tpu.memory_space<vmem>>, vector<1x1x256x75xf32>
    %2 = vector.shape_cast %1 : vector<1x1x256x75xf32> to vector<256x75xf32>
    %cst = arith.constant dense<0.000000e+00> : vector<256x32xf32>
    %3 = tpu.matmul %2, %0, %cst {dimension_numbers = #tpu.dot_dimension_numbers<[1], [0], [0], [1], [0, 0, 1, 1], [], []>} : vector<256x75xf32>, vector<75x32xf32>, vector<256x32xf32> -> vector<256x32xf32>
    %c0_5 = arith.constant 0 : index
    %c1 = arith.constant 1 : index
    %c0_6 = arith.constant 0 : index
    %c0_7 = arith.constant 0 : index
    %4 = vector.load %arg1[%c0_5, %c1, %c0_6, %c0_7] : memref<1x4x256x75xf32, #tpu.memory_space<vmem>>, vector<1x1x256x75xf32>
    %5 = vector.shape_cast %4 : vector<1x1x256x75xf32> to vector<256x75xf32>
    %cst_8 = arith.constant dense<0.000000e+00> : vector<256x32xf32>
    %6 = tpu.matmul %5, %0, %cst_8 {dimension_numbers = #tpu.dot_dimension_numbers<[1], [0], [0], [1], [0, 0, 1, 1], [], []>} : vector<256x75xf32>, vector<75x32xf32>, vector<256x32xf32> -> vector<256x32xf32>
    %7 = arith.maximumf %3, %6 : vector<256x32xf32>
    %c0_9 = arith.constant 0 : index
    %c2 = arith.constant 2 : index
    %c0_10 = arith.constant 0 : index
    %c0_11 = arith.constant 0 : index
    %8 = vector.load %arg1[%c0_9, %c2, %c0_10, %c0_11] : memref<1x4x256x75xf32, #tpu.memory_space<vmem>>, vector<1x1x256x75xf32>
    %9 = vector.shape_cast %8 : vector<1x1x256x75xf32> to vector<256x75xf32>
    %cst_12 = arith.constant dense<0.000000e+00> : vector<256x32xf32>
    %10 = tpu.matmul %9, %0, %cst_12 {dimension_numbers = #tpu.dot_dimension_numbers<[1], [0], [0], [1], [0, 0, 1, 1], [], []>} : vector<256x75xf32>, vector<75x32xf32>, vector<256x32xf32> -> vector<256x32xf32>
    %11 = arith.maximumf %7, %10 : vector<256x32xf32>
    %c0_13 = arith.constant 0 : index
    %c3 = arith.constant 3 : index
    %c0_14 = arith.constant 0 : index
    %c0_15 = arith.constant 0 : index
    %12 = vector.load %arg1[%c0_13, %c3, %c0_14, %c0_15] : memref<1x4x256x75xf32, #tpu.memory_space<vmem>>, vector<1x1x256x75xf32>
    %13 = vector.shape_cast %12 : vector<1x1x256x75xf32> to vector<256x75xf32>
    %cst_16 = arith.constant dense<0.000000e+00> : vector<256x32xf32>
    %14 = tpu.matmul %13, %0, %cst_16 {dimension_numbers = #tpu.dot_dimension_numbers<[1], [0], [0], [1], [0, 0, 1, 1], [], []>} : vector<256x75xf32>, vector<75x32xf32>, vector<256x32xf32> -> vector<256x32xf32>
    %15 = arith.maximumf %11, %14 : vector<256x32xf32>
    %c0_17 = arith.constant 0 : index
    %c0_18 = arith.constant 0 : index
    %16 = vector.load %arg3[%c0_17, %c0_18] : memref<1x32xf32, #tpu.memory_space<vmem>>, vector<1x32xf32>
    %17 = vector.broadcast %16 : vector<1x32xf32> to vector<256x32xf32>
    %18 = arith.addf %15, %17 : vector<256x32xf32>
    %c0_19 = arith.constant 0 : index
    %c0_20 = arith.constant 0 : index
    %c0_21 = arith.constant 0 : index
    %19 = vector.load %arg4[%c0_19, %c0_20, %c0_21] : memref<1x256x32xf32, #tpu.memory_space<vmem>>, vector<1x256x32xf32>
    %20 = vector.shape_cast %19 : vector<1x256x32xf32> to vector<256x32xf32>
    %21 = vector.shape_cast %18 : vector<256x32xf32> to vector<1x256x32xf32>
    tpu.vector_store %arg4[%c0_19, %c0_20, %c0_21], %21 {strides = array<i32>} : memref<1x256x32xf32, #tpu.memory_space<vmem>>, vector<1x256x32xf32>,
    return
  }
  func.func @transform_0(%arg0: i32) -> (i32, i32, i32, i32) {
    %c0_i32 = arith.constant 0 : i32
    %c0_i32_0 = arith.constant 0 : i32
    %c0_i32_1 = arith.constant 0 : i32
    %c0_i32_2 = arith.constant 0 : i32
    return %arg0, %c0_i32, %c0_i32_0, %c0_i32_1 : i32, i32, i32, i32
  }
  func.func @transform_1(%arg0: i32) -> (i32, i32) {
    %c0_i32 = arith.constant 0 : i32
    %c0_i32_0 = arith.constant 0 : i32
    %c0_i32_1 = arith.constant 0 : i32
    return %c0_i32, %c0_i32_0 : i32, i32
  }
  func.func @transform_2(%arg0: i32) -> (i32, i32) {
    %c0_i32 = arith.constant 0 : i32
    %c0_i32_0 = arith.constant 0 : i32
    %c0_i32_1 = arith.constant 0 : i32
    return %c0_i32, %c0_i32_0 : i32, i32
  }
  func.func @transform_3(%arg0: i32) -> (i32, i32, i32) {
    %c0_i32 = arith.constant 0 : i32
    %c0_i32_0 = arith.constant 0 : i32
    %c0_i32_1 = arith.constant 0 : i32
    return %arg0, %c0_i32, %c0_i32_0 : i32, i32, i32
  }
}

module attributes {stable_mosaic.version = 11 : i64} {
  func.func @_conv_pool_kernel(%arg0: i32, %arg1: memref<1x4x64x800xf32, #tpu.memory_space<vmem>>, %arg2: memref<800x32xf32, #tpu.memory_space<vmem>>, %arg3: memref<1x32xf32, #tpu.memory_space<vmem>>, %arg4: memref<1x64x32xf32, #tpu.memory_space<vmem>>) attributes {dimension_semantics = [#tpu.dimension_semantics<parallel>], iteration_bounds = array<i64: 2>, scalar_prefetch = 0 : i64, scratch_operands = 0 : i64, tpu.core_type = #tpu.core_type<tc>, window_params = [{transform_indices = @transform_0, window_bounds = array<i64: 1, 4, 64, 800>}, {pipeline_mode = #tpu.pipeline_mode<synchronous>, transform_indices = @transform_1, window_bounds = array<i64: 800, 32>}, {pipeline_mode = #tpu.pipeline_mode<synchronous>, transform_indices = @transform_2, window_bounds = array<i64: 1, 32>}, {transform_indices = @transform_3, window_bounds = array<i64: 1, 64, 32>}]} {
    %c0 = arith.constant 0 : index
    %c0_0 = arith.constant 0 : index
    %0 = vector.load %arg2[%c0, %c0_0] : memref<800x32xf32, #tpu.memory_space<vmem>>, vector<800x32xf32>
    %c0_1 = arith.constant 0 : index
    %c0_2 = arith.constant 0 : index
    %c0_3 = arith.constant 0 : index
    %c0_4 = arith.constant 0 : index
    %1 = vector.load %arg1[%c0_1, %c0_2, %c0_3, %c0_4] : memref<1x4x64x800xf32, #tpu.memory_space<vmem>>, vector<1x1x64x800xf32>
    %2 = vector.shape_cast %1 : vector<1x1x64x800xf32> to vector<64x800xf32>
    %cst = arith.constant dense<0.000000e+00> : vector<64x32xf32>
    %3 = tpu.matmul %2, %0, %cst {dimension_numbers = #tpu.dot_dimension_numbers<[1], [0], [0], [1], [0, 0, 1, 1], [], []>} : vector<64x800xf32>, vector<800x32xf32>, vector<64x32xf32> -> vector<64x32xf32>
    %c0_5 = arith.constant 0 : index
    %c1 = arith.constant 1 : index
    %c0_6 = arith.constant 0 : index
    %c0_7 = arith.constant 0 : index
    %4 = vector.load %arg1[%c0_5, %c1, %c0_6, %c0_7] : memref<1x4x64x800xf32, #tpu.memory_space<vmem>>, vector<1x1x64x800xf32>
    %5 = vector.shape_cast %4 : vector<1x1x64x800xf32> to vector<64x800xf32>
    %cst_8 = arith.constant dense<0.000000e+00> : vector<64x32xf32>
    %6 = tpu.matmul %5, %0, %cst_8 {dimension_numbers = #tpu.dot_dimension_numbers<[1], [0], [0], [1], [0, 0, 1, 1], [], []>} : vector<64x800xf32>, vector<800x32xf32>, vector<64x32xf32> -> vector<64x32xf32>
    %7 = arith.maximumf %3, %6 : vector<64x32xf32>
    %c0_9 = arith.constant 0 : index
    %c2 = arith.constant 2 : index
    %c0_10 = arith.constant 0 : index
    %c0_11 = arith.constant 0 : index
    %8 = vector.load %arg1[%c0_9, %c2, %c0_10, %c0_11] : memref<1x4x64x800xf32, #tpu.memory_space<vmem>>, vector<1x1x64x800xf32>
    %9 = vector.shape_cast %8 : vector<1x1x64x800xf32> to vector<64x800xf32>
    %cst_12 = arith.constant dense<0.000000e+00> : vector<64x32xf32>
    %10 = tpu.matmul %9, %0, %cst_12 {dimension_numbers = #tpu.dot_dimension_numbers<[1], [0], [0], [1], [0, 0, 1, 1], [], []>} : vector<64x800xf32>, vector<800x32xf32>, vector<64x32xf32> -> vector<64x32xf32>
    %11 = arith.maximumf %7, %10 : vector<64x32xf32>
    %c0_13 = arith.constant 0 : index
    %c3 = arith.constant 3 : index
    %c0_14 = arith.constant 0 : index
    %c0_15 = arith.constant 0 : index
    %12 = vector.load %arg1[%c0_13, %c3, %c0_14, %c0_15] : memref<1x4x64x800xf32, #tpu.memory_space<vmem>>, vector<1x1x64x800xf32>
    %13 = vector.shape_cast %12 : vector<1x1x64x800xf32> to vector<64x800xf32>
    %cst_16 = arith.constant dense<0.000000e+00> : vector<64x32xf32>
    %14 = tpu.matmul %13, %0, %cst_16 {dimension_numbers = #tpu.dot_dimension_numbers<[1], [0], [0], [1], [0, 0, 1, 1], [], []>} : vector<64x800xf32>, vector<800x32xf32>, vector<64x32xf32> -> vector<64x32xf32>
    %15 = arith.maximumf %11, %14 : vector<64x32xf32>
    %c0_17 = arith.constant 0 : index
    %c0_18 = arith.constant 0 : index
    %16 = vector.load %arg3[%c0_17, %c0_18] : memref<1x32xf32, #tpu.memory_space<vmem>>, vector<1x32xf32>
    %17 = vector.broadcast %16 : vector<1x32xf32> to vector<64x32xf32>
    %18 = arith.addf %15, %17 : vector<64x32xf32>
    %c0_19 = arith.constant 0 : index
    %c0_20 = arith.constant 0 : index
    %c0_21 = arith.constant 0 : index
    %19 = vector.load %arg4[%c0_19, %c0_20, %c0_21] : memref<1x64x32xf32, #tpu.memory_space<vmem>>, vector<1x64x32xf32>
    %20 = vector.shape_cast %19 : vector<1x64x32xf32> to vector<64x32xf32>
    %21 = vector.shape_cast %18 : vector<64x32xf32> to vector<1x64x32xf32>
    tpu.vector_store %arg4[%c0_19, %c0_20, %c0_21], %21 {strides = array<i32>} : memref<1x64x32xf32, #tpu.memory_space<vmem>>, vector<1x64x32xf32>,
    return
  }
  func.func @transform_0(%arg0: i32) -> (i32, i32, i32, i32) {
    %c0_i32 = arith.constant 0 : i32
    %c0_i32_0 = arith.constant 0 : i32
    %c0_i32_1 = arith.constant 0 : i32
    %c0_i32_2 = arith.constant 0 : i32
    return %arg0, %c0_i32, %c0_i32_0, %c0_i32_1 : i32, i32, i32, i32
  }
  func.func @transform_1(%arg0: i32) -> (i32, i32) {
    %c0_i32 = arith.constant 0 : i32
    %c0_i32_0 = arith.constant 0 : i32
    %c0_i32_1 = arith.constant 0 : i32
    return %c0_i32, %c0_i32_0 : i32, i32
  }
  func.func @transform_2(%arg0: i32) -> (i32, i32) {
    %c0_i32 = arith.constant 0 : i32
    %c0_i32_0 = arith.constant 0 : i32
    %c0_i32_1 = arith.constant 0 : i32
    return %c0_i32, %c0_i32_0 : i32, i32
  }
  func.func @transform_3(%arg0: i32) -> (i32, i32, i32) {
    %c0_i32 = arith.constant 0 : i32
    %c0_i32_0 = arith.constant 0 : i32
    %c0_i32_1 = arith.constant 0 : i32
    return %arg0, %c0_i32, %c0_i32_0 : i32, i32, i32
  }
}

module attributes {stable_mosaic.version = 11 : i64} {
  func.func @_conv_pool_kernel(%arg0: i32, %arg1: memref<1x4x16x800xf32, #tpu.memory_space<vmem>>, %arg2: memref<800x64xf32, #tpu.memory_space<vmem>>, %arg3: memref<1x64xf32, #tpu.memory_space<vmem>>, %arg4: memref<1x16x64xf32, #tpu.memory_space<vmem>>) attributes {dimension_semantics = [#tpu.dimension_semantics<parallel>], iteration_bounds = array<i64: 2>, scalar_prefetch = 0 : i64, scratch_operands = 0 : i64, tpu.core_type = #tpu.core_type<tc>, window_params = [{transform_indices = @transform_0, window_bounds = array<i64: 1, 4, 16, 800>}, {pipeline_mode = #tpu.pipeline_mode<synchronous>, transform_indices = @transform_1, window_bounds = array<i64: 800, 64>}, {pipeline_mode = #tpu.pipeline_mode<synchronous>, transform_indices = @transform_2, window_bounds = array<i64: 1, 64>}, {transform_indices = @transform_3, window_bounds = array<i64: 1, 16, 64>}]} {
    %c0 = arith.constant 0 : index
    %c0_0 = arith.constant 0 : index
    %0 = vector.load %arg2[%c0, %c0_0] : memref<800x64xf32, #tpu.memory_space<vmem>>, vector<800x64xf32>
    %c0_1 = arith.constant 0 : index
    %c0_2 = arith.constant 0 : index
    %c0_3 = arith.constant 0 : index
    %c0_4 = arith.constant 0 : index
    %1 = vector.load %arg1[%c0_1, %c0_2, %c0_3, %c0_4] : memref<1x4x16x800xf32, #tpu.memory_space<vmem>>, vector<1x1x16x800xf32>
    %2 = vector.shape_cast %1 : vector<1x1x16x800xf32> to vector<16x800xf32>
    %cst = arith.constant dense<0.000000e+00> : vector<16x64xf32>
    %3 = tpu.matmul %2, %0, %cst {dimension_numbers = #tpu.dot_dimension_numbers<[1], [0], [0], [1], [0, 0, 1, 1], [], []>} : vector<16x800xf32>, vector<800x64xf32>, vector<16x64xf32> -> vector<16x64xf32>
    %c0_5 = arith.constant 0 : index
    %c1 = arith.constant 1 : index
    %c0_6 = arith.constant 0 : index
    %c0_7 = arith.constant 0 : index
    %4 = vector.load %arg1[%c0_5, %c1, %c0_6, %c0_7] : memref<1x4x16x800xf32, #tpu.memory_space<vmem>>, vector<1x1x16x800xf32>
    %5 = vector.shape_cast %4 : vector<1x1x16x800xf32> to vector<16x800xf32>
    %cst_8 = arith.constant dense<0.000000e+00> : vector<16x64xf32>
    %6 = tpu.matmul %5, %0, %cst_8 {dimension_numbers = #tpu.dot_dimension_numbers<[1], [0], [0], [1], [0, 0, 1, 1], [], []>} : vector<16x800xf32>, vector<800x64xf32>, vector<16x64xf32> -> vector<16x64xf32>
    %7 = arith.maximumf %3, %6 : vector<16x64xf32>
    %c0_9 = arith.constant 0 : index
    %c2 = arith.constant 2 : index
    %c0_10 = arith.constant 0 : index
    %c0_11 = arith.constant 0 : index
    %8 = vector.load %arg1[%c0_9, %c2, %c0_10, %c0_11] : memref<1x4x16x800xf32, #tpu.memory_space<vmem>>, vector<1x1x16x800xf32>
    %9 = vector.shape_cast %8 : vector<1x1x16x800xf32> to vector<16x800xf32>
    %cst_12 = arith.constant dense<0.000000e+00> : vector<16x64xf32>
    %10 = tpu.matmul %9, %0, %cst_12 {dimension_numbers = #tpu.dot_dimension_numbers<[1], [0], [0], [1], [0, 0, 1, 1], [], []>} : vector<16x800xf32>, vector<800x64xf32>, vector<16x64xf32> -> vector<16x64xf32>
    %11 = arith.maximumf %7, %10 : vector<16x64xf32>
    %c0_13 = arith.constant 0 : index
    %c3 = arith.constant 3 : index
    %c0_14 = arith.constant 0 : index
    %c0_15 = arith.constant 0 : index
    %12 = vector.load %arg1[%c0_13, %c3, %c0_14, %c0_15] : memref<1x4x16x800xf32, #tpu.memory_space<vmem>>, vector<1x1x16x800xf32>
    %13 = vector.shape_cast %12 : vector<1x1x16x800xf32> to vector<16x800xf32>
    %cst_16 = arith.constant dense<0.000000e+00> : vector<16x64xf32>
    %14 = tpu.matmul %13, %0, %cst_16 {dimension_numbers = #tpu.dot_dimension_numbers<[1], [0], [0], [1], [0, 0, 1, 1], [], []>} : vector<16x800xf32>, vector<800x64xf32>, vector<16x64xf32> -> vector<16x64xf32>
    %15 = arith.maximumf %11, %14 : vector<16x64xf32>
    %c0_17 = arith.constant 0 : index
    %c0_18 = arith.constant 0 : index
    %16 = vector.load %arg3[%c0_17, %c0_18] : memref<1x64xf32, #tpu.memory_space<vmem>>, vector<1x64xf32>
    %17 = vector.broadcast %16 : vector<1x64xf32> to vector<16x64xf32>
    %18 = arith.addf %15, %17 : vector<16x64xf32>
    %c0_19 = arith.constant 0 : index
    %c0_20 = arith.constant 0 : index
    %c0_21 = arith.constant 0 : index
    %19 = vector.load %arg4[%c0_19, %c0_20, %c0_21] : memref<1x16x64xf32, #tpu.memory_space<vmem>>, vector<1x16x64xf32>
    %20 = vector.shape_cast %19 : vector<1x16x64xf32> to vector<16x64xf32>
    %21 = vector.shape_cast %18 : vector<16x64xf32> to vector<1x16x64xf32>
    tpu.vector_store %arg4[%c0_19, %c0_20, %c0_21], %21 {strides = array<i32>} : memref<1x16x64xf32, #tpu.memory_space<vmem>>, vector<1x16x64xf32>,
    return
  }
  func.func @transform_0(%arg0: i32) -> (i32, i32, i32, i32) {
    %c0_i32 = arith.constant 0 : i32
    %c0_i32_0 = arith.constant 0 : i32
    %c0_i32_1 = arith.constant 0 : i32
    %c0_i32_2 = arith.constant 0 : i32
    return %arg0, %c0_i32, %c0_i32_0, %c0_i32_1 : i32, i32, i32, i32
  }
  func.func @transform_1(%arg0: i32) -> (i32, i32) {
    %c0_i32 = arith.constant 0 : i32
    %c0_i32_0 = arith.constant 0 : i32
    %c0_i32_1 = arith.constant 0 : i32
    return %c0_i32, %c0_i32_0 : i32, i32
  }
  func.func @transform_2(%arg0: i32) -> (i32, i32) {
    %c0_i32 = arith.constant 0 : i32
    %c0_i32_0 = arith.constant 0 : i32
    %c0_i32_1 = arith.constant 0 : i32
    return %c0_i32, %c0_i32_0 : i32, i32
  }
  func.func @transform_3(%arg0: i32) -> (i32, i32, i32) {
    %c0_i32 = arith.constant 0 : i32
    %c0_i32_0 = arith.constant 0 : i32
    %c0_i32_1 = arith.constant 0 : i32
    return %arg0, %c0_i32, %c0_i32_0 : i32, i32, i32
  }
}

module attributes {stable_mosaic.version = 11 : i64} {
  func.func @_mlp_kernel(%arg0: i32, %arg1: memref<2x1024xf32, #tpu.memory_space<vmem>>, %arg2: memref<1024x64xf32, #tpu.memory_space<vmem>>, %arg3: memref<1x64xf32, #tpu.memory_space<vmem>>, %arg4: memref<64x10xf32, #tpu.memory_space<vmem>>, %arg5: memref<1x10xf32, #tpu.memory_space<vmem>>, %arg6: memref<2x10xf32, #tpu.memory_space<vmem>>) attributes {dimension_semantics = [#tpu.dimension_semantics<arbitrary>], iteration_bounds = array<i64: 1>, scalar_prefetch = 0 : i64, scratch_operands = 0 : i64, tpu.core_type = #tpu.core_type<tc>, window_params = [{pipeline_mode = #tpu.pipeline_mode<synchronous>, transform_indices = @transform_0, window_bounds = array<i64: 2, 1024>}, {pipeline_mode = #tpu.pipeline_mode<synchronous>, transform_indices = @transform_1, window_bounds = array<i64: 1024, 64>}, {pipeline_mode = #tpu.pipeline_mode<synchronous>, transform_indices = @transform_2, window_bounds = array<i64: 1, 64>}, {pipeline_mode = #tpu.pipeline_mode<synchronous>, transform_indices = @transform_3, window_bounds = array<i64: 64, 10>}, {pipeline_mode = #tpu.pipeline_mode<synchronous>, transform_indices = @transform_4, window_bounds = array<i64: 1, 10>}, {pipeline_mode = #tpu.pipeline_mode<synchronous>, transform_indices = @transform_5, window_bounds = array<i64: 2, 10>}]} {
    %c0 = arith.constant 0 : index
    %c0_0 = arith.constant 0 : index
    %0 = vector.load %arg1[%c0, %c0_0] : memref<2x1024xf32, #tpu.memory_space<vmem>>, vector<2x1024xf32>
    %c0_1 = arith.constant 0 : index
    %c0_2 = arith.constant 0 : index
    %1 = vector.load %arg2[%c0_1, %c0_2] : memref<1024x64xf32, #tpu.memory_space<vmem>>, vector<1024x64xf32>
    %cst = arith.constant dense<0.000000e+00> : vector<2x64xf32>
    %2 = tpu.matmul %0, %1, %cst {dimension_numbers = #tpu.dot_dimension_numbers<[1], [0], [0], [1], [0, 0, 1, 1], [], []>} : vector<2x1024xf32>, vector<1024x64xf32>, vector<2x64xf32> -> vector<2x64xf32>
    %c0_3 = arith.constant 0 : index
    %c0_4 = arith.constant 0 : index
    %3 = vector.load %arg3[%c0_3, %c0_4] : memref<1x64xf32, #tpu.memory_space<vmem>>, vector<1x64xf32>
    %4 = vector.broadcast %3 : vector<1x64xf32> to vector<2x64xf32>
    %5 = arith.addf %2, %4 : vector<2x64xf32>
    %c0_5 = arith.constant 0 : index
    %c0_6 = arith.constant 0 : index
    %6 = vector.load %arg4[%c0_5, %c0_6] : memref<64x10xf32, #tpu.memory_space<vmem>>, vector<64x10xf32>
    %cst_7 = arith.constant dense<0.000000e+00> : vector<2x10xf32>
    %7 = tpu.matmul %5, %6, %cst_7 {dimension_numbers = #tpu.dot_dimension_numbers<[1], [0], [0], [1], [0, 0, 1, 1], [], []>} : vector<2x64xf32>, vector<64x10xf32>, vector<2x10xf32> -> vector<2x10xf32>
    %c0_8 = arith.constant 0 : index
    %c0_9 = arith.constant 0 : index
    %8 = vector.load %arg5[%c0_8, %c0_9] : memref<1x10xf32, #tpu.memory_space<vmem>>, vector<1x10xf32>
    %9 = vector.broadcast %8 : vector<1x10xf32> to vector<2x10xf32>
    %10 = arith.addf %7, %9 : vector<2x10xf32>
    %c0_10 = arith.constant 0 : index
    %c0_11 = arith.constant 0 : index
    %11 = vector.load %arg6[%c0_10, %c0_11] : memref<2x10xf32, #tpu.memory_space<vmem>>, vector<2x10xf32>
    tpu.vector_store %arg6[%c0_10, %c0_11], %10 {strides = array<i32>} : memref<2x10xf32, #tpu.memory_space<vmem>>, vector<2x10xf32>,
    return
  }
  func.func @transform_0(%arg0: i32) -> (i32, i32) {
    %c0_i32 = arith.constant 0 : i32
    %c0_i32_0 = arith.constant 0 : i32
    %c0_i32_1 = arith.constant 0 : i32
    return %c0_i32, %c0_i32_0 : i32, i32
  }
  func.func @transform_1(%arg0: i32) -> (i32, i32) {
    %c0_i32 = arith.constant 0 : i32
    %c0_i32_0 = arith.constant 0 : i32
    %c0_i32_1 = arith.constant 0 : i32
    return %c0_i32, %c0_i32_0 : i32, i32
  }
  func.func @transform_2(%arg0: i32) -> (i32, i32) {
    %c0_i32 = arith.constant 0 : i32
    %c0_i32_0 = arith.constant 0 : i32
    %c0_i32_1 = arith.constant 0 : i32
    return %c0_i32, %c0_i32_0 : i32, i32
  }
  func.func @transform_3(%arg0: i32) -> (i32, i32) {
    %c0_i32 = arith.constant 0 : i32
    %c0_i32_0 = arith.constant 0 : i32
    %c0_i32_1 = arith.constant 0 : i32
    return %c0_i32, %c0_i32_0 : i32, i32
  }
  func.func @transform_4(%arg0: i32) -> (i32, i32) {
    %c0_i32 = arith.constant 0 : i32
    %c0_i32_0 = arith.constant 0 : i32
    %c0_i32_1 = arith.constant 0 : i32
    return %c0_i32, %c0_i32_0 : i32, i32
  }
  func.func @transform_5(%arg0: i32) -> (i32, i32) {
    %c0_i32 = arith.constant 0 : i32
    %c0_i32_0 = arith.constant 0 : i32
    %c0_i32_1 = arith.constant 0 : i32
    return %c0_i32, %c0_i32_0 : i32, i32
  }
}

</mosaic_0001>

<bundles_post_ra>
// kernel: tudui_forward.4
= control target key start
LH: loop header
LB: loop body
LE: loop exit
PB: predicated region body
PF: predicated region fallthrough
CT: control target
= control target key end

     0   :  { %s2542_s12 = smov 0   ;;  %s3254_s0 = inlined_call_operand.vmem [shape: f32[2,4,256,75], index: 0, kind: input, shape index: {}]   ;;  %s3255_s1 = inlined_call_operand.vmem [shape: f32[75,32], index: 1, kind: input, shape index: {}]   ;;  %s3256_s2 = inlined_call_operand.vmem [shape: f32[1,32], index: 2, kind: input, shape index: {}]   ;;  %s3257_s3 = inlined_call_operand.vmem [shape: f32[2,256,32], index: 3, kind: output, shape index: {}]  }
   0x1 LB: > { %s1824_s13 = sadd.s32 4294967295, %s2520_s12   ;;  %p1828_p0 = scmp.ge.s32.totalorder %s2520_s12, 1  ;;  %s2520_s12 = sphi %s2542_s12, %s13_s12  }
   0x2   : > { %p137_p1 = scmp.lt.s32.totalorder %s2520_s12, 3 }
   0x4   : > { %p138_p2 = pnand %p1828_p0, %p137_p1 }
   0x6   : > { %141 = sbr.rel (%p138_p2) target bundleno = 359 (0x167), region = 32 }
   0xb   : > { %v2553_v0 = vld [vmem:[%s3255_s1 + $0x48] sm:$0x7]  ;;  %vm310_vm0 = vcmask 1042432   ;;  %v2558_v1 = vld [vmem:[%s3255_s1 + $0x40] sm:$0xff]  ;;  %v2571_v2 = vld [vmem:[%s3255_s1 + $0x38] sm:$0xff]  ;;  %p161_p3 = scmp.lt.s32.totalorder %s1824_s13, 1 }
   0xc   : > { %2234 = vmatprep.subr.msk.mxu0 %vm310_vm0, %v2553_v0  ;;  %2302 = vmatprep.subr.msk.mxu1 %vm310_vm0, %v2553_v0  ;;  %v2580_v3 = vld [vmem:[%s3255_s1 + $0x30] sm:$0xff]  ;;  %v2589_v4 = vld [vmem:[%s3255_s1 + $0x28] sm:$0xff]  ;;  %v2600_v5 = vld [vmem:[%s3255_s1 + $0x20] sm:$0xff]  ;;  %vm213_vm1 = vcmask 613376   ;;  %vm1736_vm2 = vcmask 261120  }
   0xd   : > { %2235 = vmatpush3.msk.msra.mxu0 %vm310_vm0, %v2553_v0  ;;  %2303 = vmatpush3.msk.msra.mxu1 %vm310_vm0, %v2553_v0  ;;  %s3285_s13 = smov (!%p161_p3, %s1824_s13), 1  ;;  %v2609_v6 = vld [vmem:[%s3255_s1 + $0x18] sm:$0xff]  ;;  %v2619_v7 = vld [vmem:[%s3255_s1 + $0x10] sm:$0xff]  ;;  %v2628_v8 = vld [vmem:[%s3255_s1 + $0x8] sm:$0xff] }
   0xe   : > { %2236 = vmatprep.subr.mxu0 %v2558_v1  ;;  %2304 = vmatprep.subr.mxu1 %v2558_v1  ;;  %s2064_s28 = sshll.u32 %s3285_s13, 10  ;;  %v2642_v9 = vld [vmem:[%s3255_s1] sm:$0xff]  ;;  %s2065_s11 = sshll.u32 %s3285_s13, 8 }
   0xf   : > { %2237 = vmatpush3.msra.mxu0 %v2558_v1  ;;  %2305 = vmatpush3.msra.mxu1 %v2558_v1  ;;  %s2633_s8 = scalar_lea.vmem %s3254_s0, %s2064_s28  ;;  %s3095_s18 = scalar_lea.vmem %s3257_s3, %s2065_s11 }
  0x10   : > { %2238 = vmatprep.subr.mxu0 %v2571_v2  ;;  %2306 = vmatprep.subr.mxu1 %v2571_v2  ;;  %v181_v10 = vld [vmem:[%s2633_s8] sm:$0xff]  ;;  %v182_v12 = vld [vmem:[%s2633_s8 + $0x8] sm:$0xff]  ;;  %v183_v14 = vld [vmem:[%s2633_s8 + $0x10] sm:$0xff] }
  0x11   : > { %2239 = vmatpush3.msra.mxu0 %v2571_v2  ;;  %2307 = vmatpush3.msra.mxu1 %v2571_v2  ;;  %v1866_v11 = vld [vmem:[%s2633_s8 + $0x100] sm:$0xff]  ;;  %v1867_v13 = vld [vmem:[%s2633_s8 + $0x108] sm:$0xff]  ;;  %v1868_v15 = vld [vmem:[%s2633_s8 + $0x110] sm:$0xff] }
  0x12   : > { %2240 = vmatprep.subr.mxu0 %v2580_v3  ;;  %2308 = vmatprep.subr.mxu1 %v2580_v3  ;;  %v184_v16 = vld [vmem:[%s2633_s8 + $0x18] sm:$0xff]  ;;  %v185_v18 = vld [vmem:[%s2633_s8 + $0x20] sm:$0xff]  ;;  %v186_v20 = vld [vmem:[%s2633_s8 + $0x28] sm:$0xff] }
  0x13   : > { %2241 = vmatpush3.msra.mxu0 %v2580_v3  ;;  %2309 = vmatpush3.msra.mxu1 %v2580_v3  ;;  %v1869_v17 = vld [vmem:[%s2633_s8 + $0x118] sm:$0xff]  ;;  %v1870_v19 = vld [vmem:[%s2633_s8 + $0x120] sm:$0xff]  ;;  %v1871_v21 = vld [vmem:[%s2633_s8 + $0x128] sm:$0xff] }
  0x14   : > { %2242 = vmatprep.subr.mxu0 %v2589_v4  ;;  %2310 = vmatprep.subr.mxu1 %v2589_v4  ;;  %v187_v22 = vld [vmem:[%s2633_s8 + $0x30] sm:$0xff]  ;;  %v188_v24 = vld [vmem:[%s2633_s8 + $0x38] sm:$0xff]  ;;  %v189_v26 = vld [vmem:[%s2633_s8 + $0x40] sm:$0xff] }
  0x15   : > { %2243 = vmatpush3.msra.mxu0 %v2589_v4  ;;  %2311 = vmatpush3.msra.mxu1 %v2589_v4  ;;  %v1872_v23 = vld [vmem:[%s2633_s8 + $0x130] sm:$0xff]  ;;  %v1873_v25 = vld [vmem:[%s2633_s8 + $0x138] sm:$0xff]  ;;  %v1874_v27 = vld [vmem:[%s2633_s8 + $0x140] sm:$0xff] }
  0x16   : > { %2244 = vmatprep.subr.mxu0 %v2600_v5  ;;  %2312 = vmatprep.subr.mxu1 %v2600_v5  ;;  %v190_v28 = vld [vmem:[%s2633_s8 + $0x48] sm:$0xff]  ;;  %v191_v30 = vld [vmem:[%s2633_s8 + $0x50] sm:$0xff]  ;;  %v192_v32 = vld [vmem:[%s2633_s8 + $0x58] sm:$0xff] }
  0x17   : > { %2245 = vmatpush3.msra.mxu0 %v2600_v5  ;;  %2313 = vmatpush3.msra.mxu1 %v2600_v5  ;;  %v1875_v29 = vld [vmem:[%s2633_s8 + $0x148] sm:$0xff]  ;;  %v1876_v31 = vld [vmem:[%s2633_s8 + $0x150] sm:$0xff]  ;;  %v1877_v33 = vld [vmem:[%s2633_s8 + $0x158] sm:$0xff] }
  0x18   : > { %2246 = vmatprep.subr.mxu0 %v2609_v6  ;;  %2314 = vmatprep.subr.mxu1 %v2609_v6  ;;  %v193_v34 = vld [vmem:[%s2633_s8 + $0x60] sm:$0xff]  ;;  %v194_v36 = vld [vmem:[%s2633_s8 + $0x68] sm:$0xff]  ;;  %v195_v38 = vld [vmem:[%s2633_s8 + $0x70] sm:$0xff] }
  0x19   : > { %2247 = vmatpush3.msra.mxu0 %v2609_v6  ;;  %2315 = vmatpush3.msra.mxu1 %v2609_v6  ;;  %v1878_v35 = vld [vmem:[%s2633_s8 + $0x160] sm:$0xff]  ;;  %v1879_v37 = vld [vmem:[%s2633_s8 + $0x168] sm:$0xff]  ;;  %v1880_v39 = vld [vmem:[%s2633_s8 + $0x170] sm:$0xff] }
  0x1a   : > { %2248 = vmatprep.subr.mxu0 %v2619_v7  ;;  %2316 = vmatprep.subr.mxu1 %v2619_v7  ;;  %v196_v40 = vld [vmem:[%s2633_s8 + $0x78] sm:$0xff]  ;;  %v197_v42 = vld [vmem:[%s2633_s8 + $0x80] sm:$0xff]  ;;  %v198_v44 = vld [vmem:[%s2633_s8 + $0x88] sm:$0xff] }
  0x1b   : > { %2249 = vmatpush3.msra.mxu0 %v2619_v7  ;;  %2317 = vmatpush3.msra.mxu1 %v2619_v7  ;;  %v1881_v41 = vld [vmem:[%s2633_s8 + $0x178] sm:$0xff]  ;;  %v1882_v43 = vld [vmem:[%s2633_s8 + $0x180] sm:$0xff]  ;;  %v1883_v45 = vld [vmem:[%s2633_s8 + $0x188] sm:$0xff] }
  0x1c   : > { %2250 = vmatprep.subr.mxu0 %v2628_v8  ;;  %2318 = vmatprep.subr.mxu1 %v2628_v8  ;;  %v199_v46 = vld [vmem:[%s2633_s8 + $0x90] sm:$0xff]  ;;  %v200_v48 = vld [vmem:[%s2633_s8 + $0x98] sm:$0xff]  ;;  %v201_v50 = vld [vmem:[%s2633_s8 + $0xa0] sm:$0xff] }
  0x1d   : > { %2251 = vmatpush3.msra.mxu0 %v2628_v8  ;;  %2319 = vmatpush3.msra.mxu1 %v2628_v8  ;;  %v1884_v47 = vld [vmem:[%s2633_s8 + $0x190] sm:$0xff]  ;;  %v1885_v49 = vld [vmem:[%s2633_s8 + $0x198] sm:$0xff]  ;;  %v1886_v51 = vld [vmem:[%s2633_s8 + $0x1a0] sm:$0xff] }
  0x1e   : > { %2252 = vmatprep.subr.mxu0 %v2642_v9  ;;  %2320 = vmatprep.subr.mxu1 %v2642_v9  ;;  %v202_v52 = vld [vmem:[%s2633_s8 + $0xa8] sm:$0xff]  ;;  %v203_v54 = vld [vmem:[%s2633_s8 + $0xb0] sm:$0xff]  ;;  %v204_v56 = vld [vmem:[%s2633_s8 + $0xb8] sm:$0xff] }
  0x1f   : > { %2253 = vmatpush3.msra.mxu0 %v2642_v9  ;;  %2254 = vmatprep.mubr.msk.f32.mxu0 %vm213_vm1, %v181_v10  ;;  %v1887_v53 = vld [vmem:[%s2633_s8 + $0x1a8] sm:$0xff]  ;;  %v1888_v55 = vld [vmem:[%s2633_s8 + $0x1b0] sm:$0xff]  ;;  %v1889_v57 = vld [vmem:[%s2633_s8 + $0x1b8] sm:$0xff] }
  0x20   : > { %2321 = vmatpush3.msra.mxu1 %v2642_v9  ;;  %2322 = vmatprep.mubr.msk.f32.mxu1 %vm213_vm1, %v1866_v11  ;;  %v205_v58 = vld [vmem:[%s2633_s8 + $0xc0] sm:$0xff]  ;;  %v206_v60 = vld [vmem:[%s2633_s8 + $0xc8] sm:$0xff]  ;;  %v207_v62 = vld [vmem:[%s2633_s8 + $0xd0] sm:$0xff] }
  0x21   : > { %2255 = vmatmul.mubr.msk.f32.vlgmr.msra.gmra.mxu0 %vm213_vm1, %v182_v12  ;;  %2323 = vmatmul.mubr.msk.f32.vlgmr.msra.gmra.mxu1 %vm213_vm1, %v1867_v13  ;;  %v1890_v59 = vld [vmem:[%s2633_s8 + $0x1c0] sm:$0xff]  ;;  %v1891_v61 = vld [vmem:[%s2633_s8 + $0x1c8] sm:$0xff]  ;;  %v1892_v63 = vld [vmem:[%s2633_s8 + $0x1d0] sm:$0xff] }
  0x22   : > { %2370 = vmatprep.subr.msk.mxu0 %vm310_vm0, %v2553_v0  ;;  %2438 = vmatprep.subr.msk.mxu1 %vm310_vm0, %v2553_v0  ;;  %v1931_v10 = vld [vmem:[%s2633_s8 + $0x200] sm:$0xff]  ;;  %v1932_v12 = vld [vmem:[%s2633_s8 + $0x208] sm:$0xff] }
  0x23   : > { %2371 = vmatpush3.msk.msra.mxu0 %vm310_vm0, %v2553_v0  ;;  %2257 = vmatprep.mubr.msk.f32.mxu0 %vm213_vm1, %v183_v14  ;;  %v1996_v11 = vld [vmem:[%s2633_s8 + $0x300] sm:$0xff]  ;;  %v1997_v13 = vld [vmem:[%s2633_s8 + $0x308] sm:$0xff]  ;;  %v1933_v14 = vld [vmem:[%s2633_s8 + $0x210] sm:$0xff] }
  0x24   : > { %2325 = vmatprep.mubr.msk.f32.mxu1 %vm213_vm1, %v1868_v15  ;;  %2439 = vmatpush3.msk.msra.mxu1 %vm310_vm0, %v2553_v0  ;;  %v208_v0 = vld [vmem:[%s2633_s8 + $0xd8] sm:$0xff]  ;;  %v1998_v15 = vld [vmem:[%s2633_s8 + $0x310] sm:$0xff] }
  0x25   : > { %2258 = vmatmul.mubr.msk.f32.gmra.mxu0 %vm213_vm1, %v184_v16  ;;  %2326 = vmatmul.mubr.msk.f32.gmra.mxu1 %vm213_vm1, %v1869_v17  ;;  %v1934_v16 = vld [vmem:[%s2633_s8 + $0x218] sm:$0xff] }
  0x26   : > { %2260 = vmatprep.mubr.msk.f32.mxu0 %vm213_vm1, %v185_v18  ;;  %2328 = vmatprep.mubr.msk.f32.mxu1 %vm213_vm1, %v1870_v19  ;;  %v1999_v17 = vld [vmem:[%s2633_s8 + $0x318] sm:$0xff]  ;;  %v1935_v18 = vld [vmem:[%s2633_s8 + $0x220] sm:$0xff] }
  0x27   : > { %2372 = vmatprep.subr.mxu0 %v2558_v1  ;;  %2440 = vmatprep.subr.mxu1 %v2558_v1  ;;  %v2000_v19 = vld [vmem:[%s2633_s8 + $0x320] sm:$0xff] }
  0x28   : > { %2373 = vmatpush3.msra.mxu0 %v2558_v1  ;;  %2441 = vmatpush3.msra.mxu1 %v2558_v1  ;;  %v1893_v1 = vld [vmem:[%s2633_s8 + $0x1d8] sm:$0xff] }
  0x29   : > { %2261 = vmatmul.mubr.msk.f32.gmra.mxu0 %vm213_vm1, %v186_v20  ;;  %2329 = vmatmul.mubr.msk.f32.gmra.mxu1 %vm213_vm1, %v1871_v21  ;;  %v1936_v20 = vld [vmem:[%s2633_s8 + $0x228] sm:$0xff] }
  0x2a   : > { %2263 = vmatprep.mubr.msk.f32.mxu0 %vm213_vm1, %v187_v22  ;;  %2331 = vmatprep.mubr.msk.f32.mxu1 %vm213_vm1, %v1872_v23  ;;  %v2001_v21 = vld [vmem:[%s2633_s8 + $0x328] sm:$0xff]  ;;  %v1937_v22 = vld [vmem:[%s2633_s8 + $0x230] sm:$0xff] }
  0x2b   : > { %2374 = vmatprep.subr.mxu0 %v2571_v2  ;;  %2442 = vmatprep.subr.mxu1 %v2571_v2  ;;  %v2002_v23 = vld [vmem:[%s2633_s8 + $0x330] sm:$0xff] }
  0x2c   : > { %2375 = vmatpush3.msra.mxu0 %v2571_v2  ;;  %2443 = vmatpush3.msra.mxu1 %v2571_v2  ;;  %v209_v2 = vld [vmem:[%s2633_s8 + $0xe0] sm:$0xff] }
  0x2d   : > { %2264 = vmatmul.mubr.msk.f32.gmra.mxu0 %vm213_vm1, %v188_v24  ;;  %2332 = vmatmul.mubr.msk.f32.gmra.mxu1 %vm213_vm1, %v1873_v25  ;;  %v1938_v24 = vld [vmem:[%s2633_s8 + $0x238] sm:$0xff] }
  0x2e   : > { %2266 = vmatprep.mubr.msk.f32.mxu0 %vm213_vm1, %v189_v26  ;;  %2334 = vmatprep.mubr.msk.f32.mxu1 %vm213_vm1, %v1874_v27  ;;  %v2003_v25 = vld [vmem:[%s2633_s8 + $0x338] sm:$0xff]  ;;  %v1939_v26 = vld [vmem:[%s2633_s8 + $0x240] sm:$0xff] }
  0x2f   : > { %2376 = vmatprep.subr.mxu0 %v2580_v3  ;;  %2444 = vmatprep.subr.mxu1 %v2580_v3  ;;  %v2004_v27 = vld [vmem:[%s2633_s8 + $0x340] sm:$0xff] }
  0x30   : > { %2377 = vmatpush3.msra.mxu0 %v2580_v3  ;;  %2445 = vmatpush3.msra.mxu1 %v2580_v3  ;;  %v1894_v3 = vld [vmem:[%s2633_s8 + $0x1e0] sm:$0xff] }
  0x31   : > { %2267 = vmatmul.mubr.msk.f32.gmra.mxu0 %vm213_vm1, %v190_v28  ;;  %2335 = vmatmul.mubr.msk.f32.gmra.mxu1 %vm213_vm1, %v1875_v29  ;;  %v1940_v28 = vld [vmem:[%s2633_s8 + $0x248] sm:$0xff] }
  0x32   : > { %2269 = vmatprep.mubr.msk.f32.mxu0 %vm213_vm1, %v191_v30  ;;  %2337 = vmatprep.mubr.msk.f32.mxu1 %vm213_vm1, %v1876_v31  ;;  %v2005_v29 = vld [vmem:[%s2633_s8 + $0x348] sm:$0xff]  ;;  %v1941_v30 = vld [vmem:[%s2633_s8 + $0x250] sm:$0xff] }
  0x33   : > { %2378 = vmatprep.subr.mxu0 %v2589_v4  ;;  %2446 = vmatprep.subr.mxu1 %v2589_v4  ;;  %v2006_v31 = vld [vmem:[%s2633_s8 + $0x350] sm:$0xff] }
  0x34   : > { %2379 = vmatpush3.msra.mxu0 %v2589_v4  ;;  %2447 = vmatpush3.msra.mxu1 %v2589_v4  ;;  %v210_v4 = vld [vmem:[%s2633_s8 + $0xe8] sm:$0xff] }
  0x35   : > { %2270 = vmatmul.mubr.msk.f32.gmra.mxu0 %vm213_vm1, %v192_v32  ;;  %2338 = vmatmul.mubr.msk.f32.gmra.mxu1 %vm213_vm1, %v1877_v33  ;;  %v1942_v32 = vld [vmem:[%s2633_s8 + $0x258] sm:$0xff] }
  0x36   : > { %2272 = vmatprep.mubr.msk.f32.mxu0 %vm213_vm1, %v193_v34  ;;  %2340 = vmatprep.mubr.msk.f32.mxu1 %vm213_vm1, %v1878_v35  ;;  %v2007_v33 = vld [vmem:[%s2633_s8 + $0x358] sm:$0xff]  ;;  %v1943_v34 = vld [vmem:[%s2633_s8 + $0x260] sm:$0xff] }
  0x37   : > { %2380 = vmatprep.subr.mxu0 %v2600_v5  ;;  %2448 = vmatprep.subr.mxu1 %v2600_v5  ;;  %v2008_v35 = vld [vmem:[%s2633_s8 + $0x360] sm:$0xff] }
  0x38   : > { %2381 = vmatpush3.msra.mxu0 %v2600_v5  ;;  %2449 = vmatpush3.msra.mxu1 %v2600_v5  ;;  %v1895_v5 = vld [vmem:[%s2633_s8 + $0x1e8] sm:$0xff] }
  0x39   : > { %2273 = vmatmul.mubr.msk.f32.gmra.mxu0 %vm213_vm1, %v194_v36  ;;  %2341 = vmatmul.mubr.msk.f32.gmra.mxu1 %vm213_vm1, %v1879_v37  ;;  %v1944_v36 = vld [vmem:[%s2633_s8 + $0x268] sm:$0xff] }
  0x3a   : > { %2275 = vmatprep.mubr.msk.f32.mxu0 %vm213_vm1, %v195_v38  ;;  %2343 = vmatprep.mubr.msk.f32.mxu1 %vm213_vm1, %v1880_v39  ;;  %v2009_v37 = vld [vmem:[%s2633_s8 + $0x368] sm:$0xff]  ;;  %v1945_v38 = vld [vmem:[%s2633_s8 + $0x270] sm:$0xff] }
  0x3b   : > { %2382 = vmatprep.subr.mxu0 %v2609_v6  ;;  %2450 = vmatprep.subr.mxu1 %v2609_v6  ;;  %v2010_v39 = vld [vmem:[%s2633_s8 + $0x370] sm:$0xff] }
  0x3c   : > { %2383 = vmatpush3.msra.mxu0 %v2609_v6  ;;  %2451 = vmatpush3.msra.mxu1 %v2609_v6  ;;  %v211_v6 = vld [vmem:[%s2633_s8 + $0xf0] sm:$0xff] }
  0x3d   : > { %2276 = vmatmul.mubr.msk.f32.gmra.mxu0 %vm213_vm1, %v196_v40  ;;  %2344 = vmatmul.mubr.msk.f32.gmra.mxu1 %vm213_vm1, %v1881_v41  ;;  %v1946_v40 = vld [vmem:[%s2633_s8 + $0x278] sm:$0xff] }
  0x3e   : > { %2278 = vmatprep.mubr.msk.f32.mxu0 %vm213_vm1, %v197_v42  ;;  %2346 = vmatprep.mubr.msk.f32.mxu1 %vm213_vm1, %v1882_v43  ;;  %v2011_v41 = vld [vmem:[%s2633_s8 + $0x378] sm:$0xff]  ;;  %v1947_v42 = vld [vmem:[%s2633_s8 + $0x280] sm:$0xff] }
  0x3f   : > { %2384 = vmatprep.subr.mxu0 %v2619_v7  ;;  %2452 = vmatprep.subr.mxu1 %v2619_v7  ;;  %v2012_v43 = vld [vmem:[%s2633_s8 + $0x380] sm:$0xff] }
  0x40   : > { %2385 = vmatpush3.msra.mxu0 %v2619_v7  ;;  %2453 = vmatpush3.msra.mxu1 %v2619_v7  ;;  %v1896_v7 = vld [vmem:[%s2633_s8 + $0x1f0] sm:$0xff] }
  0x41   : > { %2279 = vmatmul.mubr.msk.f32.gmra.mxu0 %vm213_vm1, %v198_v44  ;;  %2347 = vmatmul.mubr.msk.f32.gmra.mxu1 %vm213_vm1, %v1883_v45  ;;  %v1948_v44 = vld [vmem:[%s2633_s8 + $0x288] sm:$0xff] }
  0x42   : > { %2281 = vmatprep.mubr.msk.f32.mxu0 %vm213_vm1, %v199_v46  ;;  %2349 = vmatprep.mubr.msk.f32.mxu1 %vm213_vm1, %v1884_v47  ;;  %v2013_v45 = vld [vmem:[%s2633_s8 + $0x388] sm:$0xff]  ;;  %v1949_v46 = vld [vmem:[%s2633_s8 + $0x290] sm:$0xff] }
  0x43   : > { %2386 = vmatprep.subr.mxu0 %v2628_v8  ;;  %2454 = vmatprep.subr.mxu1 %v2628_v8  ;;  %v2014_v47 = vld [vmem:[%s2633_s8 + $0x390] sm:$0xff] }
  0x44   : > { %2387 = vmatpush3.msra.mxu0 %v2628_v8  ;;  %2455 = vmatpush3.msra.mxu1 %v2628_v8  ;;  %v212_v8 = vld [vmem:[%s2633_s8 + $0xf8] sm:$0xff] }
  0x45   : > { %2282 = vmatmul.mubr.msk.f32.gmra.mxu0 %vm213_vm1, %v200_v48  ;;  %2350 = vmatmul.mubr.msk.f32.gmra.mxu1 %vm213_vm1, %v1885_v49  ;;  %v1950_v48 = vld [vmem:[%s2633_s8 + $0x298] sm:$0xff] }
  0x46   : > { %2284 = vmatprep.mubr.msk.f32.mxu0 %vm213_vm1, %v201_v50  ;;  %2352 = vmatprep.mubr.msk.f32.mxu1 %vm213_vm1, %v1886_v51  ;;  %v2015_v49 = vld [vmem:[%s2633_s8 + $0x398] sm:$0xff]  ;;  %v1951_v50 = vld [vmem:[%s2633_s8 + $0x2a0] sm:$0xff] }
  0x47   : > { %2388 = vmatprep.subr.mxu0 %v2642_v9  ;;  %2456 = vmatprep.subr.mxu1 %v2642_v9  ;;  %v2016_v51 = vld [vmem:[%s2633_s8 + $0x3a0] sm:$0xff] }
  0x48   : > { %2389 = vmatpush3.msra.mxu0 %v2642_v9  ;;  %2457 = vmatpush3.msra.mxu1 %v2642_v9  ;;  %v1897_v9 = vld [vmem:[%s2633_s8 + $0x1f8] sm:$0xff] }
  0x49   : > { %2285 = vmatmul.mubr.msk.f32.gmra.mxu0 %vm213_vm1, %v202_v52  ;;  %2353 = vmatmul.mubr.msk.f32.gmra.mxu1 %vm213_vm1, %v1887_v53  ;;  %v1952_v52 = vld [vmem:[%s2633_s8 + $0x2a8] sm:$0xff] }
  0x4a   : > { %2287 = vmatprep.mubr.msk.f32.mxu0 %vm213_vm1, %v203_v54  ;;  %2355 = vmatprep.mubr.msk.f32.mxu1 %vm213_vm1, %v1888_v55  ;;  %v2017_v53 = vld [vmem:[%s2633_s8 + $0x3a8] sm:$0xff]  ;;  %v1953_v54 = vld [vmem:[%s2633_s8 + $0x2b0] sm:$0xff] }
  0x4b   : > { %v2018_v55 = vld [vmem:[%s2633_s8 + $0x3b0] sm:$0xff] }
  0x4d   : > { %2288 = vmatmul.mubr.msk.f32.gmra.mxu0 %vm213_vm1, %v204_v56  ;;  %2356 = vmatmul.mubr.msk.f32.gmra.mxu1 %vm213_vm1, %v1889_v57  ;;  %v1954_v56 = vld [vmem:[%s2633_s8 + $0x2b8] sm:$0xff] }
  0x4e   : > { %2290 = vmatprep.mubr.msk.f32.mxu0 %vm213_vm1, %v205_v58  ;;  %2358 = vmatprep.mubr.msk.f32.mxu1 %vm213_vm1, %v1890_v59  ;;  %v2019_v57 = vld [vmem:[%s2633_s8 + $0x3b8] sm:$0xff]  ;;  %v1955_v58 = vld [vmem:[%s2633_s8 + $0x2c0] sm:$0xff] }
  0x4f   : > { %v2020_v59 = vld [vmem:[%s2633_s8 + $0x3c0] sm:$0xff] }
  0x51   : > { %2291 = vmatmul.mubr.msk.f32.gmra.mxu0 %vm213_vm1, %v206_v60  ;;  %2359 = vmatmul.mubr.msk.f32.gmra.mxu1 %vm213_vm1, %v1891_v61  ;;  %v1956_v60 = vld [vmem:[%s2633_s8 + $0x2c8] sm:$0xff] }
  0x52   : > { %2293 = vmatprep.mubr.msk.f32.mxu0 %vm213_vm1, %v207_v62  ;;  %2361 = vmatprep.mubr.msk.f32.mxu1 %vm213_vm1, %v1892_v63  ;;  %v2021_v61 = vld [vmem:[%s2633_s8 + $0x3c8] sm:$0xff]  ;;  %v1957_v62 = vld [vmem:[%s2633_s8 + $0x2d0] sm:$0xff] }
  0x53   : > { %v2022_v63 = vld [vmem:[%s2633_s8 + $0x3d0] sm:$0xff] }
  0x55   : > { %2294 = vmatmul.mubr.msk.f32.gmra.mxu0 %vm213_vm1, %v208_v0  ;;  %2362 = vmatmul.mubr.msk.f32.gmra.mxu1 %vm213_vm1, %v1893_v1  ;;  %v1958_v0 = vld [vmem:[%s2633_s8 + $0x2d8] sm:$0xff] }
  0x56   : > { %2296 = vmatprep.mubr.msk.f32.mxu0 %vm213_vm1, %v209_v2  ;;  %2364 = vmatprep.mubr.msk.f32.mxu1 %vm213_vm1, %v1894_v3  ;;  %v2023_v1 = vld [vmem:[%s2633_s8 + $0x3d8] sm:$0xff]  ;;  %v1959_v2 = vld [vmem:[%s2633_s8 + $0x2e0] sm:$0xff] }
  0x57   : > { %v2024_v3 = vld [vmem:[%s2633_s8 + $0x3e0] sm:$0xff] }
  0x59   : > { %2297 = vmatmul.mubr.msk.f32.gmra.mxu0 %vm213_vm1, %v210_v4  ;;  %2365 = vmatmul.mubr.msk.f32.gmra.mxu1 %vm213_vm1, %v1895_v5  ;;  %v1960_v4 = vld [vmem:[%s2633_s8 + $0x2e8] sm:$0xff] }
  0x5a   : > { %2299 = vmatprep.mubr.msk.f32.mxu0 %vm213_vm1, %v211_v6  ;;  %2367 = vmatprep.mubr.msk.f32.mxu1 %vm213_vm1, %v1896_v7  ;;  %v2025_v5 = vld [vmem:[%s2633_s8 + $0x3e8] sm:$0xff]  ;;  %v1961_v6 = vld [vmem:[%s2633_s8 + $0x2f0] sm:$0xff] }
  0x5b   : > { %v2026_v7 = vld [vmem:[%s2633_s8 + $0x3f0] sm:$0xff] }
  0x5d   : > { %2300 = vmatmul.mubr.msk.f32.gmra.mxu0 %vm213_vm1, %v212_v8  ;;  %2368 = vmatmul.mubr.msk.f32.gmra.mxu1 %vm213_vm1, %v1897_v9  ;;  %v1962_v8 = vld [vmem:[%s2633_s8 + $0x2f8] sm:$0xff] }
  0x5e   : > { %2390 = vmatprep.mubr.msk.f32.mxu0 %vm213_vm1, %v1931_v10  ;;  %2458 = vmatprep.mubr.msk.f32.mxu1 %vm213_vm1, %v1996_v11  ;;  %v2027_v9 = vld [vmem:[%s2633_s8 + $0x3f8] sm:$0xff] }
  0x61   : > { %2391 = vmatmul.mubr.msk.f32.vlgmr.msra.gmra.mxu0 %vm213_vm1, %v1932_v12  ;;  %2459 = vmatmul.mubr.msk.f32.vlgmr.msra.gmra.mxu1 %vm213_vm1, %v1997_v13 }
  0x62   : > { %2393 = vmatprep.mubr.msk.f32.mxu0 %vm213_vm1, %v1933_v14  ;;  %2461 = vmatprep.mubr.msk.f32.mxu1 %vm213_vm1, %v1998_v15 }
  0x65   : > { %2394 = vmatmul.mubr.msk.f32.gmra.mxu0 %vm213_vm1, %v1934_v16  ;;  %2462 = vmatmul.mubr.msk.f32.gmra.mxu1 %vm213_vm1, %v1999_v17 }
  0x66   : > { %2396 = vmatprep.mubr.msk.f32.mxu0 %vm213_vm1, %v1935_v18  ;;  %2464 = vmatprep.mubr.msk.f32.mxu1 %vm213_vm1, %v2000_v19 }
  0x69   : > { %2397 = vmatmul.mubr.msk.f32.gmra.mxu0 %vm213_vm1, %v1936_v20  ;;  %2465 = vmatmul.mubr.msk.f32.gmra.mxu1 %vm213_vm1, %v2001_v21 }
  0x6a   : > { %2399 = vmatprep.mubr.msk.f32.mxu0 %vm213_vm1, %v1937_v22  ;;  %2467 = vmatprep.mubr.msk.f32.mxu1 %vm213_vm1, %v2002_v23 }
  0x6d   : > { %2400 = vmatmul.mubr.msk.f32.gmra.mxu0 %vm213_vm1, %v1938_v24  ;;  %2468 = vmatmul.mubr.msk.f32.gmra.mxu1 %vm213_vm1, %v2003_v25 }
  0x6e   : > { %2402 = vmatprep.mubr.msk.f32.mxu0 %vm213_vm1, %v1939_v26  ;;  %2470 = vmatprep.mubr.msk.f32.mxu1 %vm213_vm1, %v2004_v27 }
  0x71   : > { %2403 = vmatmul.mubr.msk.f32.gmra.mxu0 %vm213_vm1, %v1940_v28  ;;  %2471 = vmatmul.mubr.msk.f32.gmra.mxu1 %vm213_vm1, %v2005_v29 }
  0x72   : > { %2405 = vmatprep.mubr.msk.f32.mxu0 %vm213_vm1, %v1941_v30  ;;  %2473 = vmatprep.mubr.msk.f32.mxu1 %vm213_vm1, %v2006_v31 }
  0x75   : > { %2406 = vmatmul.mubr.msk.f32.gmra.mxu0 %vm213_vm1, %v1942_v32  ;;  %2474 = vmatmul.mubr.msk.f32.gmra.mxu1 %vm213_vm1, %v2007_v33 }
  0x76   : > { %2408 = vmatprep.mubr.msk.f32.mxu0 %vm213_vm1, %v1943_v34  ;;  %2476 = vmatprep.mubr.msk.f32.mxu1 %vm213_vm1, %v2008_v35 }
  0x79   : > { %2409 = vmatmul.mubr.msk.f32.gmra.mxu0 %vm213_vm1, %v1944_v36  ;;  %2477 = vmatmul.mubr.msk.f32.gmra.mxu1 %vm213_vm1, %v2009_v37 }
  0x7a   : > { %2411 = vmatprep.mubr.msk.f32.mxu0 %vm213_vm1, %v1945_v38  ;;  %2479 = vmatprep.mubr.msk.f32.mxu1 %vm213_vm1, %v2010_v39 }
  0x7d   : > { %2412 = vmatmul.mubr.msk.f32.gmra.mxu0 %vm213_vm1, %v1946_v40  ;;  %2480 = vmatmul.mubr.msk.f32.gmra.mxu1 %vm213_vm1, %v2011_v41 }
  0x7e   : > { %2414 = vmatprep.mubr.msk.f32.mxu0 %vm213_vm1, %v1947_v42  ;;  %2482 = vmatprep.mubr.msk.f32.mxu1 %vm213_vm1, %v2012_v43 }
  0x81   : > { %2415 = vmatmul.mubr.msk.f32.gmra.mxu0 %vm213_vm1, %v1948_v44  ;;  %2483 = vmatmul.mubr.msk.f32.gmra.mxu1 %vm213_vm1, %v2013_v45 }
  0x82   : > { %2417 = vmatprep.mubr.msk.f32.mxu0 %vm213_vm1, %v1949_v46  ;;  %2485 = vmatprep.mubr.msk.f32.mxu1 %vm213_vm1, %v2014_v47 }
  0x85   : > { %2418 = vmatmul.mubr.msk.f32.gmra.mxu0 %vm213_vm1, %v1950_v48  ;;  %2486 = vmatmul.mubr.msk.f32.gmra.mxu1 %vm213_vm1, %v2015_v49 }
  0x86   : > { %2420 = vmatprep.mubr.msk.f32.mxu0 %vm213_vm1, %v1951_v50  ;;  %2488 = vmatprep.mubr.msk.f32.mxu1 %vm213_vm1, %v2016_v51 }
  0x89   : > { %2421 = vmatmul.mubr.msk.f32.gmra.mxu0 %vm213_vm1, %v1952_v52  ;;  %2489 = vmatmul.mubr.msk.f32.gmra.mxu1 %vm213_vm1, %v2017_v53 }
  0x8a   : > { %2423 = vmatprep.mubr.msk.f32.mxu0 %vm213_vm1, %v1953_v54  ;;  %2491 = vmatprep.mubr.msk.f32.mxu1 %vm213_vm1, %v2018_v55 }
  0x8d   : > { %2424 = vmatmul.mubr.msk.f32.gmra.mxu0 %vm213_vm1, %v1954_v56  ;;  %2492 = vmatmul.mubr.msk.f32.gmra.mxu1 %vm213_vm1, %v2019_v57 }
  0x8e   : > { %2426 = vmatprep.mubr.msk.f32.mxu0 %vm213_vm1, %v1955_v58  ;;  %2494 = vmatprep.mubr.msk.f32.mxu1 %vm213_vm1, %v2020_v59 }
  0x91   : > { %2427 = vmatmul.mubr.msk.f32.gmra.mxu0 %vm213_vm1, %v1956_v60  ;;  %2495 = vmatmul.mubr.msk.f32.gmra.mxu1 %vm213_vm1, %v2021_v61 }
  0x92   : > { %2429 = vmatprep.mubr.msk.f32.mxu0 %vm213_vm1, %v1957_v62  ;;  %2497 = vmatprep.mubr.msk.f32.mxu1 %vm213_vm1, %v2022_v63 }
  0x95   : > { %2430 = vmatmul.mubr.msk.f32.gmra.mxu0 %vm213_vm1, %v1958_v0  ;;  %2498 = vmatmul.mubr.msk.f32.gmra.mxu1 %vm213_vm1, %v2023_v1 }
  0x96   : > { %2432 = vmatprep.mubr.msk.f32.mxu0 %vm213_vm1, %v1959_v2  ;;  %2500 = vmatprep.mubr.msk.f32.mxu1 %vm213_vm1, %v2024_v3 }
  0x99   : > { %2433 = vmatmul.mubr.msk.f32.gmra.mxu0 %vm213_vm1, %v1960_v4  ;;  %2501 = vmatmul.mubr.msk.f32.gmra.mxu1 %vm213_vm1, %v2025_v5 }
  0x9a   : > { %2435 = vmatprep.mubr.msk.f32.mxu0 %vm213_vm1, %v1961_v6  ;;  %2503 = vmatprep.mubr.msk.f32.mxu1 %vm213_vm1, %v2026_v7 }
  0x9d   : > { %2436 = vmatmul.mubr.msk.f32.gmra.mxu0 %vm213_vm1, %v1962_v8  ;;  %2504 = vmatmul.mubr.msk.f32.gmra.mxu1 %vm213_vm1, %v2027_v9 }
  0xe1   : > { %v2952_v10 = vpop.f32.mrf.mxu0  ;;  %v2954_v11 = vpop.f32.mrf.mxu1 }
  0xe3   : > { %v2956_v12 = vpop.f32.mrf.mxu0  ;;  %v2958_v13 = vpop.f32.mrf.mxu1 }
  0xe5   : > { %v2960_v14 = vpop.f32.mrf.mxu0  ;;  %v2962_v15 = vpop.f32.mrf.mxu1 }
  0xe7   : > { %v2964_v16 = vpop.f32.mrf.mxu0  ;;  %v2966_v17 = vpop.f32.mrf.mxu1 }
  0xe9   : > { %v2968_v18 = vpop.f32.mrf.mxu0  ;;  %v2970_v19 = vpop.f32.mrf.mxu1 }
  0xeb   : > { %v2972_v20 = vpop.f32.mrf.mxu0  ;;  %v2974_v21 = vpop.f32.mrf.mxu1 }
  0xed   : > { %v2976_v22 = vpop.f32.mrf.mxu0  ;;  %v2978_v23 = vpop.f32.mrf.mxu1 }
  0xef   : > { %v2980_v24 = vpop.f32.mrf.mxu0  ;;  %v2982_v25 = vpop.f32.mrf.mxu1 }
  0xf1   : > { %v2984_v26 = vpop.f32.mrf.mxu0  ;;  %v2986_v27 = vpop.f32.mrf.mxu1 }
  0xf3   : > { %v2988_v28 = vpop.f32.mrf.mxu0  ;;  %v2990_v29 = vpop.f32.mrf.mxu1 }
  0xf5   : > { %v2992_v30 = vpop.f32.mrf.mxu0  ;;  %v2994_v31 = vpop.f32.mrf.mxu1 }
  0xf7   : > { %v2996_v32 = vpop.f32.mrf.mxu0  ;;  %v2998_v33 = vpop.f32.mrf.mxu1 }
  0xf9   : > { %v3000_v34 = vpop.f32.mrf.mxu0  ;;  %v3002_v35 = vpop.f32.mrf.mxu1 }
  0xfb   : > { %v3004_v36 = vpop.f32.mrf.mxu0  ;;  %v3006_v37 = vpop.f32.mrf.mxu1 }
  0xfd   : > { %v3008_v38 = vpop.f32.mrf.mxu0  ;;  %v3010_v39 = vpop.f32.mrf.mxu1 }
  0xff   : > { %v3012_v40 = vpop.f32.mrf.mxu0  ;;  %v3014_v41 = vpop.f32.mrf.mxu1 }
 0x101   : > { %v3016_v42 = vpop.f32.mrf.mxu0  ;;  %v3018_v43 = vpop.f32.mrf.mxu1 }
 0x103   : > { %v3020_v44 = vpop.f32.mrf.mxu0  ;;  %v3022_v45 = vpop.f32.mrf.mxu1 }
 0x105   : > { %v3024_v46 = vpop.f32.mrf.mxu0  ;;  %v3026_v47 = vpop.f32.mrf.mxu1 }
 0x107   : > { %v3028_v48 = vpop.f32.mrf.mxu0  ;;  %v3030_v49 = vpop.f32.mrf.mxu1 }
 0x109   : > { %v3032_v50 = vpop.f32.mrf.mxu0  ;;  %v3034_v51 = vpop.f32.mrf.mxu1 }
 0x10b   : > { %v3036_v52 = vpop.f32.mrf.mxu0  ;;  %v3038_v53 = vpop.f32.mrf.mxu1 }
 0x10d   : > { %v3040_v54 = vpop.f32.mrf.mxu0  ;;  %v3042_v55 = vpop.f32.mrf.mxu1 }
 0x10f   : > { %v3044_v56 = vpop.f32.mrf.mxu0  ;;  %v3046_v57 = vpop.f32.mrf.mxu1 }
 0x111   : > { %v3048_v58 = vpop.f32.mrf.mxu0  ;;  %v3050_v59 = vpop.f32.mrf.mxu1 }
 0x113   : > { %v3052_v60 = vpop.f32.mrf.mxu0  ;;  %v3054_v61 = vpop.f32.mrf.mxu1 }
 0x114   : > { %3258 = vst [vmem:[#allocation2_spill] sm:$0xff] %v3052_v60 }
 0x115   : > { %v3056_v62 = vpop.f32.mrf.mxu0  ;;  %v3058_v63 = vpop.f32.mrf.mxu1 }
 0x116   : > { %3259 = vst [vmem:[#allocation3_spill] sm:$0xff] %v3056_v62  ;;  %3260 = vst [vmem:[#allocation4_spill] sm:$0xff] %v3058_v63 }
 0x117   : > { %v3060_v0 = vpop.f32.mrf.mxu0  ;;  %v3062_v1 = vpop.f32.mrf.mxu1 }
 0x118   : > { %3261 = vst [vmem:[#allocation5_spill] sm:$0xff] %v3060_v0  ;;  %3262 = vst [vmem:[#allocation6_spill] sm:$0xff] %v3062_v1  ;;  %v894_v0 = vmax.f32 %v2952_v10, %v2954_v11 }
 0x119   : > { %v3064_v2 = vpop.f32.mrf.mxu0  ;;  %v3066_v3 = vpop.f32.mrf.mxu1 }
 0x11a   : > { %3263 = vst [vmem:[#allocation7_spill] sm:$0xff] %v3064_v2  ;;  %3264 = vst [vmem:[#allocation8_spill] sm:$0xff] %v3066_v3  ;;  %v893_v2 = vmax.f32 %v2956_v12, %v2958_v13  ;;  %v895_v12 = vmax.f32 %v2964_v16, %v2966_v17  ;;  %v897_v16 = vmax.f32 %v2972_v20, %v2974_v21 }
 0x11b   : > { %v3068_v4 = vpop.f32.mrf.mxu0  ;;  %v3070_v5 = vpop.f32.mrf.mxu1  ;;  %v899_v21 = vmax.f32 %v2980_v24, %v2982_v25  ;;  %v901_v25 = vmax.f32 %v2988_v28, %v2990_v29  ;;  %v903_v29 = vmax.f32 %v2996_v32, %v2998_v33  ;;  %v905_v33 = vmax.f32 %v3004_v36, %v3006_v37 }
 0x11c   : > { %3265 = vst [vmem:[#allocation9_spill] sm:$0xff] %v3068_v4  ;;  %3266 = vst [vmem:[#allocation10_spill] sm:$0xff] %v3070_v5  ;;  %v907_v37 = vmax.f32 %v3012_v40, %v3014_v41  ;;  %v909_v41 = vmax.f32 %v3020_v44, %v3022_v45  ;;  %v911_v45 = vmax.f32 %v3028_v48, %v3030_v49 }
 0x11d   : > { %v3072_v6 = vpop.f32.mrf.mxu0  ;;  %v3074_v7 = vpop.f32.mrf.mxu1  ;;  %v913_v49 = vmax.f32 %v3036_v52, %v3038_v53  ;;  %v915_v53 = vmax.f32 %v3044_v56, %v3046_v57  ;;  %v3271_v57 = vld [vmem:[#allocation2_spill] sm:$0xff] }
 0x11e   : > { %3267 = vst [vmem:[#allocation11_spill] sm:$0xff] %v3072_v6  ;;  %3268 = vst [vmem:[#allocation12_spill] sm:$0xff] %v3074_v7  ;;  %v3088_v6 = vld [vmem:[%s3256_s2] ss:$0 sm:$0xff] }
 0x11f   : > { %v3076_v8 = vpop.f32.mrf.mxu0  ;;  %v3078_v9 = vpop.f32.mrf.mxu1 }
 0x120   : > { %3269 = vst [vmem:[#allocation13_spill] sm:$0xff] %v3076_v8  ;;  %3270 = vst [vmem:[#allocation14_spill] sm:$0xff] %v3078_v9  ;;  %v896_v8 = vmax.f32 %v2960_v14, %v2962_v15 }
 0x121   : > { %v2392_v1 = vpop.f32.mrf.mxu0  ;;  %v2460_v62 = vpop.f32.mrf.mxu1 }
 0x122   : > { %v1280_v3 = vmax.f32 %v894_v0, %v2392_v1 }
 0x123   : > { %v1120_v7 = vpop.f32.mrf.mxu0  ;;  %v1506_v4 = vpop.f32.mrf.mxu1 }
 0x124   : > { %v1666_v9 = vmax.f32 %v1280_v3, %v2460_v62  ;;  %v1279_v5 = vmax.f32 %v893_v2, %v1120_v7  ;;  %v898_v62 = vmax.f32 %v2968_v18, %v2970_v19  ;;  %v900_v19 = vmax.f32 %v2976_v22, %v2978_v23 }
 0x125   : > { %v2395_v10 = vpop.f32.mrf.mxu0  ;;  %v2463_v11 = vpop.f32.mrf.mxu1  ;;  %v902_v23 = vmax.f32 %v2984_v26, %v2986_v27  ;;  %v904_v27 = vmax.f32 %v2992_v30, %v2994_v31  ;;  %v906_v31 = vmax.f32 %v3000_v34, %v3002_v35  ;;  %v908_v35 = vmax.f32 %v3008_v38, %v3010_v39 }
 0x126   : > { %v1705_v13 = vadd.f32 %v3088_v6, %v1666_v9  ;;  %v1665_v0 = vmax.f32 %v1279_v5, %v1506_v4  ;;  %v1282_v1 = vmax.f32 %v896_v8, %v2395_v10  ;;  %v910_v39 = vmax.f32 %v3016_v42, %v3018_v43 }
 0x127   : > { %v1130_v14 = vpop.f32.mrf.mxu0  ;;  %v1516_v15 = vpop.f32.mrf.mxu1  ;;  %v912_v43 = vmax.f32 %v3024_v46, %v3026_v47  ;;  %v914_v47 = vmax.f32 %v3032_v50, %v3034_v51  ;;  %v916_v51 = vmax.f32 %v3040_v54, %v3042_v55  ;;  %v918_v55 = vmax.f32 %v3048_v58, %v3050_v59  ;;  %v3272_v59 = vld [vmem:[#allocation4_spill] sm:$0xff] }
 0x128   : > { %1738 = vst.msk [vmem:[%s3095_s18 + $0x8] sm:$0xff] %vm1736_vm2, %v1705_v13  ;;  %v1704_v2 = vadd.f32 %v3088_v6, %v1665_v0  ;;  %v1668_v3 = vmax.f32 %v1282_v1, %v2463_v11  ;;  %v1281_v7 = vmax.f32 %v895_v12, %v1130_v14 }
 0x129   : > { %v2398_v63 = vpop.f32.mrf.mxu0  ;;  %v2466_v60 = vpop.f32.mrf.mxu1 }
 0x12a   : > { %1737 = vst.msk [vmem:[%s3095_s18] sm:$0xff] %vm1736_vm2, %v1704_v2  ;;  %v1707_v17 = vadd.f32 %v3088_v6, %v1668_v3  ;;  %v1667_v4 = vmax.f32 %v1281_v7, %v1516_v15  ;;  %v1284_v5 = vmax.f32 %v898_v62, %v2398_v63 }
 0x12b   : > { %v1140_v8 = vpop.f32.mrf.mxu0  ;;  %v1526_v18 = vpop.f32.mrf.mxu1 }
 0x12c   : > { %1740 = vst.msk [vmem:[%s3095_s18 + $0x18] sm:$0xff] %vm1736_vm2, %v1707_v17  ;;  %v1706_v9 = vadd.f32 %v3088_v6, %v1667_v4  ;;  %v1670_v10 = vmax.f32 %v1284_v5, %v2466_v60  ;;  %v1283_v11 = vmax.f32 %v897_v16, %v1140_v8 }
 0x12d   : > { %v2401_v12 = vpop.f32.mrf.mxu0  ;;  %v2469_v20 = vpop.f32.mrf.mxu1 }
 0x12e   : > { %1739 = vst.msk [vmem:[%s3095_s18 + $0x10] sm:$0xff] %vm1736_vm2, %v1706_v9  ;;  %v1709_v63 = vadd.f32 %v3088_v6, %v1670_v10  ;;  %v1669_v13 = vmax.f32 %v1283_v11, %v1526_v18  ;;  %v1286_v0 = vmax.f32 %v900_v19, %v2401_v12 }
 0x12f   : > { %v1150_v1 = vpop.f32.mrf.mxu0  ;;  %v1536_v22 = vpop.f32.mrf.mxu1 }
 0x130   : > { %1742 = vst.msk [vmem:[%s3095_s18 + $0x28] sm:$0xff] %vm1736_vm2, %v1709_v63  ;;  %v1708_v60 = vadd.f32 %v3088_v6, %v1669_v13  ;;  %v1672_v14 = vmax.f32 %v1286_v0, %v2469_v20  ;;  %v1285_v15 = vmax.f32 %v899_v21, %v1150_v1 }
 0x131   : > { %v2404_v62 = vpop.f32.mrf.mxu0  ;;  %v2472_v24 = vpop.f32.mrf.mxu1 }
 0x132   : > { %1741 = vst.msk [vmem:[%s3095_s18 + $0x20] sm:$0xff] %vm1736_vm2, %v1708_v60  ;;  %v1711_v2 = vadd.f32 %v3088_v6, %v1672_v14  ;;  %v1671_v3 = vmax.f32 %v1285_v15, %v1536_v22  ;;  %v1288_v7 = vmax.f32 %v902_v23, %v2404_v62 }
 0x133   : > { %v1160_v16 = vpop.f32.mrf.mxu0  ;;  %v1546_v26 = vpop.f32.mrf.mxu1 }
 0x134   : > { %1744 = vst.msk [vmem:[%s3095_s18 + $0x38] sm:$0xff] %vm1736_vm2, %v1711_v2  ;;  %v1710_v17 = vadd.f32 %v3088_v6, %v1671_v3  ;;  %v1674_v4 = vmax.f32 %v1288_v7, %v2472_v24  ;;  %v1287_v5 = vmax.f32 %v901_v25, %v1160_v16 }
 0x135   : > { %v2407_v8 = vpop.f32.mrf.mxu0  ;;  %v2475_v28 = vpop.f32.mrf.mxu1 }
 0x136   : > { %1743 = vst.msk [vmem:[%s3095_s18 + $0x30] sm:$0xff] %vm1736_vm2, %v1710_v17  ;;  %v1713_v18 = vadd.f32 %v3088_v6, %v1674_v4  ;;  %v1673_v19 = vmax.f32 %v1287_v5, %v1546_v26  ;;  %v1290_v9 = vmax.f32 %v904_v27, %v2407_v8 }
 0x137   : > { %v1170_v10 = vpop.f32.mrf.mxu0  ;;  %v1556_v30 = vpop.f32.mrf.mxu1 }
 0x138   : > { %1746 = vst.msk [vmem:[%s3095_s18 + $0x48] sm:$0xff] %vm1736_vm2, %v1713_v18  ;;  %v1712_v11 = vadd.f32 %v3088_v6, %v1673_v19  ;;  %v1676_v12 = vmax.f32 %v1290_v9, %v2475_v28  ;;  %v1289_v20 = vmax.f32 %v903_v29, %v1170_v10 }
 0x139   : > { %v2410_v21 = vpop.f32.mrf.mxu0  ;;  %v2478_v32 = vpop.f32.mrf.mxu1 }
 0x13a   : > { %1745 = vst.msk [vmem:[%s3095_s18 + $0x40] sm:$0xff] %vm1736_vm2, %v1712_v11  ;;  %v1715_v63 = vadd.f32 %v3088_v6, %v1676_v12  ;;  %v1675_v13 = vmax.f32 %v1289_v20, %v1556_v30  ;;  %v1292_v0 = vmax.f32 %v906_v31, %v2410_v21 }
 0x13b   : > { %v1180_v1 = vpop.f32.mrf.mxu0  ;;  %v1566_v34 = vpop.f32.mrf.mxu1 }
 0x13c   : > { %1748 = vst.msk [vmem:[%s3095_s18 + $0x58] sm:$0xff] %vm1736_vm2, %v1715_v63  ;;  %v1714_v22 = vadd.f32 %v3088_v6, %v1675_v13  ;;  %v1678_v23 = vmax.f32 %v1292_v0, %v2478_v32  ;;  %v1291_v60 = vmax.f32 %v905_v33, %v1180_v1 }
 0x13d   : > { %v2413_v14 = vpop.f32.mrf.mxu0  ;;  %v2481_v36 = vpop.f32.mrf.mxu1 }
 0x13e   : > { %1747 = vst.msk [vmem:[%s3095_s18 + $0x50] sm:$0xff] %vm1736_vm2, %v1714_v22  ;;  %v1717_v15 = vadd.f32 %v3088_v6, %v1678_v23  ;;  %v1677_v62 = vmax.f32 %v1291_v60, %v1566_v34  ;;  %v1294_v24 = vmax.f32 %v908_v35, %v2413_v14 }
 0x13f   : > { %v1190_v25 = vpop.f32.mrf.mxu0  ;;  %v1576_v38 = vpop.f32.mrf.mxu1 }
 0x140   : > { %1750 = vst.msk [vmem:[%s3095_s18 + $0x68] sm:$0xff] %vm1736_vm2, %v1717_v15  ;;  %v1716_v2 = vadd.f32 %v3088_v6, %v1677_v62  ;;  %v1680_v3 = vmax.f32 %v1294_v24, %v2481_v36  ;;  %v1293_v7 = vmax.f32 %v907_v37, %v1190_v25  ;;  %v917_v15 = vmax.f32 %v3271_v57, %v3054_v61 }
 0x141   : > { %v2416_v16 = vpop.f32.mrf.mxu0  ;;  %v2484_v40 = vpop.f32.mrf.mxu1 }
 0x142   : > { %1749 = vst.msk [vmem:[%s3095_s18 + $0x60] sm:$0xff] %vm1736_vm2, %v1716_v2  ;;  %v1719_v26 = vadd.f32 %v3088_v6, %v1680_v3  ;;  %v1679_v27 = vmax.f32 %v1293_v7, %v1576_v38  ;;  %v1296_v17 = vmax.f32 %v910_v39, %v2416_v16  ;;  %v3273_v39 = vld [vmem:[#allocation3_spill] sm:$0xff] }
 0x143   : > { %v1200_v4 = vpop.f32.mrf.mxu0  ;;  %v1586_v42 = vpop.f32.mrf.mxu1  ;;  %v920_v2 = vmax.f32 %v3273_v39, %v3272_v59 }
 0x144   : > { %1752 = vst.msk [vmem:[%s3095_s18 + $0x78] sm:$0xff] %vm1736_vm2, %v1719_v26  ;;  %v1718_v5 = vadd.f32 %v3088_v6, %v1679_v27  ;;  %v1682_v8 = vmax.f32 %v1296_v17, %v2484_v40  ;;  %v1295_v28 = vmax.f32 %v909_v41, %v1200_v4  ;;  %v3274_v41 = vld [vmem:[#allocation6_spill] sm:$0xff]  ;;  %v3275_v26 = vld [vmem:[#allocation5_spill] sm:$0xff] }
 0x145   : > { %v2419_v29 = vpop.f32.mrf.mxu0  ;;  %v2487_v44 = vpop.f32.mrf.mxu1  ;;  %v919_v27 = vmax.f32 %v3275_v26, %v3274_v41 }
 0x146   : > { %1751 = vst.msk [vmem:[%s3095_s18 + $0x70] sm:$0xff] %vm1736_vm2, %v1718_v5  ;;  %v1721_v18 = vadd.f32 %v3088_v6, %v1682_v8  ;;  %v1681_v19 = vmax.f32 %v1295_v28, %v1586_v42  ;;  %v1298_v9 = vmax.f32 %v912_v43, %v2419_v29  ;;  %v3276_v8 = vld [vmem:[#allocation8_spill] sm:$0xff]  ;;  %v3277_v28 = vld [vmem:[#allocation7_spill] sm:$0xff] }
 0x147   : > { %v1210_v10 = vpop.f32.mrf.mxu0  ;;  %v1596_v46 = vpop.f32.mrf.mxu1  ;;  %v922_v29 = vmax.f32 %v3277_v28, %v3276_v8 }
 0x148   : > { %1754 = vst.msk [vmem:[%s3095_s18 + $0x88] sm:$0xff] %vm1736_vm2, %v1721_v18  ;;  %v1720_v30 = vadd.f32 %v3088_v6, %v1681_v19  ;;  %v1684_v31 = vmax.f32 %v1298_v9, %v2487_v44  ;;  %v1297_v11 = vmax.f32 %v911_v45, %v1210_v10  ;;  %v3278_v10 = vld [vmem:[#allocation10_spill] sm:$0xff] }
 0x149   : > { %v2422_v12 = vpop.f32.mrf.mxu0  ;;  %v2490_v48 = vpop.f32.mrf.mxu1 }
 0x14a   : > { %1753 = vst.msk [vmem:[%s3095_s18 + $0x80] sm:$0xff] %vm1736_vm2, %v1720_v30  ;;  %v1723_v20 = vadd.f32 %v3088_v6, %v1684_v31  ;;  %v1683_v21 = vmax.f32 %v1297_v11, %v1596_v46  ;;  %v1300_v32 = vmax.f32 %v914_v47, %v2422_v12  ;;  %v3279_v46 = vld [vmem:[#allocation9_spill] sm:$0xff] }
 0x14b   : > { %v1220_v33 = vpop.f32.mrf.mxu0  ;;  %v1606_v50 = vpop.f32.mrf.mxu1  ;;  %v921_v47 = vmax.f32 %v3279_v46, %v3278_v10 }
 0x14c   : > { %1756 = vst.msk [vmem:[%s3095_s18 + $0x98] sm:$0xff] %vm1736_vm2, %v1723_v20  ;;  %v1722_v63 = vadd.f32 %v3088_v6, %v1683_v21  ;;  %v1686_v13 = vmax.f32 %v1300_v32, %v2490_v48  ;;  %v1299_v0 = vmax.f32 %v913_v49, %v1220_v33  ;;  %v3280_v49 = vld [vmem:[#allocation12_spill] sm:$0xff]  ;;  %v3281_v20 = vld [vmem:[#allocation11_spill] sm:$0xff] }
 0x14d   : > { %v2425_v1 = vpop.f32.mrf.mxu0  ;;  %v2493_v52 = vpop.f32.mrf.mxu1  ;;  %v924_v21 = vmax.f32 %v3281_v20, %v3280_v49 }
 0x14e   : > { %1755 = vst.msk [vmem:[%s3095_s18 + $0x90] sm:$0xff] %vm1736_vm2, %v1722_v63  ;;  %v1725_v34 = vadd.f32 %v3088_v6, %v1686_v13  ;;  %v1685_v35 = vmax.f32 %v1299_v0, %v1606_v50  ;;  %v1302_v22 = vmax.f32 %v916_v51, %v2425_v1  ;;  %v3282_v13 = vld [vmem:[#allocation14_spill] sm:$0xff]  ;;  %v3283_v0 = vld [vmem:[#allocation13_spill] sm:$0xff] }
 0x14f   : > { %v1230_v23 = vpop.f32.mrf.mxu0  ;;  %v1616_v54 = vpop.f32.mrf.mxu1  ;;  %v923_v1 = vmax.f32 %v3283_v0, %v3282_v13 }
 0x150   : > { %1758 = vst.msk [vmem:[%s3095_s18 + $0xa8] sm:$0xff] %vm1736_vm2, %v1725_v34  ;;  %v1724_v60 = vadd.f32 %v3088_v6, %v1685_v35  ;;  %v1688_v14 = vmax.f32 %v1302_v22, %v2493_v52  ;;  %v1301_v36 = vmax.f32 %v915_v53, %v1230_v23 }
 0x151   : > { %v2428_v37 = vpop.f32.mrf.mxu0  ;;  %v2496_v56 = vpop.f32.mrf.mxu1 }
 0x152   : > { %1757 = vst.msk [vmem:[%s3095_s18 + $0xa0] sm:$0xff] %vm1736_vm2, %v1724_v60  ;;  %v1727_v62 = vadd.f32 %v3088_v6, %v1688_v14  ;;  %v1687_v24 = vmax.f32 %v1301_v36, %v1616_v54  ;;  %v1304_v25 = vmax.f32 %v918_v55, %v2428_v37 }
 0x153   : > { %v1240_v38 = vpop.f32.mrf.mxu0  ;;  %v1626_v58 = vpop.f32.mrf.mxu1 }
 0x154   : > { %1760 = vst.msk [vmem:[%s3095_s18 + $0xb8] sm:$0xff] %vm1736_vm2, %v1727_v62  ;;  %v1726_v3 = vadd.f32 %v3088_v6, %v1687_v24  ;;  %v1690_v7 = vmax.f32 %v1304_v25, %v2496_v56  ;;  %v1303_v16 = vmax.f32 %v917_v15, %v1240_v38 }
 0x155   : > { %v2431_v40 = vpop.f32.mrf.mxu0  ;;  %v2499_v61 = vpop.f32.mrf.mxu1 }
 0x156   : > { %1759 = vst.msk [vmem:[%s3095_s18 + $0xb0] sm:$0xff] %vm1736_vm2, %v1726_v3  ;;  %v1729_v17 = vadd.f32 %v3088_v6, %v1690_v7  ;;  %v1689_v4 = vmax.f32 %v1303_v16, %v1626_v58  ;;  %v1306_v42 = vmax.f32 %v920_v2, %v2431_v40 }
 0x157   : > { %v1250_v43 = vpop.f32.mrf.mxu0  ;;  %v1636_v5 = vpop.f32.mrf.mxu1 }
 0x158   : > { %1762 = vst.msk [vmem:[%s3095_s18 + $0xc8] sm:$0xff] %vm1736_vm2, %v1729_v17  ;;  %v1728_v44 = vadd.f32 %v3088_v6, %v1689_v4  ;;  %v1692_v45 = vmax.f32 %v1306_v42, %v2499_v61  ;;  %v1305_v18 = vmax.f32 %v919_v27, %v1250_v43 }
 0x159   : > { %v2434_v19 = vpop.f32.mrf.mxu0  ;;  %v2502_v9 = vpop.f32.mrf.mxu1 }
 0x15a   : > { %1761 = vst.msk [vmem:[%s3095_s18 + $0xc0] sm:$0xff] %vm1736_vm2, %v1728_v44  ;;  %v1731_v30 = vadd.f32 %v3088_v6, %v1692_v45  ;;  %v1691_v31 = vmax.f32 %v1305_v18, %v1636_v5  ;;  %v1308_v11 = vmax.f32 %v922_v29, %v2434_v19 }
 0x15b   : > { %v1260_v12 = vpop.f32.mrf.mxu0  ;;  %v1646_v48 = vpop.f32.mrf.mxu1 }
 0x15c   : > { %1764 = vst.msk [vmem:[%s3095_s18 + $0xd8] sm:$0xff] %vm1736_vm2, %v1731_v30  ;;  %v1730_v32 = vadd.f32 %v3088_v6, %v1691_v31  ;;  %v1694_v33 = vmax.f32 %v1308_v11, %v2502_v9  ;;  %v1307_v50 = vmax.f32 %v921_v47, %v1260_v12 }
 0x15d   : > { %v2437_v51 = vpop.f32.mrf.mxu0  ;;  %v2505_v63 = vpop.f32.mrf.mxu1 }
 0x15e   : > { %1763 = vst.msk [vmem:[%s3095_s18 + $0xd0] sm:$0xff] %vm1736_vm2, %v1730_v32  ;;  %v1733_v52 = vadd.f32 %v3088_v6, %v1694_v33  ;;  %v1693_v53 = vmax.f32 %v1307_v50, %v1646_v48  ;;  %v1310_v34 = vmax.f32 %v924_v21, %v2437_v51 }
 0x15f   : > { %v1270_v35 = vpop.f32.mrf.mxu0  ;;  %v1656_v55 = vpop.f32.mrf.mxu1 }
 0x160   : > { %1766 = vst.msk [vmem:[%s3095_s18 + $0xe8] sm:$0xff] %vm1736_vm2, %v1733_v52  ;;  %v1732_v22 = vadd.f32 %v3088_v6, %v1693_v53  ;;  %v1696_v23 = vmax.f32 %v1310_v34, %v2505_v63  ;;  %v1309_v54 = vmax.f32 %v923_v1, %v1270_v35 }
 0x162   : > { %1765 = vst.msk [vmem:[%s3095_s18 + $0xe0] sm:$0xff] %vm1736_vm2, %v1732_v22  ;;  %v1735_v60 = vadd.f32 %v3088_v6, %v1696_v23  ;;  %v1695_v14 = vmax.f32 %v1309_v54, %v1656_v55 }
 0x164   : > { %1768 = vst.msk [vmem:[%s3095_s18 + $0xf8] sm:$0xff] %vm1736_vm2, %v1735_v60  ;;  %v1734_v36 = vadd.f32 %v3088_v6, %v1695_v14 }
 0x166   : > { %1767 = vst.msk [vmem:[%s3095_s18 + $0xf0] sm:$0xff] %vm1736_vm2, %v1734_v36 }
 0x167 PF: > { %s13_s12 = sadd.s32 1, %s2520_s12  }
 0x168   : > { %p10_p4 = scmp.ge.s32.totalorder %s13_s12, 4  }
 0x16a   :  { %12 = sbr.rel (!%p10_p4) target bundleno = 1 (0x1), region = 65 }

// kernel: tudui_forward.5
= control target key start
LH: loop header
LB: loop body
LE: loop exit
PB: predicated region body
PF: predicated region fallthrough
CT: control target
= control target key end

     0   :  { %s3558_s12 = smov 0   ;;  %s5143_s0 = inlined_call_operand.vmem [shape: f32[2,4,64,800], index: 0, kind: input, shape index: {}]   ;;  %s5144_s1 = inlined_call_operand.vmem [shape: f32[800,32], index: 1, kind: input, shape index: {}]   ;;  %s5145_s2 = inlined_call_operand.vmem [shape: f32[1,32], index: 2, kind: input, shape index: {}]   ;;  %s5146_s3 = inlined_call_operand.vmem [shape: f32[2,64,32], index: 3, kind: output, shape index: {}]  }
   0x1 LB: > { %s2377_s13 = sadd.s32 4294967295, %s3536_s12   ;;  %p2381_p0 = scmp.ge.s32.totalorder %s3536_s12, 1  ;;  %s3536_s12 = sphi %s3558_s12, %s13_s12  }
   0x2   : > { %p137_p1 = scmp.lt.s32.totalorder %s3536_s12, 3 }
   0x4   : > { %p138_p2 = pnand %p2381_p0, %p137_p1 }
   0x6   : > { %141 = sbr.rel (%p138_p2) target bundleno = 562 (0x232), region = 32 }
   0xb   : > { %v3569_v0 = vld [vmem:[%s5144_s1 + $0xf8] sm:$0xff]  ;;  %v3591_v4 = vld [vmem:[%s5144_s1 + $0xf0] sm:$0xff]  ;;  %v3613_v8 = vld [vmem:[%s5144_s1 + $0xe8] sm:$0xff]  ;;  %p3766_p3 = scmp.lt.s32.totalorder %s2377_s13, 1  ;;  %vm327_vm0 = vcmask 261120  }
   0xc   : > { %v3574_v1 = vld [vmem:[%s5144_s1 + $0x1f8] sm:$0xff]  ;;  %2589 = vmatprep.subr.mxu0 %v3569_v0  ;;  %v3596_v5 = vld [vmem:[%s5144_s1 + $0x1f0] sm:$0xff]  ;;  %v3620_v9 = vld [vmem:[%s5144_s1 + $0x1e8] sm:$0xff] }
   0xd   : > { %v3579_v2 = vld [vmem:[%s5144_s1 + $0x78] sm:$0xff]  ;;  %2645 = vmatprep.subr.mxu1 %v3574_v1  ;;  %v3603_v6 = vld [vmem:[%s5144_s1 + $0x70] sm:$0xff]  ;;  %v3625_v10 = vld [vmem:[%s5144_s1 + $0x68] sm:$0xff]  ;;  %s5371_s13 = smov (!%p3766_p3, %s2377_s13), 1 }
   0xe   : > { %v3586_v3 = vld [vmem:[%s5144_s1 + $0x178] sm:$0xff]  ;;  %2590 = vmatpush3.msra.mxu0 %v3579_v2  ;;  %v3608_v7 = vld [vmem:[%s5144_s1 + $0x170] sm:$0xff]  ;;  %v3630_v11 = vld [vmem:[%s5144_s1 + $0x168] sm:$0xff]  ;;  %s3421_s15 = smul.u32 1792, %s5371_s13 }
   0xf   : > { %2646 = vmatpush3.msra.mxu1 %v3586_v3  ;;  %2591 = vmatprep.subr.mxu0 %v3591_v4  ;;  %v3637_v12 = vld [vmem:[%s5144_s1 + $0xe0] sm:$0xff]  ;;  %v3661_v16 = vld [vmem:[%s5144_s1 + $0xd8] sm:$0xff]  ;;  %v3685_v20 = vld [vmem:[%s5144_s1 + $0xd0] sm:$0xff] }
  0x10   : > { %2647 = vmatprep.subr.mxu1 %v3596_v5  ;;  %2592 = vmatpush3.msra.mxu0 %v3603_v6  ;;  %v3642_v13 = vld [vmem:[%s5144_s1 + $0x1e0] sm:$0xff]  ;;  %v3666_v17 = vld [vmem:[%s5144_s1 + $0x1d8] sm:$0xff]  ;;  %v3690_v21 = vld [vmem:[%s5144_s1 + $0x1d0] sm:$0xff]  ;;  %s3924_s7 = scalar_lea.vmem %s5143_s0, %s3421_s15 }
  0x11   : > { %2648 = vmatpush3.msra.mxu1 %v3608_v7  ;;  %2593 = vmatprep.subr.mxu0 %v3613_v8  ;;  %v3649_v14 = vld [vmem:[%s5144_s1 + $0x60] sm:$0xff]  ;;  %v3673_v18 = vld [vmem:[%s5144_s1 + $0x58] sm:$0xff]  ;;  %v3697_v22 = vld [vmem:[%s5144_s1 + $0x50] sm:$0xff] }
  0x12   : > { %2649 = vmatprep.subr.mxu1 %v3620_v9  ;;  %v3654_v15 = vld [vmem:[%s5144_s1 + $0x160] sm:$0xff]  ;;  %2594 = vmatpush3.msra.mxu0 %v3625_v10  ;;  %v3678_v19 = vld [vmem:[%s5144_s1 + $0x158] sm:$0xff]  ;;  %v3702_v23 = vld [vmem:[%s5144_s1 + $0x150] sm:$0xff] }
  0x13   : > { %2650 = vmatpush3.msra.mxu1 %v3630_v11  ;;  %2595 = vmatprep.subr.mxu0 %v3637_v12  ;;  %v3709_v24 = vld [vmem:[%s5144_s1 + $0xc8] sm:$0xff]  ;;  %v3733_v28 = vld [vmem:[%s5144_s1 + $0xc0] sm:$0xff]  ;;  %v3757_v32 = vld [vmem:[%s5144_s1 + $0xb8] sm:$0xff] }
  0x14   : > { %2651 = vmatprep.subr.mxu1 %v3642_v13  ;;  %2596 = vmatpush3.msra.mxu0 %v3649_v14  ;;  %v3714_v25 = vld [vmem:[%s5144_s1 + $0x1c8] sm:$0xff]  ;;  %v3738_v29 = vld [vmem:[%s5144_s1 + $0x1c0] sm:$0xff]  ;;  %v3762_v33 = vld [vmem:[%s5144_s1 + $0x1b8] sm:$0xff] }
  0x15   : > { %2652 = vmatpush3.msra.mxu1 %v3654_v15  ;;  %2597 = vmatprep.subr.mxu0 %v3661_v16  ;;  %v3721_v26 = vld [vmem:[%s5144_s1 + $0x48] sm:$0xff]  ;;  %v3745_v30 = vld [vmem:[%s5144_s1 + $0x40] sm:$0xff]  ;;  %v3775_v34 = vld [vmem:[%s5144_s1 + $0x38] sm:$0xff] }
  0x16   : > { %2653 = vmatprep.subr.mxu1 %v3666_v17  ;;  %2598 = vmatpush3.msra.mxu0 %v3673_v18  ;;  %v3726_v27 = vld [vmem:[%s5144_s1 + $0x148] sm:$0xff]  ;;  %v3750_v31 = vld [vmem:[%s5144_s1 + $0x140] sm:$0xff]  ;;  %v3780_v35 = vld [vmem:[%s5144_s1 + $0x138] sm:$0xff] }
  0x17   : > { %2654 = vmatpush3.msra.mxu1 %v3678_v19  ;;  %2599 = vmatprep.subr.mxu0 %v3685_v20  ;;  %v3787_v36 = vld [vmem:[%s5144_s1 + $0xb0] sm:$0xff]  ;;  %v3811_v40 = vld [vmem:[%s5144_s1 + $0xa8] sm:$0xff]  ;;  %v3841_v44 = vld [vmem:[%s5144_s1 + $0xa0] sm:$0xff] }
  0x18   : > { %2655 = vmatprep.subr.mxu1 %v3690_v21  ;;  %2600 = vmatpush3.msra.mxu0 %v3697_v22  ;;  %v3792_v37 = vld [vmem:[%s5144_s1 + $0x1b0] sm:$0xff]  ;;  %v3816_v41 = vld [vmem:[%s5144_s1 + $0x1a8] sm:$0xff]  ;;  %5239 = vst [vmem:[#allocation2_spill] sm:$0xff] %v3841_v44  ;;  %v3846_v45 = vld [vmem:[%s5144_s1 + $0x1a0] sm:$0xff] }
  0x19   : > { %2656 = vmatpush3.msra.mxu1 %v3702_v23  ;;  %2601 = vmatprep.subr.mxu0 %v3709_v24  ;;  %v3799_v38 = vld [vmem:[%s5144_s1 + $0x30] sm:$0xff]  ;;  %v3829_v42 = vld [vmem:[%s5144_s1 + $0x28] sm:$0xff]  ;;  %v3853_v46 = vld [vmem:[%s5144_s1 + $0x20] sm:$0xff] }
  0x1a   : > { %2657 = vmatprep.subr.mxu1 %v3714_v25  ;;  %2602 = vmatpush3.msra.mxu0 %v3721_v26  ;;  %v3804_v39 = vld [vmem:[%s5144_s1 + $0x130] sm:$0xff]  ;;  %v3834_v43 = vld [vmem:[%s5144_s1 + $0x128] sm:$0xff]  ;;  %5240 = vst [vmem:[#allocation3_spill] sm:$0xff] %v3853_v46  ;;  %v3858_v47 = vld [vmem:[%s5144_s1 + $0x120] sm:$0xff] }
  0x1b   : > { %2658 = vmatpush3.msra.mxu1 %v3726_v27  ;;  %2603 = vmatprep.subr.mxu0 %v3733_v28  ;;  %v3865_v48 = vld [vmem:[%s5144_s1 + $0x98] sm:$0xff]  ;;  %v3890_v52 = vld [vmem:[%s5144_s1 + $0x90] sm:$0xff]  ;;  %v3914_v56 = vld [vmem:[%s5144_s1 + $0x88] sm:$0xff] }
  0x1c   : > { %2659 = vmatprep.subr.mxu1 %v3738_v29  ;;  %2604 = vmatpush3.msra.mxu0 %v3745_v30  ;;  %5241 = vst [vmem:[#allocation4_spill] sm:$0xff] %v3865_v48  ;;  %v3870_v49 = vld [vmem:[%s5144_s1 + $0x198] sm:$0xff]  ;;  %5245 = vst [vmem:[#allocation8_spill] sm:$0xff] %v3890_v52  ;;  %v3895_v53 = vld [vmem:[%s5144_s1 + $0x190] sm:$0xff] }
  0x1d   : > { %2660 = vmatpush3.msra.mxu1 %v3750_v31  ;;  %2605 = vmatprep.subr.mxu0 %v3757_v32  ;;  %5242 = vst [vmem:[#allocation5_spill] sm:$0xff] %v3870_v49  ;;  %v3878_v50 = vld [vmem:[%s5144_s1 + $0x18] sm:$0xff]  ;;  %5246 = vst [vmem:[#allocation9_spill] sm:$0xff] %v3895_v53  ;;  %v3902_v54 = vld [vmem:[%s5144_s1 + $0x10] sm:$0xff] }
  0x1e   : > { %2661 = vmatprep.subr.mxu1 %v3762_v33  ;;  %2606 = vmatpush3.msra.mxu0 %v3775_v34  ;;  %5243 = vst [vmem:[#allocation6_spill] sm:$0xff] %v3878_v50  ;;  %v3883_v51 = vld [vmem:[%s5144_s1 + $0x118] sm:$0xff]  ;;  %5247 = vst [vmem:[#allocation10_spill] sm:$0xff] %v3902_v54  ;;  %v3907_v55 = vld [vmem:[%s5144_s1 + $0x110] sm:$0xff] }
  0x1f   : > { %2662 = vmatpush3.msra.mxu1 %v3780_v35  ;;  %2607 = vmatprep.subr.mxu0 %v3787_v36  ;;  %5244 = vst [vmem:[#allocation7_spill] sm:$0xff] %v3883_v51  ;;  %5248 = vst [vmem:[#allocation11_spill] sm:$0xff] %v3907_v55  ;;  %v3919_v57 = vld [vmem:[%s5144_s1 + $0x188] sm:$0xff]  ;;  %v3943_v60 = vld [vmem:[%s5144_s1 + $0x80] sm:$0xff] }
  0x20   : > { %2663 = vmatprep.subr.mxu1 %v3792_v37  ;;  %2608 = vmatpush3.msra.mxu0 %v3799_v38  ;;  %5249 = vst [vmem:[#allocation12_spill] sm:$0xff] %v3914_v56  ;;  %5250 = vst [vmem:[#allocation13_spill] sm:$0xff] %v3919_v57  ;;  %v3931_v58 = vld [vmem:[%s5144_s1 + $0x8] sm:$0xff]  ;;  %v3948_v61 = vld [vmem:[%s5144_s1 + $0x180] sm:$0xff] }
  0x21   : > { %2664 = vmatpush3.msra.mxu1 %v3804_v39  ;;  %2609 = vmatprep.subr.mxu0 %v3811_v40  ;;  %5251 = vst [vmem:[#allocation14_spill] sm:$0xff] %v3931_v58  ;;  %v3936_v59 = vld [vmem:[%s5144_s1 + $0x108] sm:$0xff]  ;;  %5253 = vst [vmem:[#allocation16_spill] sm:$0xff] %v3943_v60  ;;  %v3955_v62 = vld [vmem:[%s5144_s1] sm:$0xff] }
  0x22   : > { %2665 = vmatprep.subr.mxu1 %v3816_v41  ;;  %2610 = vmatpush3.msra.mxu0 %v3829_v42  ;;  %5252 = vst [vmem:[#allocation15_spill] sm:$0xff] %v3936_v59  ;;  %5254 = vst [vmem:[#allocation17_spill] sm:$0xff] %v3948_v61  ;;  %v272_v63 = vld [vmem:[%s3924_s7 + $0x8] sm:$0xff] }
  0x23   : > { %2666 = vmatpush3.msra.mxu1 %v3834_v43  ;;  %2611 = vmatprep.subr.mxu0 %v3841_v44  ;;  %5255 = vst [vmem:[#allocation18_spill] sm:$0xff] %v3955_v62 }
  0x24   : > { %2667 = vmatprep.subr.mxu1 %v3846_v45  ;;  %2612 = vmatpush3.msra.mxu0 %v3853_v46 }
  0x25   : > { %2668 = vmatpush3.msra.mxu1 %v3858_v47  ;;  %2613 = vmatprep.subr.mxu0 %v3865_v48 }
  0x26   : > { %2669 = vmatprep.subr.mxu1 %v3870_v49  ;;  %2614 = vmatpush3.msra.mxu0 %v3878_v50 }
  0x27   : > { %2670 = vmatpush3.msra.mxu1 %v3883_v51  ;;  %2615 = vmatprep.subr.mxu0 %v3890_v52  ;;  %v287_v52 = vld [vmem:[%s3924_s7 + $0x80] sm:$0xff] }
  0x28   : > { %2671 = vmatprep.subr.mxu1 %v3895_v53  ;;  %2616 = vmatpush3.msra.mxu0 %v3902_v54  ;;  %v3963_v54 = vld [vmem:[%s5144_s1 + $0x100] sm:$0xff] }
  0x29   : > { %2672 = vmatpush3.msra.mxu1 %v3907_v55  ;;  %2617 = vmatprep.subr.mxu0 %v3914_v56  ;;  %5256 = vst [vmem:[#allocation19_spill] sm:$0xff] %v3963_v54  ;;  %v274_v55 = vld [vmem:[%s3924_s7 + $0x18] sm:$0xff]  ;;  %v271_v56 = vld [vmem:[%s3924_s7] sm:$0xff] }
  0x2a   : > { %2673 = vmatprep.subr.mxu1 %v3919_v57  ;;  %2618 = vmatpush3.msra.mxu0 %v3931_v58  ;;  %v273_v57 = vld [vmem:[%s3924_s7 + $0x10] sm:$0xff]  ;;  %v3974_v58 = vld [vmem:[%s5144_s1 + $0x2f8] sm:$0xff] }
  0x2b   : > { %2674 = vmatpush3.msra.mxu1 %v3936_v59  ;;  %2619 = vmatprep.subr.mxu0 %v3943_v60  ;;  %5257 = vst [vmem:[#allocation20_spill] sm:$0xff] %v3974_v58  ;;  %v279_v59 = vld [vmem:[%s3924_s7 + $0x40] sm:$0xff]  ;;  %v3981_v60 = vld [vmem:[%s5144_s1 + $0x278] sm:$0xff] }
  0x2c   : > { %2675 = vmatprep.subr.mxu1 %v3948_v61  ;;  %2620 = vmatpush3.msra.mxu0 %v3955_v62  ;;  %5258 = vst [vmem:[#allocation21_spill] sm:$0xff] %v3981_v60  ;;  %v281_v61 = vld [vmem:[%s3924_s7 + $0x50] sm:$0xff]  ;;  %v3992_v62 = vld [vmem:[%s5144_s1 + $0x318] sm:$0xff] }
  0x2d   : > { %416 = vmatprep.mubr.f32.mxu0 %v272_v63  ;;  %2676 = vmatpush3.msra.mxu1 %v3963_v54  ;;  %v3987_v63 = vld [vmem:[%s5144_s1 + $0x2f0] sm:$0xff]  ;;  %5260 = vst [vmem:[#allocation23_spill] sm:$0xff] %v3992_v62  ;;  %v4006_v54 = vld [vmem:[%s5144_s1 + $0x2e8] sm:$0xff] }
  0x2e   : > { %521 = vmatprep.mubr.f32.mxu1 %v274_v55  ;;  %417 = vmatmul.mubr.f32.vlgmr.msra.gmra.mxu0 %v271_v56  ;;  %5259 = vst [vmem:[#allocation22_spill] sm:$0xff] %v3987_v63  ;;  %v3998_v55 = vld [vmem:[%s5144_s1 + $0x270] sm:$0xff]  ;;  %v280_v56 = vld [vmem:[%s3924_s7 + $0x48] sm:$0xff]  ;;  %5262 = vst [vmem:[#allocation25_spill] sm:$0xff] %v4006_v54 }
  0x2f   : > { %522 = vmatmul.mubr.f32.vlgmr.msra.gmra.mxu1 %v273_v57  ;;  %2701 = vmatprep.subr.mxu0 %v3974_v58  ;;  %5261 = vst [vmem:[#allocation24_spill] sm:$0xff] %v3998_v55  ;;  %v278_v57 = vld [vmem:[%s3924_s7 + $0x38] sm:$0xff] }
  0x30   : > { %421 = vmatprep.mubr.f32.mxu0 %v279_v59  ;;  %2702 = vmatpush3.msra.mxu0 %v3981_v60  ;;  %v4012_v59 = vld [vmem:[%s5144_s1 + $0x268] sm:$0xff]  ;;  %v286_v58 = vld [vmem:[%s3924_s7 + $0x78] sm:$0xff] }
  0x31   : > { %526 = vmatprep.mubr.f32.mxu1 %v281_v61  ;;  %2703 = vmatprep.subr.mxu0 %v3987_v63  ;;  %5263 = vst [vmem:[#allocation26_spill] sm:$0xff] %v4012_v59  ;;  %v4020_v61 = vld [vmem:[%s5144_s1 + $0x2e0] sm:$0xff]  ;;  %v288_v60 = vld [vmem:[%s3924_s7 + $0x88] sm:$0xff] }
  0x32   : > { %3309 = vmatprep.subr.mxu1 %v3992_v62  ;;  %2704 = vmatpush3.msra.mxu0 %v3998_v55  ;;  %5264 = vst [vmem:[#allocation27_spill] sm:$0xff] %v4020_v61  ;;  %v4027_v63 = vld [vmem:[%s5144_s1 + $0x260] sm:$0xff]  ;;  %v4035_v55 = vld [vmem:[%s5144_s1 + $0x2d8] sm:$0xff] }
  0x33   : > { %527 = vmatmul.mubr.f32.gmra.mxu1 %v280_v56  ;;  %422 = vmatmul.mubr.f32.gmra.mxu0 %v278_v57  ;;  %5265 = vst [vmem:[#allocation28_spill] sm:$0xff] %v4027_v63  ;;  %v285_v56 = vld [vmem:[%s3924_s7 + $0x70] sm:$0xff]  ;;  %5266 = vst [vmem:[#allocation29_spill] sm:$0xff] %v4035_v55  ;;  %v4041_v57 = vld [vmem:[%s5144_s1 + $0x258] sm:$0xff] }
  0x34   : > { %2705 = vmatprep.subr.mxu0 %v4006_v54  ;;  %426 = vmatprep.mubr.f32.mxu0 %v286_v58  ;;  %5267 = vst [vmem:[#allocation30_spill] sm:$0xff] %v4041_v57  ;;  %v4047_v58 = vld [vmem:[%s5144_s1 + $0x2d0] sm:$0xff]  ;;  %v302_v54 = vld [vmem:[%s3924_s7 + $0xf8] sm:$0xff] }
  0x35   : > { %2706 = vmatpush3.msra.mxu0 %v4012_v59  ;;  %531 = vmatprep.mubr.f32.mxu1 %v288_v60  ;;  %5268 = vst [vmem:[#allocation31_spill] sm:$0xff] %v4047_v58  ;;  %v293_v59 = vld [vmem:[%s3924_s7 + $0xb0] sm:$0xff]  ;;  %v295_v60 = vld [vmem:[%s3924_s7 + $0xc0] sm:$0xff] }
  0x36   : > { %2707 = vmatprep.subr.mxu0 %v4020_v61  ;;  %v4055_v61 = vld [vmem:[%s5144_s1 + $0x250] sm:$0xff]  ;;  %3310 = vmatpush3.msra.mxu1 %v3992_v62 }
  0x37   : > { %2708 = vmatpush3.msra.mxu0 %v4027_v63  ;;  %532 = vmatmul.mubr.f32.gmra.mxu1 %v287_v52  ;;  %5269 = vst [vmem:[#allocation32_spill] sm:$0xff] %v4055_v61  ;;  %v292_v52 = vld [vmem:[%s3924_s7 + $0xa8] sm:$0xff]  ;;  %v294_v63 = vld [vmem:[%s3924_s7 + $0xb8] sm:$0xff] }
  0x38   : > { %427 = vmatmul.mubr.f32.gmra.mxu0 %v285_v56  ;;  %2709 = vmatprep.subr.mxu0 %v4035_v55  ;;  %v4065_v56 = vld [vmem:[%s5144_s1 + $0x2c8] sm:$0xff] }
  0x39   : > { %2710 = vmatpush3.msra.mxu0 %v4041_v57  ;;  %431 = vmatprep.mubr.f32.mxu0 %v293_v59  ;;  %5270 = vst [vmem:[#allocation33_spill] sm:$0xff] %v4065_v56  ;;  %v300_v55 = vld [vmem:[%s3924_s7 + $0xe8] sm:$0xff]  ;;  %v4078_v59 = vld [vmem:[%s5144_s1 + $0x2c0] sm:$0xff] }
  0x3a   : > { %2711 = vmatprep.subr.mxu0 %v4047_v58  ;;  %536 = vmatprep.mubr.f32.mxu1 %v295_v60  ;;  %v4072_v57 = vld [vmem:[%s5144_s1 + $0x248] sm:$0xff]  ;;  %5272 = vst [vmem:[#allocation35_spill] sm:$0xff] %v4078_v59  ;;  %v4083_v60 = vld [vmem:[%s5144_s1 + $0x310] sm:$0xff]  ;;  %v4097_v58 = vld [vmem:[%s5144_s1 + $0x2b8] sm:$0xff] }
  0x3b   : > { %2712 = vmatpush3.msra.mxu0 %v4055_v61  ;;  %5271 = vst [vmem:[#allocation34_spill] sm:$0xff] %v4072_v57  ;;  %537 = vmatmul.mubr.f32.gmra.mxu1 %v294_v63  ;;  %5273 = vst [vmem:[#allocation36_spill] sm:$0xff] %v4083_v60  ;;  %v301_v63 = vld [vmem:[%s3924_s7 + $0xf0] sm:$0xff]  ;;  %v299_v61 = vld [vmem:[%s3924_s7 + $0xe0] sm:$0xff] }
  0x3c   : > { %432 = vmatmul.mubr.f32.gmra.mxu0 %v292_v52  ;;  %2713 = vmatprep.subr.mxu0 %v4065_v56  ;;  %v4089_v52 = vld [vmem:[%s5144_s1 + $0x240] sm:$0xff]  ;;  %5275 = vst [vmem:[#allocation38_spill] sm:$0xff] %v4097_v58  ;;  %v4118_v56 = vld [vmem:[%s5144_s1 + $0x230] sm:$0xff] }
  0x3d   : > { %436 = vmatprep.mubr.f32.mxu0 %v300_v55  ;;  %5274 = vst [vmem:[#allocation37_spill] sm:$0xff] %v4089_v52  ;;  %2714 = vmatpush3.msra.mxu0 %v4072_v57  ;;  %v4104_v55 = vld [vmem:[%s5144_s1 + $0x238] sm:$0xff]  ;;  %v307_v57 = vld [vmem:[%s3924_s7 + $0x120] sm:$0xff]  ;;  %5278 = vst [vmem:[#allocation41_spill] sm:$0xff] %v4118_v56 }
  0x3e   : > { %541 = vmatprep.mubr.f32.mxu1 %v302_v54  ;;  %2715 = vmatprep.subr.mxu0 %v4078_v59  ;;  %5276 = vst [vmem:[#allocation39_spill] sm:$0xff] %v4104_v55  ;;  %v4110_v54 = vld [vmem:[%s5144_s1 + $0x2b0] sm:$0xff] }
  0x3f   : > { %3311 = vmatprep.subr.mxu1 %v4083_v60  ;;  %2716 = vmatpush3.msra.mxu0 %v4089_v52  ;;  %5277 = vst [vmem:[#allocation40_spill] sm:$0xff] %v4110_v54  ;;  %v309_v59 = vld [vmem:[%s3924_s7 + $0x130] sm:$0xff]  ;;  %v308_v52 = vld [vmem:[%s3924_s7 + $0x128] sm:$0xff] }
  0x40   : > { %542 = vmatmul.mubr.f32.gmra.mxu1 %v301_v63  ;;  %437 = vmatmul.mubr.f32.gmra.mxu0 %v299_v61  ;;  %v306_v63 = vld [vmem:[%s3924_s7 + $0x118] sm:$0xff]  ;;  %v4128_v61 = vld [vmem:[%s5144_s1 + $0x2a8] sm:$0xff] }
  0x41   : > { %2717 = vmatprep.subr.mxu0 %v4097_v58  ;;  %3312 = vmatpush3.msra.mxu1 %v4083_v60  ;;  %5279 = vst [vmem:[#allocation42_spill] sm:$0xff] %v4128_v61  ;;  %v314_v58 = vld [vmem:[%s3924_s7 + $0x158] sm:$0xff]  ;;  %v316_v60 = vld [vmem:[%s3924_s7 + $0x168] sm:$0xff] }
  0x42   : > { %2718 = vmatpush3.msra.mxu0 %v4104_v55  ;;  %441 = vmatprep.mubr.f32.mxu0 %v307_v57  ;;  %v4135_v55 = vld [vmem:[%s5144_s1 + $0x228] sm:$0xff]  ;;  %v4141_v57 = vld [vmem:[%s5144_s1 + $0x2a0] sm:$0xff] }
  0x43   : > { %2719 = vmatprep.subr.mxu0 %v4110_v54  ;;  %546 = vmatprep.mubr.f32.mxu1 %v309_v59  ;;  %5280 = vst [vmem:[#allocation43_spill] sm:$0xff] %v4135_v55  ;;  %5281 = vst [vmem:[#allocation44_spill] sm:$0xff] %v4141_v57  ;;  %v4146_v59 = vld [vmem:[%s5144_s1 + $0x308] sm:$0xff]  ;;  %v4160_v54 = vld [vmem:[%s5144_s1 + $0x298] sm:$0xff] }
  0x44   : > { %2720 = vmatpush3.msra.mxu0 %v4118_v56  ;;  %547 = vmatmul.mubr.f32.gmra.mxu1 %v308_v52  ;;  %v315_v52 = vld [vmem:[%s3924_s7 + $0x160] sm:$0xff]  ;;  %v313_v56 = vld [vmem:[%s3924_s7 + $0x150] sm:$0xff]  ;;  %5283 = vst [vmem:[#allocation46_spill] sm:$0xff] %v4160_v54 }
  0x45   : > { %442 = vmatmul.mubr.f32.gmra.mxu0 %v306_v63  ;;  %2721 = vmatprep.subr.mxu0 %v4128_v61  ;;  %v4152_v63 = vld [vmem:[%s5144_s1 + $0x220] sm:$0xff]  ;;  %v4181_v61 = vld [vmem:[%s5144_s1 + $0x210] sm:$0xff] }
  0x46   : > { %446 = vmatprep.mubr.f32.mxu0 %v314_v58  ;;  %5282 = vst [vmem:[#allocation45_spill] sm:$0xff] %v4152_v63  ;;  %2722 = vmatpush3.msra.mxu0 %v4135_v55  ;;  %v4167_v58 = vld [vmem:[%s5144_s1 + $0x218] sm:$0xff]  ;;  %v321_v55 = vld [vmem:[%s3924_s7 + $0x190] sm:$0xff]  ;;  %5286 = vst [vmem:[#allocation49_spill] sm:$0xff] %v4181_v61 }
  0x47   : > { %551 = vmatprep.mubr.f32.mxu1 %v316_v60  ;;  %2723 = vmatprep.subr.mxu0 %v4141_v57  ;;  %5284 = vst [vmem:[#allocation47_spill] sm:$0xff] %v4167_v58  ;;  %v4173_v60 = vld [vmem:[%s5144_s1 + $0x290] sm:$0xff]  ;;  %v323_v57 = vld [vmem:[%s3924_s7 + $0x1a0] sm:$0xff] }
  0x48   : > { %3313 = vmatprep.subr.mxu1 %v4146_v59  ;;  %2724 = vmatpush3.msra.mxu0 %v4152_v63  ;;  %5285 = vst [vmem:[#allocation48_spill] sm:$0xff] %v4173_v60  ;;  %v322_v63 = vld [vmem:[%s3924_s7 + $0x198] sm:$0xff] }
  0x49   : > { %552 = vmatmul.mubr.f32.gmra.mxu1 %v315_v52  ;;  %447 = vmatmul.mubr.f32.gmra.mxu0 %v313_v56  ;;  %v320_v52 = vld [vmem:[%s3924_s7 + $0x188] sm:$0xff] }
  0x4a   : > { %2725 = vmatprep.subr.mxu0 %v4160_v54  ;;  %3314 = vmatpush3.msra.mxu1 %v4146_v59  ;;  %v4191_v56 = vld [vmem:[%s5144_s1 + $0x288] sm:$0xff]  ;;  %v4196_v54 = vld [vmem:[%s5144_s1 + $0x300] sm:$0xff] }
  0x4b   : > { %2726 = vmatpush3.msra.mxu0 %v4167_v58  ;;  %451 = vmatprep.mubr.f32.mxu0 %v321_v55  ;;  %v4207_v55 = vld [vmem:[%s5144_s1 + $0x280] sm:$0xff]  ;;  %v276_v58 = vld [vmem:[%s3924_s7 + $0x28] sm:$0xff] }
  0x4c   : > { %2727 = vmatprep.subr.mxu0 %v4173_v60  ;;  %556 = vmatprep.mubr.f32.mxu1 %v323_v57  ;;  %v4202_v60 = vld [vmem:[%s5144_s1 + $0x208] sm:$0xff]  ;;  %v4215_v57 = vld [vmem:[%s5144_s1 + $0x200] sm:$0xff] }
  0x4d   : > { %2728 = vmatpush3.msra.mxu0 %v4181_v61  ;;  %5287 = vst [vmem:[#allocation50_spill] sm:$0xff] %v4202_v60  ;;  %557 = vmatmul.mubr.f32.gmra.mxu1 %v322_v63  ;;  %v277_v61 = vld [vmem:[%s3924_s7 + $0x30] sm:$0xff]  ;;  %v275_v63 = vld [vmem:[%s3924_s7 + $0x20] sm:$0xff] }
  0x4e   : > { %452 = vmatmul.mubr.f32.gmra.mxu0 %v320_v52  ;;  %2729 = vmatprep.subr.mxu0 %v4191_v56  ;;  %v284_v52 = vld [vmem:[%s3924_s7 + $0x68] sm:$0xff] }
  0x4f   : > { %3315 = vmatprep.subr.mxu1 %v4196_v54  ;;  %2730 = vmatpush3.msra.mxu0 %v4202_v60  ;;  %v283_v60 = vld [vmem:[%s3924_s7 + $0x60] sm:$0xff] }
  0x50   : > { %3316 = vmatpush3.msra.mxu1 %v4196_v54  ;;  %2731 = vmatprep.subr.mxu0 %v4207_v55 }
  0x51   : > { %626 = vmatprep.mubr.f32.mxu0 %v276_v58  ;;  %2732 = vmatpush3.msra.mxu0 %v4215_v57  ;;  %v282_v58 = vld [vmem:[%s3924_s7 + $0x58] sm:$0xff] }
  0x52   : > { %3317 = vmatprep.mubr.msk.f32.mxu1 %vm327_vm0, %v277_v61  ;;  %2825 = vmatprep.subr.mxu1 %v3574_v1  ;;  %v290_v61 = vld [vmem:[%s3924_s7 + $0x98] sm:$0xff] }
  0x53   : > { %627 = vmatmul.mubr.f32.vlgmr.msra.gmra.mxu0 %v275_v63  ;;  %3318 = vmatmul.mubr.msk.f32.vlgmr.msra.gmra.mxu1 %vm327_vm0, %v284_v52  ;;  %v297_v63 = vld [vmem:[%s3924_s7 + $0xd0] sm:$0xff]  ;;  %v291_v52 = vld [vmem:[%s3924_s7 + $0xa0] sm:$0xff] }
  0x54   : > { %2769 = vmatprep.subr.mxu0 %v3569_v0  ;;  %2826 = vmatpush3.msra.mxu1 %v3586_v3 }
  0x55   : > { %2770 = vmatpush3.msra.mxu0 %v3579_v2  ;;  %2827 = vmatprep.subr.mxu1 %v3596_v5 }
  0x56   : > { %2771 = vmatprep.subr.mxu0 %v3591_v4  ;;  %2828 = vmatpush3.msra.mxu1 %v3608_v7 }
  0x57   : > { %631 = vmatprep.mubr.f32.mxu0 %v283_v60  ;;  %2772 = vmatpush3.msra.mxu0 %v3603_v6  ;;  %v289_v60 = vld [vmem:[%s3924_s7 + $0x90] sm:$0xff] }
  0x58   : > { %2829 = vmatprep.subr.mxu1 %v3620_v9  ;;  %632 = vmatmul.mubr.f32.gmra.mxu0 %v282_v58  ;;  %v296_v58 = vld [vmem:[%s3924_s7 + $0xc8] sm:$0xff] }
  0x59   : > { %2773 = vmatprep.subr.mxu0 %v3613_v8  ;;  %2830 = vmatpush3.msra.mxu1 %v3630_v11 }
  0x5a   : > { %2774 = vmatpush3.msra.mxu0 %v3625_v10  ;;  %2831 = vmatprep.subr.mxu1 %v3642_v13 }
  0x5b   : > { %2775 = vmatprep.subr.mxu0 %v3637_v12  ;;  %2832 = vmatpush3.msra.mxu1 %v3654_v15 }
  0x5c   : > { %636 = vmatprep.mubr.f32.mxu0 %v290_v61  ;;  %2776 = vmatpush3.msra.mxu0 %v3649_v14  ;;  %v298_v61 = vld [vmem:[%s3924_s7 + $0xd8] sm:$0xff] }
  0x5d   : > { %2833 = vmatprep.subr.mxu1 %v3666_v17  ;;  %637 = vmatmul.mubr.f32.gmra.mxu0 %v289_v60  ;;  %v304_v60 = vld [vmem:[%s3924_s7 + $0x108] sm:$0xff] }
  0x5e   : > { %2777 = vmatprep.subr.mxu0 %v3661_v16  ;;  %2834 = vmatpush3.msra.mxu1 %v3678_v19 }
  0x5f   : > { %2778 = vmatpush3.msra.mxu0 %v3673_v18  ;;  %2835 = vmatprep.subr.mxu1 %v3690_v21 }
  0x60   : > { %2779 = vmatprep.subr.mxu0 %v3685_v20  ;;  %2836 = vmatpush3.msra.mxu1 %v3702_v23 }
  0x61   : > { %641 = vmatprep.mubr.f32.mxu0 %v297_v63  ;;  %3320 = vmatprep.mubr.msk.f32.mxu1 %vm327_vm0, %v291_v52  ;;  %v303_v63 = vld [vmem:[%s3924_s7 + $0x100] sm:$0xff] }
  0x62   : > { %2780 = vmatpush3.msra.mxu0 %v3697_v22  ;;  %2837 = vmatprep.subr.mxu1 %v3714_v25  ;;  %v311_v52 = vld [vmem:[%s3924_s7 + $0x140] sm:$0xff] }
  0x63   : > { %642 = vmatmul.mubr.f32.gmra.mxu0 %v296_v58  ;;  %3321 = vmatmul.mubr.msk.f32.gmra.mxu1 %vm327_vm0, %v298_v61  ;;  %v305_v58 = vld [vmem:[%s3924_s7 + $0x110] sm:$0xff]  ;;  %v310_v61 = vld [vmem:[%s3924_s7 + $0x138] sm:$0xff] }
  0x64   : > { %2781 = vmatprep.subr.mxu0 %v3709_v24  ;;  %2838 = vmatpush3.msra.mxu1 %v3726_v27 }
  0x65   : > { %2782 = vmatpush3.msra.mxu0 %v3721_v26  ;;  %2839 = vmatprep.subr.mxu1 %v3738_v29 }
  0x66   : > { %2783 = vmatprep.subr.mxu0 %v3733_v28  ;;  %2840 = vmatpush3.msra.mxu1 %v3750_v31 }
  0x67   : > { %646 = vmatprep.mubr.f32.mxu0 %v304_v60  ;;  %2784 = vmatpush3.msra.mxu0 %v3745_v30  ;;  %v312_v60 = vld [vmem:[%s3924_s7 + $0x148] sm:$0xff] }
  0x68   : > { %2841 = vmatprep.subr.mxu1 %v3762_v33  ;;  %647 = vmatmul.mubr.f32.gmra.mxu0 %v303_v63  ;;  %v318_v63 = vld [vmem:[%s3924_s7 + $0x178] sm:$0xff] }
  0x69   : > { %2785 = vmatprep.subr.mxu0 %v3757_v32  ;;  %2842 = vmatpush3.msra.mxu1 %v3780_v35 }
  0x6a   : > { %2786 = vmatpush3.msra.mxu0 %v3775_v34  ;;  %2843 = vmatprep.subr.mxu1 %v3792_v37 }
  0x6b   : > { %2787 = vmatprep.subr.mxu0 %v3787_v36  ;;  %2844 = vmatpush3.msra.mxu1 %v3804_v39 }
  0x6c   : > { %651 = vmatprep.mubr.f32.mxu0 %v311_v52  ;;  %3323 = vmatprep.mubr.msk.f32.mxu1 %vm327_vm0, %v305_v58  ;;  %v317_v52 = vld [vmem:[%s3924_s7 + $0x170] sm:$0xff]  ;;  %v319_v58 = vld [vmem:[%s3924_s7 + $0x180] sm:$0xff] }
  0x6d   : > { %2788 = vmatpush3.msra.mxu0 %v3799_v38  ;;  %2845 = vmatprep.subr.mxu1 %v3816_v41 }
  0x6e   : > { %652 = vmatmul.mubr.f32.gmra.mxu0 %v310_v61  ;;  %3324 = vmatmul.mubr.msk.f32.gmra.mxu1 %vm327_vm0, %v312_v60  ;;  %v325_v61 = vld [vmem:[%s3924_s7 + $0x1b0] sm:$0xff]  ;;  %v326_v60 = vld [vmem:[%s3924_s7 + $0x1b8] sm:$0xff] }
  0x6f   : > { %2789 = vmatprep.subr.mxu0 %v3811_v40  ;;  %2846 = vmatpush3.msra.mxu1 %v3834_v43 }
  0x70   : > { %2790 = vmatpush3.msra.mxu0 %v3829_v42  ;;  %2847 = vmatprep.subr.mxu1 %v3846_v45 }
  0x71   : > { %2791 = vmatprep.subr.mxu0 %v3841_v44  ;;  %2848 = vmatpush3.msra.mxu1 %v3858_v47  ;;  %v5297_v44 = vld [vmem:[#allocation19_spill] sm:$0xff] }
  0x72   : > { %656 = vmatprep.mubr.f32.mxu0 %v318_v63  ;;  %2792 = vmatpush3.msra.mxu0 %v3853_v46  ;;  %v5288_v63 = vld [vmem:[#allocation8_spill] sm:$0xff]  ;;  %v5289_v46 = vld [vmem:[#allocation11_spill] sm:$0xff] }
  0x73   : > { %2849 = vmatprep.subr.mxu1 %v3870_v49  ;;  %657 = vmatmul.mubr.f32.gmra.mxu0 %v317_v52  ;;  %v324_v52 = vld [vmem:[%s3924_s7 + $0x1a8] sm:$0xff]  ;;  %v5295_v49 = vld [vmem:[#allocation17_spill] sm:$0xff] }
  0x74   : > { %2793 = vmatprep.subr.mxu0 %v3865_v48  ;;  %2850 = vmatpush3.msra.mxu1 %v3883_v51  ;;  %v5290_v48 = vld [vmem:[#allocation10_spill] sm:$0xff]  ;;  %v5293_v51 = vld [vmem:[#allocation15_spill] sm:$0xff] }
  0x75   : > { %2794 = vmatpush3.msra.mxu0 %v3878_v50  ;;  %2851 = vmatprep.subr.mxu1 %v3895_v53  ;;  %v5291_v50 = vld [vmem:[#allocation13_spill] sm:$0xff]  ;;  %v5292_v53 = vld [vmem:[#allocation12_spill] sm:$0xff] }
  0x76   : > { %3326 = vmatprep.mubr.msk.f32.mxu1 %vm327_vm0, %v319_v58  ;;  %2795 = vmatprep.subr.mxu0 %v5288_v63  ;;  %v2396_v58 = vld [vmem:[%s3924_s7 + $0x1d8] sm:$0xff]  ;;  %v5294_v63 = vld [vmem:[#allocation14_spill] sm:$0xff] }
  0x77   : > { %2852 = vmatpush3.msra.mxu1 %v5289_v46  ;;  %661 = vmatprep.mubr.f32.mxu0 %v325_v61  ;;  %v2394_v46 = vld [vmem:[%s3924_s7 + $0x1c8] sm:$0xff]  ;;  %v5296_v61 = vld [vmem:[#allocation16_spill] sm:$0xff] }
  0x78   : > { %3327 = vmatmul.mubr.msk.f32.gmra.mxu1 %vm327_vm0, %v326_v60  ;;  %2796 = vmatpush3.msra.mxu0 %v5290_v48  ;;  %v2395_v60 = vld [vmem:[%s3924_s7 + $0x1d0] sm:$0xff]  ;;  %v2393_v48 = vld [vmem:[%s3924_s7 + $0x1c0] sm:$0xff] }
  0x79   : > { %2853 = vmatprep.subr.mxu1 %v5291_v50  ;;  %662 = vmatmul.mubr.f32.gmra.mxu0 %v324_v52  ;;  %v2403_v52 = vld [vmem:[%s3924_s7 + $0x210] sm:$0xff]  ;;  %v2410_v50 = vld [vmem:[%s3924_s7 + $0x248] sm:$0xff] }
  0x7a   : > { %2797 = vmatprep.subr.mxu0 %v5292_v53  ;;  %2854 = vmatpush3.msra.mxu1 %v5293_v51  ;;  %v5298_v53 = vld [vmem:[#allocation18_spill] sm:$0xff] }
  0x7b   : > { %2798 = vmatpush3.msra.mxu0 %v5294_v63  ;;  %2855 = vmatprep.subr.mxu1 %v5295_v49  ;;  %v2401_v51 = vld [vmem:[%s3924_s7 + $0x200] sm:$0xff]  ;;  %v5299_v63 = vld [vmem:[#allocation20_spill] sm:$0xff]  ;;  %v5300_v49 = vld [vmem:[#allocation21_spill] sm:$0xff] }
  0x7c   : > { %2799 = vmatprep.subr.mxu0 %v5296_v61  ;;  %2856 = vmatpush3.msra.mxu1 %v5297_v44  ;;  %v2402_v61 = vld [vmem:[%s3924_s7 + $0x208] sm:$0xff]  ;;  %v2400_v44 = vld [vmem:[%s3924_s7 + $0x1f8] sm:$0xff] }
  0x7d   : > { %1022 = vmatprep.mubr.f32.mxu1 %v2396_v58  ;;  %2800 = vmatpush3.msra.mxu0 %v5298_v53  ;;  %v5301_v58 = vld [vmem:[#allocation22_spill] sm:$0xff] }
  0x7e   : > { %917 = vmatprep.mubr.f32.mxu0 %v2394_v46  ;;  %1023 = vmatmul.mubr.f32.vlgmr.msra.gmra.mxu1 %v2395_v60  ;;  %v5302_v46 = vld [vmem:[#allocation24_spill] sm:$0xff]  ;;  %v5303_v60 = vld [vmem:[#allocation25_spill] sm:$0xff] }
  0x7f   : > { %918 = vmatmul.mubr.f32.vlgmr.msra.gmra.mxu0 %v2393_v48  ;;  %2881 = vmatprep.subr.mxu0 %v5299_v63  ;;  %v2408_v48 = vld [vmem:[%s3924_s7 + $0x238] sm:$0xff]  ;;  %v2417_v63 = vld [vmem:[%s3924_s7 + $0x280] sm:$0xff] }
  0x80   : > { %1027 = vmatprep.mubr.f32.mxu1 %v2403_v52  ;;  %2882 = vmatpush3.msra.mxu0 %v5300_v49  ;;  %v2409_v52 = vld [vmem:[%s3924_s7 + $0x240] sm:$0xff] }
  0x81   : > { %922 = vmatprep.mubr.f32.mxu0 %v2401_v51  ;;  %2883 = vmatprep.subr.mxu0 %v5301_v58  ;;  %v5304_v49 = vld [vmem:[#allocation26_spill] sm:$0xff]  ;;  %v2407_v51 = vld [vmem:[%s3924_s7 + $0x230] sm:$0xff]  ;;  %v5305_v58 = vld [vmem:[#allocation27_spill] sm:$0xff] }
  0x82   : > { %3329 = vmatprep.subr.mxu1 %v3992_v62  ;;  %1028 = vmatmul.mubr.f32.gmra.mxu1 %v2402_v61  ;;  %v5306_v61 = vld [vmem:[#allocation28_spill] sm:$0xff] }
  0x83   : > { %2884 = vmatpush3.msra.mxu0 %v5302_v46  ;;  %1032 = vmatprep.mubr.f32.mxu1 %v2410_v50  ;;  %v2415_v46 = vld [vmem:[%s3924_s7 + $0x270] sm:$0xff]  ;;  %v2424_v50 = vld [vmem:[%s3924_s7 + $0x2b8] sm:$0xff] }
  0x84   : > { %923 = vmatmul.mubr.f32.gmra.mxu0 %v2400_v44  ;;  %2885 = vmatprep.subr.mxu0 %v5303_v60  ;;  %v2416_v44 = vld [vmem:[%s3924_s7 + $0x278] sm:$0xff] }
  0x85   : > { %2886 = vmatpush3.msra.mxu0 %v5304_v49  ;;  %927 = vmatprep.mubr.f32.mxu0 %v2408_v48  ;;  %v5307_v60 = vld [vmem:[#allocation29_spill] sm:$0xff]  ;;  %v5308_v49 = vld [vmem:[#allocation30_spill] sm:$0xff]  ;;  %v2414_v48 = vld [vmem:[%s3924_s7 + $0x268] sm:$0xff] }
  0x86   : > { %2887 = vmatprep.subr.mxu0 %v5305_v58  ;;  %1033 = vmatmul.mubr.f32.gmra.mxu1 %v2409_v52  ;;  %v5309_v52 = vld [vmem:[#allocation31_spill] sm:$0xff]  ;;  %v5311_v58 = vld [vmem:[#allocation33_spill] sm:$0xff] }
  0x87   : > { %2888 = vmatpush3.msra.mxu0 %v5306_v61  ;;  %3330 = vmatpush3.msra.mxu1 %v3992_v62  ;;  %v5310_v61 = vld [vmem:[#allocation32_spill] sm:$0xff]  ;;  %v5314_v62 = vld [vmem:[#allocation35_spill] sm:$0xff] }
  0x88   : > { %928 = vmatmul.mubr.f32.gmra.mxu0 %v2407_v51  ;;  %2889 = vmatprep.subr.mxu0 %v5307_v60  ;;  %v2422_v51 = vld [vmem:[%s3924_s7 + $0x2a8] sm:$0xff]  ;;  %v5312_v60 = vld [vmem:[#allocation34_spill] sm:$0xff] }
  0x89   : > { %1037 = vmatprep.mubr.f32.mxu1 %v2417_v63  ;;  %2890 = vmatpush3.msra.mxu0 %v5308_v49  ;;  %v2423_v63 = vld [vmem:[%s3924_s7 + $0x2b0] sm:$0xff] }
  0x8a   : > { %932 = vmatprep.mubr.f32.mxu0 %v2415_v46  ;;  %2891 = vmatprep.subr.mxu0 %v5309_v52  ;;  %v5313_v49 = vld [vmem:[#allocation36_spill] sm:$0xff]  ;;  %v2421_v46 = vld [vmem:[%s3924_s7 + $0x2a0] sm:$0xff]  ;;  %v5317_v52 = vld [vmem:[#allocation39_spill] sm:$0xff] }
  0x8b   : > { %1038 = vmatmul.mubr.f32.gmra.mxu1 %v2416_v44  ;;  %2892 = vmatpush3.msra.mxu0 %v5310_v61  ;;  %v2431_v44 = vld [vmem:[%s3924_s7 + $0x2f0] sm:$0xff]  ;;  %v5315_v61 = vld [vmem:[#allocation37_spill] sm:$0xff] }
  0x8c   : > { %1042 = vmatprep.mubr.f32.mxu1 %v2424_v50  ;;  %933 = vmatmul.mubr.f32.gmra.mxu0 %v2414_v48  ;;  %v2429_v50 = vld [vmem:[%s3924_s7 + $0x2e0] sm:$0xff]  ;;  %v2430_v48 = vld [vmem:[%s3924_s7 + $0x2e8] sm:$0xff] }
  0x8d   : > { %2893 = vmatprep.subr.mxu0 %v5311_v58  ;;  %3331 = vmatprep.subr.mxu1 %v5313_v49  ;;  %v5316_v58 = vld [vmem:[#allocation38_spill] sm:$0xff] }
  0x8e   : > { %2894 = vmatpush3.msra.mxu0 %v5312_v60  ;;  %937 = vmatprep.mubr.f32.mxu0 %v2422_v51  ;;  %v2438_v60 = vld [vmem:[%s3924_s7 + $0x328] sm:$0xff]  ;;  %v2428_v51 = vld [vmem:[%s3924_s7 + $0x2d8] sm:$0xff] }
  0x8f   : > { %2895 = vmatprep.subr.mxu0 %v5314_v62  ;;  %1043 = vmatmul.mubr.f32.gmra.mxu1 %v2423_v63  ;;  %v5318_v63 = vld [vmem:[#allocation40_spill] sm:$0xff]  ;;  %v5320_v62 = vld [vmem:[#allocation42_spill] sm:$0xff] }
  0x90   : > { %2896 = vmatpush3.msra.mxu0 %v5315_v61  ;;  %3332 = vmatpush3.msra.mxu1 %v5313_v49  ;;  %v5319_v61 = vld [vmem:[#allocation41_spill] sm:$0xff] }
  0x91   : > { %938 = vmatmul.mubr.f32.gmra.mxu0 %v2421_v46  ;;  %2897 = vmatprep.subr.mxu0 %v5316_v58  ;;  %v2436_v46 = vld [vmem:[%s3924_s7 + $0x318] sm:$0xff]  ;;  %v2437_v58 = vld [vmem:[%s3924_s7 + $0x320] sm:$0xff] }
  0x92   : > { %1047 = vmatprep.mubr.f32.mxu1 %v2431_v44  ;;  %2898 = vmatpush3.msra.mxu0 %v5317_v52  ;;  %v5321_v44 = vld [vmem:[#allocation43_spill] sm:$0xff]  ;;  %v5322_v52 = vld [vmem:[#allocation44_spill] sm:$0xff] }
  0x93   : > { %942 = vmatprep.mubr.f32.mxu0 %v2429_v50  ;;  %2899 = vmatprep.subr.mxu0 %v5318_v63  ;;  %v2435_v50 = vld [vmem:[%s3924_s7 + $0x310] sm:$0xff]  ;;  %v2445_v63 = vld [vmem:[%s3924_s7 + $0x360] sm:$0xff] }
  0x94   : > { %1048 = vmatmul.mubr.f32.gmra.mxu1 %v2430_v48  ;;  %2900 = vmatpush3.msra.mxu0 %v5319_v61  ;;  %v5323_v48 = vld [vmem:[#allocation45_spill] sm:$0xff] }
  0x95   : > { %1052 = vmatprep.mubr.f32.mxu1 %v2438_v60  ;;  %943 = vmatmul.mubr.f32.gmra.mxu0 %v2428_v51  ;;  %v2443_v60 = vld [vmem:[%s3924_s7 + $0x350] sm:$0xff]  ;;  %v2444_v51 = vld [vmem:[%s3924_s7 + $0x358] sm:$0xff] }
  0x96   : > { %2901 = vmatprep.subr.mxu0 %v5320_v62  ;;  %3333 = vmatprep.subr.mxu1 %v4146_v59  ;;  %v5324_v62 = vld [vmem:[#allocation46_spill] sm:$0xff] }
  0x97   : > { %2902 = vmatpush3.msra.mxu0 %v5321_v44  ;;  %947 = vmatprep.mubr.f32.mxu0 %v2436_v46  ;;  %v5325_v44 = vld [vmem:[#allocation47_spill] sm:$0xff] }
  0x98   : > { %2903 = vmatprep.subr.mxu0 %v5322_v52  ;;  %1053 = vmatmul.mubr.f32.gmra.mxu1 %v2437_v58  ;;  %v2442_v46 = vld [vmem:[%s3924_s7 + $0x348] sm:$0xff]  ;;  %v5326_v52 = vld [vmem:[#allocation48_spill] sm:$0xff]  ;;  %v5327_v58 = vld [vmem:[#allocation49_spill] sm:$0xff] }
  0x99   : > { %2904 = vmatpush3.msra.mxu0 %v5323_v48  ;;  %3334 = vmatpush3.msra.mxu1 %v4146_v59  ;;  %v2399_v48 = vld [vmem:[%s3924_s7 + $0x1f0] sm:$0xff] }
  0x9a   : > { %948 = vmatmul.mubr.f32.gmra.mxu0 %v2435_v50  ;;  %2905 = vmatprep.subr.mxu0 %v5324_v62  ;;  %v5328_v50 = vld [vmem:[#allocation50_spill] sm:$0xff] }
  0x9b   : > { %1057 = vmatprep.mubr.f32.mxu1 %v2445_v63  ;;  %2906 = vmatpush3.msra.mxu0 %v5325_v44  ;;  %v2398_v63 = vld [vmem:[%s3924_s7 + $0x1e8] sm:$0xff] }
  0x9c   : > { %952 = vmatprep.mubr.f32.mxu0 %v2443_v60  ;;  %2907 = vmatprep.subr.mxu0 %v5326_v52  ;;  %v2406_v60 = vld [vmem:[%s3924_s7 + $0x228] sm:$0xff] }
  0x9d   : > { %1058 = vmatmul.mubr.f32.gmra.mxu1 %v2444_v51  ;;  %2908 = vmatpush3.msra.mxu0 %v5327_v58  ;;  %v2397_v51 = vld [vmem:[%s3924_s7 + $0x1e0] sm:$0xff] }
  0x9e   : > { %3335 = vmatprep.subr.mxu1 %v4196_v54  ;;  %953 = vmatmul.mubr.f32.gmra.mxu0 %v2442_v46  ;;  %v2405_v46 = vld [vmem:[%s3924_s7 + $0x220] sm:$0xff] }
  0x9f   : > { %2909 = vmatprep.subr.mxu0 %v4191_v56  ;;  %3336 = vmatpush3.msra.mxu1 %v4196_v54 }
  0xa0   : > { %2910 = vmatpush3.msra.mxu0 %v5328_v50  ;;  %3337 = vmatprep.mubr.msk.f32.mxu1 %vm327_vm0, %v2399_v48  ;;  %v2464_v48 = vld [vmem:[%s3924_s7 + $0x3b8] sm:$0xff] }
  0xa1   : > { %2911 = vmatprep.subr.mxu0 %v4207_v55  ;;  %3005 = vmatprep.subr.mxu1 %v3574_v1  ;;  %v2404_v1 = vld [vmem:[%s3924_s7 + $0x218] sm:$0xff] }
  0xa2   : > { %2912 = vmatpush3.msra.mxu0 %v4215_v57  ;;  %1127 = vmatprep.mubr.f32.mxu0 %v2398_v63  ;;  %v5348_v63 = vld [vmem:[#allocation22_spill] sm:$0xff] }
  0xa3   : > { %3338 = vmatmul.mubr.msk.f32.vlgmr.msra.gmra.mxu1 %vm327_vm0, %v2406_v60  ;;  %1128 = vmatmul.mubr.f32.vlgmr.msra.gmra.mxu0 %v2397_v51  ;;  %v2473_v60 = vld [vmem:[%s3924_s7 + $0x400] sm:$0xff]  ;;  %v5350_v51 = vld [vmem:[#allocation25_spill] sm:$0xff] }
  0xa4   : > { %3006 = vmatpush3.msra.mxu1 %v3586_v3  ;;  %2949 = vmatprep.subr.mxu0 %v3569_v0  ;;  %v2412_v0 = vld [vmem:[%s3924_s7 + $0x258] sm:$0xff]  ;;  %v2419_v3 = vld [vmem:[%s3924_s7 + $0x290] sm:$0xff] }
  0xa5   : > { %3007 = vmatprep.subr.mxu1 %v3596_v5  ;;  %2950 = vmatpush3.msra.mxu0 %v3579_v2  ;;  %v2411_v2 = vld [vmem:[%s3924_s7 + $0x250] sm:$0xff]  ;;  %v2418_v5 = vld [vmem:[%s3924_s7 + $0x288] sm:$0xff] }
  0xa6   : > { %3008 = vmatpush3.msra.mxu1 %v3608_v7  ;;  %2951 = vmatprep.subr.mxu0 %v3591_v4  ;;  %v2413_v4 = vld [vmem:[%s3924_s7 + $0x260] sm:$0xff]  ;;  %v2426_v7 = vld [vmem:[%s3924_s7 + $0x2c8] sm:$0xff] }
  0xa7   : > { %3009 = vmatprep.subr.mxu1 %v3620_v9  ;;  %1132 = vmatprep.mubr.f32.mxu0 %v2405_v46  ;;  %v2433_v9 = vld [vmem:[%s3924_s7 + $0x300] sm:$0xff]  ;;  %v2472_v46 = vld [vmem:[%s3924_s7 + $0x3f8] sm:$0xff] }
  0xa8   : > { %2952 = vmatpush3.msra.mxu0 %v3603_v6  ;;  %3010 = vmatpush3.msra.mxu1 %v3630_v11  ;;  %v2420_v6 = vld [vmem:[%s3924_s7 + $0x298] sm:$0xff] }
  0xa9   : > { %1133 = vmatmul.mubr.f32.gmra.mxu0 %v2404_v1  ;;  %2953 = vmatprep.subr.mxu0 %v3613_v8  ;;  %v2425_v8 = vld [vmem:[%s3924_s7 + $0x2c0] sm:$0xff]  ;;  %v2432_v11 = vld [vmem:[%s3924_s7 + $0x2f8] sm:$0xff] }
  0xaa   : > { %3011 = vmatprep.subr.mxu1 %v3642_v13  ;;  %2954 = vmatpush3.msra.mxu0 %v3625_v10  ;;  %v2427_v10 = vld [vmem:[%s3924_s7 + $0x2d0] sm:$0xff]  ;;  %v2440_v13 = vld [vmem:[%s3924_s7 + $0x338] sm:$0xff]  ;;  %v5351_v1 = vld [vmem:[#allocation26_spill] sm:$0xff] }
  0xab   : > { %3012 = vmatpush3.msra.mxu1 %v3654_v15  ;;  %2955 = vmatprep.subr.mxu0 %v3637_v12  ;;  %v2434_v12 = vld [vmem:[%s3924_s7 + $0x308] sm:$0xff]  ;;  %v5329_v15 = vld [vmem:[#allocation2_spill] sm:$0xff] }
  0xac   : > { %3013 = vmatprep.subr.mxu1 %v3666_v17  ;;  %1137 = vmatprep.mubr.f32.mxu0 %v2412_v0  ;;  %v5331_v17 = vld [vmem:[#allocation3_spill] sm:$0xff] }
  0xad   : > { %2956 = vmatpush3.msra.mxu0 %v3649_v14  ;;  %3014 = vmatpush3.msra.mxu1 %v3678_v19  ;;  %v2439_v14 = vld [vmem:[%s3924_s7 + $0x330] sm:$0xff]  ;;  %v5332_v19 = vld [vmem:[#allocation7_spill] sm:$0xff] }
  0xae   : > { %1138 = vmatmul.mubr.f32.gmra.mxu0 %v2411_v2  ;;  %2957 = vmatprep.subr.mxu0 %v3661_v16  ;;  %v5330_v16 = vld [vmem:[#allocation5_spill] sm:$0xff]  ;;  %v5352_v0 = vld [vmem:[#allocation23_spill] sm:$0xff]  ;;  %v2481_v2 = vld [vmem:[%s3924_s7 + $0x440] sm:$0xff] }
  0xaf   : > { %3015 = vmatprep.subr.mxu1 %v3690_v21  ;;  %2958 = vmatpush3.msra.mxu0 %v3673_v18  ;;  %v2441_v18 = vld [vmem:[%s3924_s7 + $0x340] sm:$0xff]  ;;  %v5334_v21 = vld [vmem:[#allocation9_spill] sm:$0xff] }
  0xb0   : > { %3016 = vmatpush3.msra.mxu1 %v3702_v23  ;;  %2959 = vmatprep.subr.mxu0 %v3685_v20  ;;  %v5333_v20 = vld [vmem:[#allocation4_spill] sm:$0xff]  ;;  %v5335_v23 = vld [vmem:[#allocation6_spill] sm:$0xff] }
  0xb1   : > { %3017 = vmatprep.subr.mxu1 %v3714_v25  ;;  %1142 = vmatprep.mubr.f32.mxu0 %v2419_v3  ;;  %v5336_v25 = vld [vmem:[#allocation11_spill] sm:$0xff] }
  0xb2   : > { %3340 = vmatprep.mubr.msk.f32.mxu1 %vm327_vm0, %v2413_v4  ;;  %2960 = vmatpush3.msra.mxu0 %v3697_v22  ;;  %v2448_v22 = vld [vmem:[%s3924_s7 + $0x378] sm:$0xff]  ;;  %v5353_v3 = vld [vmem:[#allocation27_spill] sm:$0xff]  ;;  %v2471_v4 = vld [vmem:[%s3924_s7 + $0x3f0] sm:$0xff] }
  0xb3   : > { %3018 = vmatpush3.msra.mxu1 %v3726_v27  ;;  %1143 = vmatmul.mubr.f32.gmra.mxu0 %v2418_v5  ;;  %v2446_v27 = vld [vmem:[%s3924_s7 + $0x368] sm:$0xff]  ;;  %v2480_v5 = vld [vmem:[%s3924_s7 + $0x438] sm:$0xff] }
  0xb4   : > { %3341 = vmatmul.mubr.msk.f32.gmra.mxu1 %vm327_vm0, %v2420_v6  ;;  %2961 = vmatprep.subr.mxu0 %v3709_v24  ;;  %v2447_v24 = vld [vmem:[%s3924_s7 + $0x370] sm:$0xff] }
  0xb5   : > { %3019 = vmatprep.subr.mxu1 %v3738_v29  ;;  %2962 = vmatpush3.msra.mxu0 %v3721_v26  ;;  %v5337_v26 = vld [vmem:[#allocation8_spill] sm:$0xff]  ;;  %v5339_v29 = vld [vmem:[#allocation10_spill] sm:$0xff] }
  0xb6   : > { %3020 = vmatpush3.msra.mxu1 %v3750_v31  ;;  %2963 = vmatprep.subr.mxu0 %v3733_v28  ;;  %v5338_v28 = vld [vmem:[#allocation13_spill] sm:$0xff]  ;;  %v5354_v6 = vld [vmem:[#allocation28_spill] sm:$0xff] }
  0xb7   : > { %3021 = vmatprep.subr.mxu1 %v3762_v33  ;;  %1147 = vmatprep.mubr.f32.mxu0 %v2426_v7  ;;  %v2460_v31 = vld [vmem:[%s3924_s7 + $0x398] sm:$0xff]  ;;  %v2479_v7 = vld [vmem:[%s3924_s7 + $0x430] sm:$0xff] }
  0xb8   : > { %2964 = vmatpush3.msra.mxu0 %v3745_v30  ;;  %3022 = vmatpush3.msra.mxu1 %v3780_v35  ;;  %v5340_v30 = vld [vmem:[#allocation15_spill] sm:$0xff]  ;;  %v5342_v33 = vld [vmem:[#allocation17_spill] sm:$0xff]  ;;  %v5343_v35 = vld [vmem:[#allocation14_spill] sm:$0xff] }
  0xb9   : > { %1148 = vmatmul.mubr.f32.gmra.mxu0 %v2425_v8  ;;  %2965 = vmatprep.subr.mxu0 %v3757_v32  ;;  %v5341_v32 = vld [vmem:[#allocation12_spill] sm:$0xff]  ;;  %v5355_v8 = vld [vmem:[#allocation29_spill] sm:$0xff] }
  0xba   : > { %3023 = vmatprep.subr.mxu1 %v3792_v37  ;;  %2966 = vmatpush3.msra.mxu0 %v3775_v34  ;;  %v2459_v34 = vld [vmem:[%s3924_s7 + $0x390] sm:$0xff]  ;;  %v2458_v37 = vld [vmem:[%s3924_s7 + $0x388] sm:$0xff] }
  0xbb   : > { %3024 = vmatpush3.msra.mxu1 %v3804_v39  ;;  %2967 = vmatprep.subr.mxu0 %v3787_v36  ;;  %v5344_v36 = vld [vmem:[#allocation19_spill] sm:$0xff]  ;;  %v2457_v39 = vld [vmem:[%s3924_s7 + $0x380] sm:$0xff] }
  0xbc   : > { %3025 = vmatprep.subr.mxu1 %v3816_v41  ;;  %1152 = vmatprep.mubr.f32.mxu0 %v2433_v9  ;;  %v2465_v41 = vld [vmem:[%s3924_s7 + $0x3c0] sm:$0xff]  ;;  %v2488_v9 = vld [vmem:[%s3924_s7 + $0x478] sm:$0xff] }
  0xbd   : > { %3343 = vmatprep.mubr.msk.f32.mxu1 %vm327_vm0, %v2427_v10  ;;  %2968 = vmatpush3.msra.mxu0 %v3799_v38  ;;  %v5345_v38 = vld [vmem:[#allocation16_spill] sm:$0xff]  ;;  %v5356_v10 = vld [vmem:[#allocation30_spill] sm:$0xff] }
  0xbe   : > { %3026 = vmatpush3.msra.mxu1 %v3834_v43  ;;  %1153 = vmatmul.mubr.f32.gmra.mxu0 %v2432_v11  ;;  %v2466_v43 = vld [vmem:[%s3924_s7 + $0x3c8] sm:$0xff] }
  0xbf   : > { %3344 = vmatmul.mubr.msk.f32.gmra.mxu1 %vm327_vm0, %v2434_v12  ;;  %2969 = vmatprep.subr.mxu0 %v3811_v40  ;;  %v2467_v40 = vld [vmem:[%s3924_s7 + $0x3d0] sm:$0xff]  ;;  %v2478_v11 = vld [vmem:[%s3924_s7 + $0x428] sm:$0xff] }
  0xc0   : > { %3027 = vmatprep.subr.mxu1 %v3846_v45  ;;  %2970 = vmatpush3.msra.mxu0 %v3829_v42  ;;  %v5346_v42 = vld [vmem:[#allocation20_spill] sm:$0xff]  ;;  %v2474_v45 = vld [vmem:[%s3924_s7 + $0x408] sm:$0xff] }
  0xc1   : > { %3028 = vmatpush3.msra.mxu1 %v3858_v47  ;;  %2971 = vmatprep.subr.mxu0 %v5329_v15  ;;  %v5347_v47 = vld [vmem:[#allocation21_spill] sm:$0xff]  ;;  %v5357_v12 = vld [vmem:[#allocation31_spill] sm:$0xff] }
  0xc2   : > { %3029 = vmatprep.subr.mxu1 %v5330_v16  ;;  %1157 = vmatprep.mubr.f32.mxu0 %v2440_v13  ;;  %v5358_v13 = vld [vmem:[#allocation32_spill] sm:$0xff]  ;;  %v5359_v15 = vld [vmem:[#allocation33_spill] sm:$0xff]  ;;  %v2486_v16 = vld [vmem:[%s3924_s7 + $0x468] sm:$0xff] }
  0xc3   : > { %2972 = vmatpush3.msra.mxu0 %v5331_v17  ;;  %3030 = vmatpush3.msra.mxu1 %v5332_v19  ;;  %v5360_v17 = vld [vmem:[#allocation34_spill] sm:$0xff]  ;;  %v5361_v19 = vld [vmem:[#allocation35_spill] sm:$0xff] }
  0xc4   : > { %1158 = vmatmul.mubr.f32.gmra.mxu0 %v2439_v14  ;;  %2973 = vmatprep.subr.mxu0 %v5333_v20  ;;  %v2487_v14 = vld [vmem:[%s3924_s7 + $0x470] sm:$0xff]  ;;  %v2485_v20 = vld [vmem:[%s3924_s7 + $0x460] sm:$0xff] }
  0xc5   : > { %3031 = vmatprep.subr.mxu1 %v5334_v21  ;;  %3346 = vmatprep.mubr.msk.f32.mxu1 %vm327_vm0, %v2441_v18  ;;  %v2495_v18 = vld [vmem:[%s3924_s7 + $0x4b0] sm:$0xff]  ;;  %v2494_v21 = vld [vmem:[%s3924_s7 + $0x4a8] sm:$0xff] }
  0xc6   : > { %2974 = vmatpush3.msra.mxu0 %v5335_v23  ;;  %3032 = vmatpush3.msra.mxu1 %v5336_v25  ;;  %v2493_v23 = vld [vmem:[%s3924_s7 + $0x4a0] sm:$0xff]  ;;  %v2502_v25 = vld [vmem:[%s3924_s7 + $0x4e8] sm:$0xff] }
  0xc7   : > { %2975 = vmatprep.subr.mxu0 %v5337_v26  ;;  %3347 = vmatmul.mubr.msk.f32.gmra.mxu1 %vm327_vm0, %v2448_v22  ;;  %v5362_v22 = vld [vmem:[#allocation37_spill] sm:$0xff]  ;;  %v5364_v26 = vld [vmem:[#allocation39_spill] sm:$0xff] }
  0xc8   : > { %3033 = vmatprep.subr.mxu1 %v5338_v28  ;;  %1162 = vmatprep.mubr.f32.mxu0 %v2447_v24  ;;  %v5363_v24 = vld [vmem:[#allocation38_spill] sm:$0xff]  ;;  %v5365_v28 = vld [vmem:[#allocation40_spill] sm:$0xff] }
  0xc9   : > { %2976 = vmatpush3.msra.mxu0 %v5339_v29  ;;  %3034 = vmatpush3.msra.mxu1 %v5340_v30  ;;  %v5366_v29 = vld [vmem:[#allocation42_spill] sm:$0xff]  ;;  %v2500_v30 = vld [vmem:[%s3924_s7 + $0x4d8] sm:$0xff] }
  0xca   : > { %1163 = vmatmul.mubr.f32.gmra.mxu0 %v2446_v27  ;;  %2977 = vmatprep.subr.mxu0 %v5341_v32  ;;  %v2492_v27 = vld [vmem:[%s3924_s7 + $0x498] sm:$0xff]  ;;  %v2509_v32 = vld [vmem:[%s3924_s7 + $0x520] sm:$0xff] }
  0xcb   : > { %3035 = vmatprep.subr.mxu1 %v5342_v33  ;;  %2978 = vmatpush3.msra.mxu0 %v5343_v35  ;;  %v5368_v33 = vld [vmem:[#allocation44_spill] sm:$0xff]  ;;  %v5369_v35 = vld [vmem:[#allocation45_spill] sm:$0xff] }
  0xcc   : > { %3036 = vmatpush3.msra.mxu1 %v5344_v36  ;;  %1531 = vmatprep.mubr.f32.mxu1 %v2460_v31  ;;  %v5367_v31 = vld [vmem:[#allocation43_spill] sm:$0xff]  ;;  %v2507_v36 = vld [vmem:[%s3924_s7 + $0x510] sm:$0xff] }
  0xcd   : > { %2979 = vmatprep.subr.mxu0 %v5345_v38  ;;  %1532 = vmatmul.mubr.f32.vlgmr.msra.gmra.mxu1 %v2459_v34  ;;  %v2499_v34 = vld [vmem:[%s3924_s7 + $0x4d0] sm:$0xff]  ;;  %v2470_v38 = vld [vmem:[%s3924_s7 + $0x3e8] sm:$0xff] }
  0xce   : > { %2980 = vmatpush3.msra.mxu0 %v5298_v53  ;;  %1426 = vmatprep.mubr.f32.mxu0 %v2458_v37  ;;  %v5349_v53 = vld [vmem:[#allocation24_spill] sm:$0xff]  ;;  %v2506_v37 = vld [vmem:[%s3924_s7 + $0x508] sm:$0xff] }
  0xcf   : > { %3061 = vmatprep.subr.mxu0 %v5346_v42  ;;  %1427 = vmatmul.mubr.f32.vlgmr.msra.gmra.mxu0 %v2457_v39 }
  0xd0   : > { %1536 = vmatprep.mubr.f32.mxu1 %v2467_v40  ;;  %3062 = vmatpush3.msra.mxu0 %v5347_v47  ;;  %v3433_v47 = vld [vmem:[%s5144_s1 + $0xf8] sm:$0xff] }
  0xd1   : > { %1431 = vmatprep.mubr.f32.mxu0 %v2465_v41  ;;  %1537 = vmatmul.mubr.f32.gmra.mxu1 %v2466_v43  ;;  %v3432_v43 = vld [vmem:[%s5144_s1 + $0x1f0] sm:$0xff] }
  0xd2   : > { %3063 = vmatprep.subr.mxu0 %v5348_v63  ;;  %1541 = vmatprep.mubr.f32.mxu1 %v2474_v45 }
  0xd3   : > { %3064 = vmatpush3.msra.mxu0 %v5349_v53  ;;  %3349 = vmatprep.subr.mxu1 %v5352_v0  ;;  %v3435_v53 = vld [vmem:[%s5144_s1 + $0x78] sm:$0xff] }
  0xd4   : > { %1432 = vmatmul.mubr.f32.gmra.mxu0 %v2464_v48  ;;  %3065 = vmatprep.subr.mxu0 %v5350_v51  ;;  %v2469_v48 = vld [vmem:[%s3924_s7 + $0x3e0] sm:$0xff] }
  0xd5   : > { %3066 = vmatpush3.msra.mxu0 %v5351_v1  ;;  %1542 = vmatmul.mubr.f32.gmra.mxu1 %v2473_v60  ;;  %v3437_v1 = vld [vmem:[%s5144_s1 + $0xf0] sm:$0xff] }
  0xd6   : > { %3067 = vmatprep.subr.mxu0 %v5353_v3  ;;  %3350 = vmatpush3.msra.mxu1 %v5352_v0  ;;  %v2468_v0 = vld [vmem:[%s3924_s7 + $0x3d8] sm:$0xff] }
  0xd7   : > { %1436 = vmatprep.mubr.f32.mxu0 %v2472_v46  ;;  %3068 = vmatpush3.msra.mxu0 %v5354_v6  ;;  %v3436_v46 = vld [vmem:[%s5144_s1 + $0x1e8] sm:$0xff]  ;;  %v3439_v6 = vld [vmem:[%s5144_s1 + $0x70] sm:$0xff] }
  0xd8   : > { %1546 = vmatprep.mubr.f32.mxu1 %v2481_v2  ;;  %1437 = vmatmul.mubr.f32.gmra.mxu0 %v2471_v4  ;;  %v3438_v4 = vld [vmem:[%s5144_s1 + $0x168] sm:$0xff] }
  0xd9   : > { %3069 = vmatprep.subr.mxu0 %v5355_v8  ;;  %1547 = vmatmul.mubr.f32.gmra.mxu1 %v2480_v5 }
  0xda   : > { %3070 = vmatpush3.msra.mxu0 %v5356_v10  ;;  %1441 = vmatprep.mubr.f32.mxu0 %v2479_v7  ;;  %v3440_v7 = vld [vmem:[%s5144_s1 + $0x1e0] sm:$0xff]  ;;  %v3441_v10 = vld [vmem:[%s5144_s1 + $0xe8] sm:$0xff] }
  0xdb   : > { %3071 = vmatprep.subr.mxu0 %v5357_v12  ;;  %1551 = vmatprep.mubr.f32.mxu1 %v2488_v9 }
  0xdc   : > { %3072 = vmatpush3.msra.mxu0 %v5358_v13  ;;  %3351 = vmatprep.subr.mxu1 %v5313_v49 }
  0xdd   : > { %1442 = vmatmul.mubr.f32.gmra.mxu0 %v2478_v11  ;;  %3073 = vmatprep.subr.mxu0 %v5359_v15  ;;  %v2476_v11 = vld [vmem:[%s3924_s7 + $0x418] sm:$0xff]  ;;  %v3443_v15 = vld [vmem:[%s5144_s1 + $0x68] sm:$0xff] }
  0xde   : > { %3074 = vmatpush3.msra.mxu0 %v5360_v17  ;;  %1552 = vmatmul.mubr.f32.gmra.mxu1 %v2487_v14  ;;  %v3442_v14 = vld [vmem:[%s5144_s1 + $0x160] sm:$0xff]  ;;  %v3444_v17 = vld [vmem:[%s5144_s1 + $0x1d8] sm:$0xff] }
  0xdf   : > { %3075 = vmatprep.subr.mxu0 %v5361_v19  ;;  %3352 = vmatpush3.msra.mxu1 %v5313_v49  ;;  %v2501_v49 = vld [vmem:[%s3924_s7 + $0x4e0] sm:$0xff]  ;;  %v2475_v19 = vld [vmem:[%s3924_s7 + $0x410] sm:$0xff] }
  0xe0   : > { %1446 = vmatprep.mubr.f32.mxu0 %v2486_v16  ;;  %3076 = vmatpush3.msra.mxu0 %v5362_v22  ;;  %v3446_v22 = vld [vmem:[%s5144_s1 + $0x158] sm:$0xff] }
  0xe1   : > { %1556 = vmatprep.mubr.f32.mxu1 %v2495_v18  ;;  %1447 = vmatmul.mubr.f32.gmra.mxu0 %v2485_v20  ;;  %v3445_v18 = vld [vmem:[%s5144_s1 + $0xe0] sm:$0xff] }
  0xe2   : > { %3077 = vmatprep.subr.mxu0 %v5363_v24  ;;  %1557 = vmatmul.mubr.f32.gmra.mxu1 %v2494_v21  ;;  %v3447_v24 = vld [vmem:[%s5144_s1 + $0x60] sm:$0xff] }
  0xe3   : > { %3078 = vmatpush3.msra.mxu0 %v5364_v26  ;;  %1451 = vmatprep.mubr.f32.mxu0 %v2493_v23 }
  0xe4   : > { %3079 = vmatprep.subr.mxu0 %v5365_v28  ;;  %1561 = vmatprep.mubr.f32.mxu1 %v2502_v25  ;;  %v3448_v25 = vld [vmem:[%s5144_s1 + $0x1d0] sm:$0xff]  ;;  %v3449_v28 = vld [vmem:[%s5144_s1 + $0xd8] sm:$0xff] }
  0xe5   : > { %3080 = vmatpush3.msra.mxu0 %v5319_v61  ;;  %3353 = vmatprep.subr.mxu1 %v4146_v59  ;;  %v2508_v61 = vld [vmem:[%s3924_s7 + $0x518] sm:$0xff] }
  0xe6   : > { %1452 = vmatmul.mubr.f32.gmra.mxu0 %v2492_v27  ;;  %3081 = vmatprep.subr.mxu0 %v5366_v29 }
  0xe7   : > { %3082 = vmatpush3.msra.mxu0 %v5367_v31  ;;  %1562 = vmatmul.mubr.f32.gmra.mxu1 %v2501_v49  ;;  %v2483_v49 = vld [vmem:[%s3924_s7 + $0x450] sm:$0xff] }
  0xe8   : > { %3083 = vmatprep.subr.mxu0 %v5368_v33  ;;  %3354 = vmatpush3.msra.mxu1 %v4146_v59  ;;  %v2463_v59 = vld [vmem:[%s3924_s7 + $0x3b0] sm:$0xff]  ;;  %v2477_v33 = vld [vmem:[%s3924_s7 + $0x420] sm:$0xff] }
  0xe9   : > { %1456 = vmatprep.mubr.f32.mxu0 %v2500_v30  ;;  %3084 = vmatpush3.msra.mxu0 %v5369_v35  ;;  %v3450_v31 = vld [vmem:[%s5144_s1 + $0x150] sm:$0xff] }
  0xea   : > { %1566 = vmatprep.mubr.f32.mxu1 %v2509_v32  ;;  %1457 = vmatmul.mubr.f32.gmra.mxu0 %v2499_v34  ;;  %v3451_v32 = vld [vmem:[%s5144_s1 + $0x58] sm:$0xff]  ;;  %v3453_v35 = vld [vmem:[%s5144_s1 + $0xd0] sm:$0xff] }
  0xeb   : > { %3085 = vmatprep.subr.mxu0 %v5324_v62  ;;  %1567 = vmatmul.mubr.f32.gmra.mxu1 %v2508_v61  ;;  %v3452_v61 = vld [vmem:[%s5144_s1 + $0x1c8] sm:$0xff] }
  0xec   : > { %3086 = vmatpush3.msra.mxu0 %v5325_v44  ;;  %1461 = vmatprep.mubr.f32.mxu0 %v2507_v36  ;;  %v2462_v44 = vld [vmem:[%s3924_s7 + $0x3a8] sm:$0xff] }
  0xed   : > { %3087 = vmatprep.subr.mxu0 %v5326_v52  ;;  %3355 = vmatprep.subr.mxu1 %v4196_v54  ;;  %v3430_v52 = vld [vmem:[%s5144_s1 + $0x1f8] sm:$0xff]  ;;  %v2482_v36 = vld [vmem:[%s3924_s7 + $0x448] sm:$0xff] }
  0xee   : > { %3088 = vmatpush3.msra.mxu0 %v5327_v58  ;;  %v2621_v39 = vpop.f32.mrf.mxu0  ;;  %3356 = vmatpush3.msra.mxu1 %v4196_v54 }
  0xef   : > { %1462 = vmatmul.mubr.f32.gmra.mxu0 %v2506_v37  ;;  %3089 = vmatprep.subr.mxu0 %v4191_v56  ;;  %v2677_v62 = vpop.f32.mrf.mxu1  ;;  %v2461_v56 = vld [vmem:[%s3924_s7 + $0x3a0] sm:$0xff] }
  0xf0   : > { %3090 = vmatpush3.msra.mxu0 %v5328_v50  ;;  %3357 = vmatprep.mubr.msk.f32.mxu1 %vm327_vm0, %v2463_v59  ;;  %v2622_v58 = vpop.f32.mrf.mxu0  ;;  %v3431_v50 = vld [vmem:[%s5144_s1 + $0x178] sm:$0xff] }
  0xf1   : > { %3185 = vmatprep.subr.mxu1 %v3430_v52  ;;  %v2678_v40 = vpop.f32.mrf.mxu1  ;;  %3091 = vmatprep.subr.mxu0 %v4207_v55  ;;  %v2623_v41 = vadd.f32 %v2622_v58, %v2621_v39  ;;  %v2484_v39 = vld [vmem:[%s3924_s7 + $0x458] sm:$0xff]  ;;  %v3455_v52 = vld [vmem:[%s5144_s1 + $0x50] sm:$0xff] }
  0xf2   : > { %3358 = vmatmul.mubr.msk.f32.vlgmr.msra.gmra.mxu1 %vm327_vm0, %v2470_v38  ;;  %v2679_v54 = vadd.f32 %v2678_v40, %v2677_v62  ;;  %3092 = vmatpush3.msra.mxu0 %v4215_v57  ;;  %v3434_v57 = vld [vmem:[%s5144_s1 + $0x170] sm:$0xff]  ;;  %v3454_v38 = vld [vmem:[%s5144_s1 + $0x148] sm:$0xff]  ;;  %v3456_v40 = vld [vmem:[%s5144_s1 + $0x1c0] sm:$0xff] }
  0xf3   : > { %3186 = vmatpush3.msra.mxu1 %v3431_v50  ;;  %v2680_v42 = vpop.f32.mrf.mxu1  ;;  %1636 = vmatprep.mubr.f32.mxu0 %v2462_v44  ;;  %v2624_v45 = vpop.f32.mrf.mxu0 }
  0xf4   : > { %3187 = vmatprep.subr.mxu1 %v3432_v43  ;;  %v4571_v55 = vadd.f32 %v2679_v54, %v2623_v41  ;;  %1637 = vmatmul.mubr.f32.vlgmr.msra.gmra.mxu0 %v2461_v56  ;;  %v3457_v41 = vld [vmem:[%s5144_s1 + $0xc8] sm:$0xff]  ;;  %v3458_v43 = vld [vmem:[%s5144_s1 + $0x140] sm:$0xff] }
  0xf5   : > { %3129 = vmatprep.subr.mxu0 %v3433_v47  ;;  %v2681_v63 = vpop.f32.mrf.mxu1  ;;  %3188 = vmatpush3.msra.mxu1 %v3434_v57  ;;  %v2625_v60 = vpop.f32.mrf.mxu0  ;;  %v2490_v54 = vld [vmem:[%s3924_s7 + $0x488] sm:$0xff]  ;;  %v2489_v57 = vld [vmem:[%s3924_s7 + $0x480] sm:$0xff] }
  0xf6   : > { %3130 = vmatpush3.msra.mxu0 %v3435_v53  ;;  %v2682_v51 = vadd.f32 %v2681_v63, %v2680_v42  ;;  %3189 = vmatprep.subr.mxu1 %v3436_v46  ;;  %v2626_v2 = vadd.f32 %v2625_v60, %v2624_v45  ;;  %v3459_v45 = vld [vmem:[%s5144_s1 + $0x48] sm:$0xff]  ;;  %v3461_v63 = vld [vmem:[%s5144_s1 + $0xc0] sm:$0xff] }
  0xf7   : > { %3131 = vmatprep.subr.mxu0 %v3437_v1  ;;  %v2683_v3 = vpop.f32.mrf.mxu1  ;;  %3190 = vmatpush3.msra.mxu1 %v3438_v4  ;;  %v3465_v4 = vld [vmem:[%s5144_s1 + $0xb8] sm:$0xff] }
  0xf8   : > { %1641 = vmatprep.mubr.f32.mxu0 %v2469_v48  ;;  %v2627_v5 = vpop.f32.mrf.mxu0  ;;  %3132 = vmatpush3.msra.mxu0 %v3439_v6  ;;  %v4599_v8 = vadd.f32 %v2682_v51, %v2626_v2  ;;  %v3460_v48 = vld [vmem:[%s5144_s1 + $0x1b8] sm:$0xff]  ;;  %v3464_v2 = vld [vmem:[%s5144_s1 + $0x1b0] sm:$0xff] }
  0xf9   : > { %3191 = vmatprep.subr.mxu1 %v3440_v7  ;;  %v2684_v9 = vpop.f32.mrf.mxu1  ;;  %1642 = vmatmul.mubr.f32.gmra.mxu0 %v2468_v0  ;;  %v3462_v51 = vld [vmem:[%s5144_s1 + $0x138] sm:$0xff]  ;;  %v3463_v0 = vld [vmem:[%s5144_s1 + $0x40] sm:$0xff] }
  0xfa   : > { %3133 = vmatprep.subr.mxu0 %v3441_v10  ;;  %v2628_v12 = vpop.f32.mrf.mxu0  ;;  %v2685_v13 = vadd.f32 %v2684_v9, %v2683_v3  ;;  %3192 = vmatpush3.msra.mxu1 %v3442_v14  ;;  %v3466_v9 = vld [vmem:[%s5144_s1 + $0x130] sm:$0xff]  ;;  %v3467_v10 = vld [vmem:[%s5144_s1 + $0x38] sm:$0xff] }
  0xfb   : > { %3134 = vmatpush3.msra.mxu0 %v3443_v15  ;;  %v2629_v16 = vadd.f32 %v2628_v12, %v2627_v5  ;;  %3193 = vmatprep.subr.mxu1 %v3444_v17  ;;  %v2686_v21 = vpop.f32.mrf.mxu1  ;;  %v2497_v5 = vld [vmem:[%s3924_s7 + $0x4c0] sm:$0xff]  ;;  %v3469_v14 = vld [vmem:[%s5144_s1 + $0xb0] sm:$0xff]  ;;  %v2496_v15 = vld [vmem:[%s3924_s7 + $0x4b8] sm:$0xff] }
  0xfc   : > { %3135 = vmatprep.subr.mxu0 %v3445_v18  ;;  %v2630_v20 = vpop.f32.mrf.mxu0  ;;  %3194 = vmatpush3.msra.mxu1 %v3446_v22  ;;  %v3470_v18 = vld [vmem:[%s5144_s1 + $0x128] sm:$0xff] }
  0xfd   : > { %1646 = vmatprep.mubr.f32.mxu0 %v2476_v11  ;;  %v4621_v23 = vadd.f32 %v2685_v13, %v2629_v16  ;;  %3136 = vmatpush3.msra.mxu0 %v3447_v24  ;;  %v2687_v27 = vpop.f32.mrf.mxu1  ;;  %v2491_v11 = vld [vmem:[%s3924_s7 + $0x490] sm:$0xff]  ;;  %v3468_v13 = vld [vmem:[%s5144_s1 + $0x1a8] sm:$0xff] }
  0xfe   : > { %3195 = vmatprep.subr.mxu1 %v3448_v25  ;;  %v2631_v26 = vpop.f32.mrf.mxu0  ;;  %1647 = vmatmul.mubr.f32.gmra.mxu0 %v2475_v19  ;;  %v2688_v30 = vadd.f32 %v2687_v27, %v2686_v21  ;;  %v2498_v19 = vld [vmem:[%s3924_s7 + $0x4c8] sm:$0xff]  ;;  %v3471_v21 = vld [vmem:[%s5144_s1 + $0x30] sm:$0xff]  ;;  %v3472_v25 = vld [vmem:[%s5144_s1 + $0x1a0] sm:$0xff] }
  0xff   : > { %3137 = vmatprep.subr.mxu0 %v3449_v28  ;;  %v2632_v29 = vadd.f32 %v2631_v26, %v2630_v20  ;;  %3196 = vmatpush3.msra.mxu1 %v3450_v31  ;;  %v3473_v27 = vld [vmem:[%s5144_s1 + $0xa8] sm:$0xff]  ;;  %v2504_v28 = vld [vmem:[%s3924_s7 + $0x4f8] sm:$0xff] }
 0x100   : > { %3138 = vmatpush3.msra.mxu0 %v3451_v32  ;;  %v2689_v34 = vpop.f32.mrf.mxu1  ;;  %3197 = vmatprep.subr.mxu1 %v3452_v61  ;;  %v2633_v59 = vpop.f32.mrf.mxu0  ;;  %v3475_v31 = vld [vmem:[%s5144_s1 + $0x28] sm:$0xff]  ;;  %v3477_v61 = vld [vmem:[%s5144_s1 + $0xa0] sm:$0xff] }
 0x101   : > { %3139 = vmatprep.subr.mxu0 %v3453_v35  ;;  %v4647_v37 = vadd.f32 %v2688_v30, %v2632_v29  ;;  %3198 = vmatpush3.msra.mxu1 %v3454_v38  ;;  %v3474_v30 = vld [vmem:[%s5144_s1 + $0x120] sm:$0xff]  ;;  %v2503_v35 = vld [vmem:[%s3924_s7 + $0x4f0] sm:$0xff] }
 0x102   : > { %1651 = vmatprep.mubr.f32.mxu0 %v2483_v49  ;;  %v2690_v62 = vpop.f32.mrf.mxu1  ;;  %3360 = vmatprep.mubr.msk.f32.mxu1 %vm327_vm0, %v2477_v33  ;;  %v2634_v44 = vpop.f32.mrf.mxu0 }
 0x103   : > { %3140 = vmatpush3.msra.mxu0 %v3455_v52  ;;  %v2691_v58 = vadd.f32 %v2690_v62, %v2689_v34  ;;  %3199 = vmatprep.subr.mxu1 %v3456_v40  ;;  %v2635_v56 = vadd.f32 %v2634_v44, %v2633_v59  ;;  %v3476_v34 = vld [vmem:[%s5144_s1 + $0x198] sm:$0xff]  ;;  %v3479_v62 = vld [vmem:[%s5144_s1 + $0x20] sm:$0xff]  ;;  %v3480_v52 = vld [vmem:[%s5144_s1 + $0x190] sm:$0xff] }
 0x104   : > { %1652 = vmatmul.mubr.f32.gmra.mxu0 %v2482_v36  ;;  %3361 = vmatmul.mubr.msk.f32.gmra.mxu1 %vm327_vm0, %v2484_v39  ;;  %v2692_v42 = vpop.f32.mrf.mxu1  ;;  %v2505_v36 = vld [vmem:[%s3924_s7 + $0x500] sm:$0xff]  ;;  %v3478_v59 = vld [vmem:[%s5144_s1 + $0x118] sm:$0xff] }
 0x105   : > { %3141 = vmatprep.subr.mxu0 %v3457_v41  ;;  %v2636_v50 = vpop.f32.mrf.mxu0  ;;  %3200 = vmatpush3.msra.mxu1 %v3458_v43  ;;  %v4671_v47 = vadd.f32 %v2691_v58, %v2635_v56  ;;  %v2512_v44 = vld [vmem:[%s3924_s7 + $0x538] sm:$0xff]  ;;  %v3482_v41 = vld [vmem:[%s5144_s1 + $0x110] sm:$0xff] }
 0x106   : > { %3142 = vmatpush3.msra.mxu0 %v3459_v45  ;;  %3201 = vmatprep.subr.mxu1 %v3460_v48  ;;  %v2693_v60 = vpop.f32.mrf.mxu1  ;;  %v3481_v56 = vld [vmem:[%s5144_s1 + $0x98] sm:$0xff]  ;;  %v3484_v45 = vld [vmem:[%s5144_s1 + $0x188] sm:$0xff]  ;;  %v3485_v48 = vld [vmem:[%s5144_s1 + $0x90] sm:$0xff] }
 0x107   : > { %3143 = vmatprep.subr.mxu0 %v3461_v63  ;;  %v2637_v53 = vpop.f32.mrf.mxu0  ;;  %3202 = vmatpush3.msra.mxu1 %v3462_v51  ;;  %v2694_v1 = vadd.f32 %v2693_v60, %v2692_v42  ;;  %v3483_v42 = vld [vmem:[%s5144_s1 + $0x18] sm:$0xff]  ;;  %v2510_v63 = vld [vmem:[%s3924_s7 + $0x528] sm:$0xff] }
 0x108   : > { %1656 = vmatprep.mubr.f32.mxu0 %v2490_v54  ;;  %v2638_v46 = vadd.f32 %v2637_v53, %v2636_v50  ;;  %3144 = vmatpush3.msra.mxu0 %v3463_v0  ;;  %v2511_v54 = vld [vmem:[%s3924_s7 + $0x530] sm:$0xff]  ;;  %v3486_v53 = vld [vmem:[%s5144_s1 + $0x108] sm:$0xff]  ;;  %v2524_v60 = vld [vmem:[%s3924_s7 + $0x558] sm:$0xff] }
 0x109   : > { %3203 = vmatprep.subr.mxu1 %v3464_v2  ;;  %v2695_v3 = vpop.f32.mrf.mxu1  ;;  %1657 = vmatmul.mubr.f32.gmra.mxu0 %v2489_v57  ;;  %v2639_v7 = vpop.f32.mrf.mxu0  ;;  %v3489_v2 = vld [vmem:[%s5144_s1 + $0x88] sm:$0xff] }
 0x10a   : > { %3145 = vmatprep.subr.mxu0 %v3465_v4  ;;  %v4693_v6 = vadd.f32 %v2694_v1, %v2638_v46  ;;  %3204 = vmatpush3.msra.mxu1 %v3466_v9  ;;  %v3487_v46 = vld [vmem:[%s5144_s1 + $0x10] sm:$0xff]  ;;  %v3488_v1 = vld [vmem:[%s5144_s1 + $0x180] sm:$0xff]  ;;  %v2522_v9 = vld [vmem:[%s3924_s7 + $0x548] sm:$0xff] }
 0x10b   : > { %3146 = vmatpush3.msra.mxu0 %v3467_v10  ;;  %v2696_v12 = vpop.f32.mrf.mxu1  ;;  %3205 = vmatprep.subr.mxu1 %v3468_v13  ;;  %v2640_v16 = vpop.f32.mrf.mxu0  ;;  %v3490_v4 = vld [vmem:[%s5144_s1 + $0x100] sm:$0xff]  ;;  %v3492_v10 = vld [vmem:[%s5144_s1 + $0x2f8] sm:$0xff]  ;;  %v2531_v13 = vld [vmem:[%s3924_s7 + $0x590] sm:$0xff] }
 0x10c   : > { %3147 = vmatprep.subr.mxu0 %v3469_v14  ;;  %v2697_v17 = vadd.f32 %v2696_v12, %v2695_v3  ;;  %3206 = vmatpush3.msra.mxu1 %v3470_v18  ;;  %v2641_v20 = vadd.f32 %v2640_v16, %v2639_v7  ;;  %v3491_v7 = vld [vmem:[%s5144_s1 + $0x8] sm:$0xff]  ;;  %v2521_v12 = vld [vmem:[%s3924_s7 + $0x540] sm:$0xff]  ;;  %v3494_v16 = vld [vmem:[%s5144_s1 + $0x278] sm:$0xff] }
 0x10d   : > { %1661 = vmatprep.mubr.f32.mxu0 %v2497_v5  ;;  %3363 = vmatprep.mubr.msk.f32.mxu1 %vm327_vm0, %v2491_v11  ;;  %v2698_v24 = vpop.f32.mrf.mxu1  ;;  %v3493_v11 = vld [vmem:[%s5144_s1 + $0x80] sm:$0xff]  ;;  %v3496_v18 = vld [vmem:[%s5144_s1 + $0x2f0] sm:$0xff] }
 0x10e   : > { %3148 = vmatpush3.msra.mxu0 %v3471_v21  ;;  %v2642_v22 = vpop.f32.mrf.mxu0  ;;  %3207 = vmatprep.subr.mxu1 %v3472_v25  ;;  %v4720_v26 = vadd.f32 %v2697_v17, %v2641_v20  ;;  %v3495_v17 = vld [vmem:[%s5144_s1] sm:$0xff] }
 0x10f   : > { %1662 = vmatmul.mubr.f32.gmra.mxu0 %v2496_v15  ;;  %3364 = vmatmul.mubr.msk.f32.gmra.mxu1 %vm327_vm0, %v2498_v19  ;;  %v2699_v29 = vpop.f32.mrf.mxu1  ;;  %v2530_v19 = vld [vmem:[%s3924_s7 + $0x588] sm:$0xff] }
 0x110   : > { %3149 = vmatprep.subr.mxu0 %v3473_v27  ;;  %v2643_v49 = vpop.f32.mrf.mxu0  ;;  %3208 = vmatpush3.msra.mxu1 %v3474_v30  ;;  %v2700_v33 = vadd.f32 %v2699_v29, %v2698_v24  ;;  %v2529_v24 = vld [vmem:[%s3924_s7 + $0x580] sm:$0xff]  ;;  %v2538_v29 = vld [vmem:[%s3924_s7 + $0x5c8] sm:$0xff] }
 0x111   : > { %3150 = vmatpush3.msra.mxu0 %v3475_v31  ;;  %v2644_v32 = vadd.f32 %v2643_v49, %v2642_v22  ;;  %3209 = vmatprep.subr.mxu1 %v3476_v34  ;;  %v3497_v22 = vld [vmem:[%s5144_s1 + $0x270] sm:$0xff]  ;;  %v2528_v49 = vld [vmem:[%s3924_s7 + $0x578] sm:$0xff]  ;;  %v3499_v31 = vld [vmem:[%s5144_s1 + $0x268] sm:$0xff] }
 0x112   : > { %3151 = vmatprep.subr.mxu0 %v3477_v61  ;;  %3210 = vmatpush3.msra.mxu1 %v3478_v59  ;;  %v2536_v59 = vld [vmem:[%s3924_s7 + $0x5b8] sm:$0xff] }
 0x113   : > { %1666 = vmatprep.mubr.f32.mxu0 %v2504_v28  ;;  %v4744_v38 = vadd.f32 %v2700_v33, %v2644_v32  ;;  %v2733_v39 = vpop.f32.mrf.mxu0  ;;  %3152 = vmatpush3.msra.mxu0 %v3479_v62  ;;  %v3319_v58 = vpop.f32.mrf.mxu1  ;;  %v3498_v28 = vld [vmem:[%s5144_s1 + $0x2e8] sm:$0xff]  ;;  %v2537_v33 = vld [vmem:[%s3924_s7 + $0x5c0] sm:$0xff] }
 0x114   : > { %3211 = vmatprep.subr.mxu1 %v3480_v52  ;;  %1667 = vmatmul.mubr.f32.gmra.mxu0 %v2503_v35  ;;  %v3502_v52 = vld [vmem:[%s5144_s1 + $0x2d8] sm:$0xff] }
 0x115   : > { %3366 = vmatprep.mubr.msk.f32.mxu1 %vm327_vm0, %v2505_v36  ;;  %v2734_v40 = vpop.f32.mrf.mxu0  ;;  %3153 = vmatprep.subr.mxu0 %v3481_v56  ;;  %v733_v43 = vpop.f32.mrf.mxu1  ;;  %v3501_v36 = vld [vmem:[%s5144_s1 + $0x260] sm:$0xff]  ;;  %v3503_v56 = vld [vmem:[%s5144_s1 + $0x258] sm:$0xff] }
 0x116   : > { %3212 = vmatpush3.msra.mxu1 %v3482_v41  ;;  %v2735_v50 = vadd.f32 %v2734_v40, %v2733_v39  ;;  %3154 = vmatpush3.msra.mxu0 %v3483_v42  ;;  %v3504_v41 = vld [vmem:[%s5144_s1 + $0x2d0] sm:$0xff] }
 0x117   : > { %3367 = vmatmul.mubr.msk.f32.gmra.mxu1 %vm327_vm0, %v2512_v44  ;;  %3213 = vmatprep.subr.mxu1 %v3484_v45  ;;  %v2535_v44 = vld [vmem:[%s3924_s7 + $0x5b0] sm:$0xff] }
 0x118   : > { %3155 = vmatprep.subr.mxu0 %v3485_v48  ;;  %v629_v57 = vadd.f32 %v2735_v50, %v4571_v55  ;;  %3214 = vmatpush3.msra.mxu1 %v3486_v53  ;;  %v2736_v51 = vpop.f32.mrf.mxu0  ;;  %v2523_v55 = vld [vmem:[%s3924_s7 + $0x550] sm:$0xff]  ;;  %v2542_v53 = vld [vmem:[%s3924_s7 + $0x5e8] sm:$0xff] }
 0x119   : > { %1671 = vmatprep.mubr.f32.mxu0 %v2511_v54  ;;  %3156 = vmatpush3.msra.mxu0 %v3487_v46  ;;  %v2544_v54 = vld [vmem:[%s3924_s7 + $0x5f8] sm:$0xff]  ;;  %v3505_v42 = vld [vmem:[%s5144_s1 + $0x250] sm:$0xff]  ;;  %v3507_v46 = vld [vmem:[%s5144_s1 + $0x248] sm:$0xff] }
 0x11a   : > { %3215 = vmatprep.subr.mxu1 %v3488_v1  ;;  %v4784_v0 = vadd.f32 %v733_v43, %v629_v57  ;;  %1672 = vmatmul.mubr.f32.gmra.mxu0 %v2510_v63  ;;  %v2737_v3 = vpop.f32.mrf.mxu0  ;;  %v2543_v43 = vld [vmem:[%s3924_s7 + $0x5f0] sm:$0xff]  ;;  %v3506_v57 = vld [vmem:[%s5144_s1 + $0x2c8] sm:$0xff] }
 0x11b   : > { %3157 = vmatprep.subr.mxu0 %v3489_v2  ;;  %3216 = vmatpush3.msra.mxu1 %v3490_v4  ;;  %v2738_v5 = vadd.f32 %v2737_v3, %v2736_v51  ;;  %v2551_v2 = vld [vmem:[%s3924_s7 + $0x630] sm:$0xff] }
 0x11c   : > { %2040 = vmatprep.mubr.f32.mxu1 %v2524_v60  ;;  %3158 = vmatpush3.msra.mxu0 %v3491_v7  ;;  %v2552_v60 = vld [vmem:[%s3924_s7 + $0x638] sm:$0xff]  ;;  %v2550_v7 = vld [vmem:[%s3924_s7 + $0x628] sm:$0xff] }
 0x11d   : > { %2041 = vmatmul.mubr.f32.vlgmr.msra.gmra.mxu1 %v2523_v55  ;;  %3389 = vmatprep.subr.mxu1 %v3492_v10  ;;  %v634_v14 = vadd.f32 %v2738_v5, %v4599_v8  ;;  %v2739_v15 = vpop.f32.mrf.mxu0  ;;  %v3508_v55 = vld [vmem:[%s5144_s1 + $0x2c0] sm:$0xff] }
 0x11e   : > { %3159 = vmatprep.subr.mxu0 %v3493_v11  ;;  %3405 = vmatpush3.msra.mxu1 %v3494_v16  ;;  %v3509_v5 = vld [vmem:[%s5144_s1 + $0x240] sm:$0xff]  ;;  %v3510_v11 = vld [vmem:[%s5144_s1 + $0x2b8] sm:$0xff] }
 0x11f   : > { %3160 = vmatpush3.msra.mxu0 %v3495_v17  ;;  %1935 = vmatprep.mubr.f32.mxu0 %v2522_v9  ;;  %v4815_v8 = vadd.f32 %v3319_v58, %v634_v14  ;;  %v2740_v20 = vpop.f32.mrf.mxu0  ;;  %v2545_v58 = vld [vmem:[%s3924_s7 + $0x600] sm:$0xff]  ;;  %v3511_v14 = vld [vmem:[%s5144_s1 + $0x238] sm:$0xff]  ;;  %v2558_v17 = vld [vmem:[%s3924_s7 + $0x668] sm:$0xff] }
 0x120   : > { %3390 = vmatprep.subr.mxu1 %v3496_v18  ;;  %1936 = vmatmul.mubr.f32.vlgmr.msra.gmra.mxu0 %v2521_v12  ;;  %v2741_v21 = vadd.f32 %v2740_v20, %v2739_v15  ;;  %v2559_v12 = vld [vmem:[%s3924_s7 + $0x670] sm:$0xff] }
 0x121   : > { %2045 = vmatprep.mubr.f32.mxu1 %v2531_v13  ;;  %3241 = vmatprep.subr.mxu0 %v3492_v10  ;;  %v3513_v20 = vld [vmem:[%s5144_s1 + $0x230] sm:$0xff] }
 0x122   : > { %3406 = vmatpush3.msra.mxu1 %v3497_v22  ;;  %3242 = vmatpush3.msra.mxu0 %v3494_v16  ;;  %v639_v27 = vadd.f32 %v2741_v21, %v4621_v23  ;;  %v3500_v23 = vld [vmem:[%s5144_s1 + $0x2e0] sm:$0xff]  ;;  %v3512_v16 = vld [vmem:[%s5144_s1 + $0x2b0] sm:$0xff] }
 0x123   : > { %2046 = vmatmul.mubr.f32.gmra.mxu1 %v2530_v19  ;;  %v2742_v25 = vpop.f32.mrf.mxu0  ;;  %3391 = vmatprep.subr.mxu1 %v3498_v28  ;;  %v3322_v30 = vpop.f32.mrf.mxu1  ;;  %v2557_v21 = vld [vmem:[%s3924_s7 + $0x660] sm:$0xff] }
 0x124   : > { %3243 = vmatprep.subr.mxu0 %v3496_v18  ;;  %3407 = vmatpush3.msra.mxu1 %v3499_v31 }
 0x125   : > { %1940 = vmatprep.mubr.f32.mxu0 %v2529_v24  ;;  %v2743_v32 = vpop.f32.mrf.mxu0  ;;  %3244 = vmatpush3.msra.mxu0 %v3497_v22  ;;  %v743_v61 = vpop.f32.mrf.mxu1 }
 0x126   : > { %3392 = vmatprep.subr.mxu1 %v3500_v23  ;;  %v2744_v34 = vadd.f32 %v2743_v32, %v2742_v25  ;;  %1941 = vmatmul.mubr.f32.gmra.mxu0 %v2528_v49  ;;  %v4834_v35 = vadd.f32 %v743_v61, %v639_v27  ;;  %v3514_v27 = vld [vmem:[%s5144_s1 + $0x2a8] sm:$0xff]  ;;  %v2565_v32 = vld [vmem:[%s3924_s7 + $0x6a0] sm:$0xff] }
 0x127   : > { %2050 = vmatprep.mubr.f32.mxu1 %v2538_v29  ;;  %3245 = vmatprep.subr.mxu0 %v3498_v28  ;;  %v2566_v28 = vld [vmem:[%s3924_s7 + $0x6a8] sm:$0xff]  ;;  %v3517_v61 = vld [vmem:[%s5144_s1 + $0x220] sm:$0xff] }
 0x128   : > { %3408 = vmatpush3.msra.mxu1 %v3501_v36  ;;  %v644_v39 = vadd.f32 %v2744_v34, %v4647_v37  ;;  %3246 = vmatpush3.msra.mxu0 %v3499_v31  ;;  %v2745_v62 = vpop.f32.mrf.mxu0  ;;  %v3515_v29 = vld [vmem:[%s5144_s1 + $0x228] sm:$0xff]  ;;  %v3516_v31 = vld [vmem:[%s5144_s1 + $0x2a0] sm:$0xff] }
 0x129   : > { %2051 = vmatmul.mubr.f32.gmra.mxu1 %v2537_v33  ;;  %3393 = vmatprep.subr.mxu1 %v3502_v52 }
 0x12a   : > { %3247 = vmatprep.subr.mxu0 %v3500_v23  ;;  %v4846_v40 = vadd.f32 %v3322_v30, %v644_v39  ;;  %3409 = vmatpush3.msra.mxu1 %v3503_v56  ;;  %v2746_v37 = vpop.f32.mrf.mxu0 }
 0x12b   : > { %1945 = vmatprep.mubr.f32.mxu0 %v2536_v59  ;;  %3248 = vmatpush3.msra.mxu0 %v3501_v36  ;;  %v2747_v50 = vadd.f32 %v2746_v37, %v2745_v62  ;;  %v2564_v36 = vld [vmem:[%s3924_s7 + $0x698] sm:$0xff] }
 0x12c   : > { %3394 = vmatprep.subr.mxu1 %v3504_v41  ;;  %1946 = vmatmul.mubr.f32.gmra.mxu0 %v2535_v44  ;;  %v2573_v44 = vld [vmem:[%s3924_s7 + $0x6e0] sm:$0xff]  ;;  %v3519_v37 = vld [vmem:[%s5144_s1 + $0x218] sm:$0xff] }
 0x12d   : > { %2055 = vmatprep.mubr.f32.mxu1 %v2545_v58  ;;  %3249 = vmatprep.subr.mxu0 %v3502_v52  ;;  %v649_v48 = vadd.f32 %v2747_v50, %v4671_v47  ;;  %v2563_v52 = vld [vmem:[%s3924_s7 + $0x690] sm:$0xff]  ;;  %v2572_v50 = vld [vmem:[%s3924_s7 + $0x6d8] sm:$0xff] }
 0x12e   : > { %3410 = vmatpush3.msra.mxu1 %v3505_v42  ;;  %v2748_v45 = vpop.f32.mrf.mxu0  ;;  %3250 = vmatpush3.msra.mxu0 %v3503_v56  ;;  %v3325_v63 = vpop.f32.mrf.mxu1 }
 0x12f   : > { %2056 = vmatmul.mubr.f32.gmra.mxu1 %v2544_v54  ;;  %3395 = vmatprep.subr.mxu1 %v3506_v57  ;;  %v3520_v54 = vld [vmem:[%s5144_s1 + $0x290] sm:$0xff] }
 0x130   : > { %3251 = vmatprep.subr.mxu0 %v3504_v41  ;;  %v2749_v51 = vpop.f32.mrf.mxu0  ;;  %3411 = vmatpush3.msra.mxu1 %v3507_v46  ;;  %v753_v1 = vpop.f32.mrf.mxu1 }
 0x131   : > { %1950 = vmatprep.mubr.f32.mxu0 %v2543_v43  ;;  %v2750_v47 = vadd.f32 %v2749_v51, %v2748_v45  ;;  %3252 = vmatpush3.msra.mxu0 %v3505_v42  ;;  %v4872_v3 = vadd.f32 %v753_v1, %v649_v48  ;;  %v3521_v48 = vld [vmem:[%s5144_s1 + $0x210] sm:$0xff] }
 0x132   : > { %3396 = vmatprep.subr.mxu1 %v3508_v55  ;;  %1951 = vmatmul.mubr.f32.gmra.mxu0 %v2542_v53 }
 0x133   : > { %2060 = vmatprep.mubr.f32.mxu1 %v2552_v60  ;;  %v654_v4 = vadd.f32 %v2750_v47, %v4693_v6  ;;  %3253 = vmatprep.subr.mxu0 %v3506_v57  ;;  %v2751_v9 = vpop.f32.mrf.mxu0  ;;  %v2549_v6 = vld [vmem:[%s3924_s7 + $0x620] sm:$0xff]  ;;  %v2570_v47 = vld [vmem:[%s3924_s7 + $0x6c8] sm:$0xff] }
 0x134   : > { %3412 = vmatpush3.msra.mxu1 %v3509_v5  ;;  %3254 = vmatpush3.msra.mxu0 %v3507_v46  ;;  %v3522_v46 = vld [vmem:[%s5144_s1 + $0x288] sm:$0xff] }
 0x135   : > { %2061 = vmatmul.mubr.f32.gmra.mxu1 %v2551_v2  ;;  %v4879_v10 = vadd.f32 %v3325_v63, %v654_v4  ;;  %3397 = vmatprep.subr.mxu1 %v3510_v11  ;;  %v2752_v13 = vpop.f32.mrf.mxu0  ;;  %v2571_v63 = vld [vmem:[%s3924_s7 + $0x6d0] sm:$0xff]  ;;  %v2568_v2 = vld [vmem:[%s3924_s7 + $0x6b8] sm:$0xff] }
 0x136   : > { %3255 = vmatprep.subr.mxu0 %v3508_v55  ;;  %3413 = vmatpush3.msra.mxu1 %v3511_v14  ;;  %v2753_v15 = vadd.f32 %v2752_v13, %v2751_v9  ;;  %v3523_v55 = vld [vmem:[%s5144_s1 + $0x208] sm:$0xff]  ;;  %v2567_v9 = vld [vmem:[%s3924_s7 + $0x6b0] sm:$0xff] }
 0x137   : > { %1955 = vmatprep.mubr.f32.mxu0 %v2550_v7  ;;  %3256 = vmatpush3.msra.mxu0 %v3509_v5  ;;  %v3524_v7 = vld [vmem:[%s5144_s1 + $0x280] sm:$0xff] }
 0x138   : > { %3398 = vmatprep.subr.mxu1 %v3512_v16  ;;  %v3328_v18 = vpop.f32.mrf.mxu1  ;;  %1956 = vmatmul.mubr.f32.gmra.mxu0 %v2549_v6  ;;  %v659_v19 = vadd.f32 %v2753_v15, %v4720_v26  ;;  %v2556_v26 = vld [vmem:[%s3924_s7 + $0x658] sm:$0xff]  ;;  %v2526_v15 = vld [vmem:[%s3924_s7 + $0x568] sm:$0xff] }
 0x139   : > { %2065 = vmatprep.mubr.f32.mxu1 %v2559_v12  ;;  %3257 = vmatprep.subr.mxu0 %v3510_v11  ;;  %v2754_v22 = vpop.f32.mrf.mxu0 }
 0x13a   : > { %3414 = vmatpush3.msra.mxu1 %v3513_v20  ;;  %v763_v24 = vpop.f32.mrf.mxu1  ;;  %3258 = vmatpush3.msra.mxu0 %v3511_v14  ;;  %v3525_v14 = vld [vmem:[%s5144_s1 + $0x200] sm:$0xff] }
 0x13b   : > { %2066 = vmatmul.mubr.f32.gmra.mxu1 %v2558_v17  ;;  %v4898_v25 = vadd.f32 %v763_v24, %v659_v19  ;;  %3399 = vmatprep.subr.mxu1 %v3514_v27  ;;  %v2755_v49 = vpop.f32.mrf.mxu0  ;;  %v3526_v19 = vld [vmem:[%s5144_s1 + $0x318] sm:$0xff]  ;;  %v2533_v24 = vld [vmem:[%s3924_s7 + $0x5a0] sm:$0xff] }
 0x13c   : > { %3259 = vmatprep.subr.mxu0 %v3512_v16  ;;  %3415 = vmatpush3.msra.mxu1 %v3515_v29  ;;  %v2756_v30 = vadd.f32 %v2755_v49, %v2754_v22 }
 0x13d   : > { %1960 = vmatprep.mubr.f32.mxu0 %v2557_v21  ;;  %3260 = vmatpush3.msra.mxu0 %v3513_v20  ;;  %v2525_v20 = vld [vmem:[%s3924_s7 + $0x560] sm:$0xff]  ;;  %v2575_v21 = vld [vmem:[%s3924_s7 + $0x6f0] sm:$0xff] }
 0x13e   : > { %3400 = vmatprep.subr.mxu1 %v3516_v31  ;;  %1961 = vmatmul.mubr.f32.gmra.mxu0 %v2556_v26  ;;  %v664_v23 = vadd.f32 %v2756_v30, %v4744_v38  ;;  %v2857_v34 = vpop.f32.mrf.mxu1  ;;  %v3518_v38 = vld [vmem:[%s5144_s1 + $0x298] sm:$0xff]  ;;  %v3527_v26 = vld [vmem:[%s5144_s1 + $0x310] sm:$0xff] }
 0x13f   : > { %2070 = vmatprep.mubr.f32.mxu1 %v2566_v28  ;;  %v2801_v33 = vpop.f32.mrf.mxu0  ;;  %3261 = vmatprep.subr.mxu0 %v3514_v27  ;;  %v2574_v28 = vld [vmem:[%s3924_s7 + $0x6e8] sm:$0xff]  ;;  %v2527_v30 = vld [vmem:[%s3924_s7 + $0x570] sm:$0xff] }
 0x140   : > { %3416 = vmatpush3.msra.mxu1 %v3517_v61  ;;  %3262 = vmatpush3.msra.mxu0 %v3515_v29  ;;  %v4917_v59 = vadd.f32 %v3328_v18, %v664_v23  ;;  %v2858_v62 = vpop.f32.mrf.mxu1 }
 0x141   : > { %2071 = vmatmul.mubr.f32.gmra.mxu1 %v2565_v32  ;;  %v2802_v39 = vpop.f32.mrf.mxu0  ;;  %3401 = vmatprep.subr.mxu1 %v3518_v38  ;;  %v2859_v56 = vadd.f32 %v2858_v62, %v2857_v34  ;;  %v2532_v32 = vld [vmem:[%s3924_s7 + $0x598] sm:$0xff]  ;;  %v3528_v34 = vld [vmem:[%s5144_s1 + $0x308] sm:$0xff] }
 0x142   : > { %3263 = vmatprep.subr.mxu0 %v3516_v31  ;;  %v2803_v58 = vadd.f32 %v2802_v39, %v2801_v33  ;;  %3417 = vmatpush3.msra.mxu1 %v3519_v37  ;;  %v2860_v41 = vpop.f32.mrf.mxu1  ;;  %v2534_v62 = vld [vmem:[%s3924_s7 + $0x5a8] sm:$0xff] }
 0x143   : > { %1965 = vmatprep.mubr.f32.mxu0 %v2564_v36  ;;  %3264 = vmatpush3.msra.mxu0 %v3517_v61  ;;  %v2540_v61 = vld [vmem:[%s3924_s7 + $0x5d8] sm:$0xff] }
 0x144   : > { %3402 = vmatprep.subr.mxu1 %v3520_v54  ;;  %v4931_v42 = vadd.f32 %v2859_v56, %v2803_v58  ;;  %v2804_v43 = vpop.f32.mrf.mxu0  ;;  %1966 = vmatmul.mubr.f32.gmra.mxu0 %v2563_v52  ;;  %v2861_v45 = vpop.f32.mrf.mxu1  ;;  %v2541_v58 = vld [vmem:[%s3924_s7 + $0x5e0] sm:$0xff]  ;;  %v2539_v56 = vld [vmem:[%s3924_s7 + $0x5d0] sm:$0xff] }
 0x145   : > { %2075 = vmatprep.mubr.f32.mxu1 %v2573_v44  ;;  %3265 = vmatprep.subr.mxu0 %v3518_v38  ;;  %v2862_v53 = vadd.f32 %v2861_v45, %v2860_v41  ;;  %v3529_v44 = vld [vmem:[%s5144_s1 + $0x300] sm:$0xff]  ;;  %v2548_v45 = vld [vmem:[%s3924_s7 + $0x618] sm:$0xff] }
 0x146   : > { %3418 = vmatpush3.msra.mxu1 %v3521_v48  ;;  %v2805_v57 = vpop.f32.mrf.mxu0  ;;  %3266 = vmatpush3.msra.mxu0 %v3519_v37  ;;  %v2863_v51 = vpop.f32.mrf.mxu1 }
 0x147   : > { %2076 = vmatmul.mubr.f32.gmra.mxu1 %v2572_v50  ;;  %v2806_v60 = vadd.f32 %v2805_v57, %v2804_v43  ;;  %3403 = vmatprep.subr.mxu1 %v3522_v46  ;;  %v2547_v50 = vld [vmem:[%s3924_s7 + $0x610] sm:$0xff] }
 0x148   : > { %3267 = vmatprep.subr.mxu0 %v3520_v54  ;;  %v2807_v1 = vpop.f32.mrf.mxu0  ;;  %3419 = vmatpush3.msra.mxu1 %v3523_v55  ;;  %v2864_v5 = vpop.f32.mrf.mxu1 }
 0x149   : > { %1970 = vmatprep.mubr.f32.mxu0 %v2571_v63  ;;  %v4945_v4 = vadd.f32 %v2862_v53, %v2806_v60  ;;  %3268 = vmatpush3.msra.mxu0 %v3521_v48  ;;  %v2865_v6 = vadd.f32 %v2864_v5, %v2863_v51  ;;  %v2555_v63 = vld [vmem:[%s3924_s7 + $0x650] sm:$0xff]  ;;  %v2546_v60 = vld [vmem:[%s3924_s7 + $0x608] sm:$0xff] }
 0x14a   : > { %3404 = vmatprep.subr.mxu1 %v3524_v7  ;;  %v2808_v11 = vpop.f32.mrf.mxu0  ;;  %1971 = vmatmul.mubr.f32.gmra.mxu0 %v2570_v47 }
 0x14b   : > { %3269 = vmatprep.subr.mxu0 %v3522_v46  ;;  %v2809_v12 = vadd.f32 %v2808_v11, %v2807_v1  ;;  %v2866_v13 = vpop.f32.mrf.mxu1  ;;  %3420 = vmatpush3.msra.mxu1 %v3525_v14  ;;  %v2554_v46 = vld [vmem:[%s3924_s7 + $0x648] sm:$0xff] }
 0x14c   : > { %2175 = vmatprep.mubr.f32.mxu1 %v2568_v2  ;;  %3270 = vmatpush3.msra.mxu0 %v3523_v55  ;;  %v2810_v17 = vpop.f32.mrf.mxu0  ;;  %v2562_v55 = vld [vmem:[%s3924_s7 + $0x688] sm:$0xff] }
 0x14d   : > { %2176 = vmatmul.mubr.f32.vlgmr.msra.gmra.mxu1 %v2567_v9  ;;  %v4955_v16 = vadd.f32 %v2865_v6, %v2809_v12  ;;  %v2867_v18 = vpop.f32.mrf.mxu1  ;;  %3369 = vmatprep.subr.mxu1 %v3526_v19  ;;  %v2553_v6 = vld [vmem:[%s3924_s7 + $0x640] sm:$0xff] }
 0x14e   : > { %3271 = vmatprep.subr.mxu0 %v3524_v7  ;;  %v2868_v22 = vadd.f32 %v2867_v18, %v2866_v13  ;;  %3370 = vmatpush3.msra.mxu1 %v3526_v19  ;;  %v2811_v27 = vpop.f32.mrf.mxu0  ;;  %v2569_v7 = vld [vmem:[%s3924_s7 + $0x6c0] sm:$0xff] }
 0x14f   : > { %3272 = vmatpush3.msra.mxu0 %v3525_v14  ;;  %2145 = vmatprep.mubr.f32.mxu0 %v2526_v15  ;;  %v2812_v49 = vadd.f32 %v2811_v27, %v2810_v17  ;;  %v2869_v29 = vpop.f32.mrf.mxu1  ;;  %v2561_v12 = vld [vmem:[%s3924_s7 + $0x680] sm:$0xff]  ;;  %v2576_v17 = vld [vmem:[%s3924_s7 + $0x6f8] sm:$0xff] }
 0x150   : > { %3371 = vmatprep.subr.mxu1 %v3527_v26  ;;  %2146 = vmatmul.mubr.f32.vlgmr.msra.gmra.mxu0 %v2525_v20  ;;  %v2560_v20 = vld [vmem:[%s3924_s7 + $0x678] sm:$0xff]  ;;  %s2588_s7 = sshll.u32 %s5371_s13, 6 }
 0x151   : > { %2180 = vmatprep.mubr.f32.mxu1 %v2575_v21  ;;  %v2813_v31 = vpop.f32.mrf.mxu0  ;;  %3372 = vmatpush3.msra.mxu1 %v3527_v26  ;;  %v4969_v23 = vadd.f32 %v2868_v22, %v2812_v49  ;;  %v2870_v33 = vpop.f32.mrf.mxu1  ;;  %s5102_s6 = scalar_lea.vmem %s5146_s3, %s2588_s7 }
 0x152   : > { %2150 = vmatprep.mubr.f32.mxu0 %v2533_v24  ;;  %2181 = vmatmul.mubr.f32.gmra.mxu1 %v2574_v28  ;;  %v2871_v39 = vadd.f32 %v2870_v33, %v2869_v29 }
 0x153   : > { %3373 = vmatprep.subr.mxu1 %v3528_v34  ;;  %v2814_v36 = vpop.f32.mrf.mxu0  ;;  %3377 = vmatprep.mubr.msk.f32.mxu1 %vm327_vm0, %v2527_v30 }
 0x154   : > { %3374 = vmatpush3.msra.mxu1 %v3528_v34  ;;  %v2815_v38 = vadd.f32 %v2814_v36, %v2813_v31  ;;  %v2872_v52 = vpop.f32.mrf.mxu1  ;;  %2151 = vmatmul.mubr.f32.gmra.mxu0 %v2532_v32 }
 0x155   : > { %3375 = vmatprep.subr.mxu1 %v3529_v44  ;;  %2155 = vmatprep.mubr.f32.mxu0 %v2540_v61  ;;  %v2816_v41 = vpop.f32.mrf.mxu0 }
 0x156   : > { %3376 = vmatpush3.msra.mxu1 %v3529_v44  ;;  %v4982_v37 = vadd.f32 %v2871_v39, %v2815_v38  ;;  %v2873_v54 = vpop.f32.mrf.mxu1 }
 0x157   : > { %3378 = vmatmul.mubr.msk.f32.vlgmr.msra.gmra.mxu1 %vm327_vm0, %v2534_v62  ;;  %v2874_v43 = vadd.f32 %v2873_v54, %v2872_v52  ;;  %v2817_v48 = vpop.f32.mrf.mxu0 }
 0x158   : > { %3380 = vmatprep.mubr.msk.f32.mxu1 %vm327_vm0, %v2541_v58  ;;  %2156 = vmatmul.mubr.f32.gmra.mxu0 %v2539_v56  ;;  %v2818_v57 = vadd.f32 %v2817_v48, %v2816_v41  ;;  %v2875_v53 = vpop.f32.mrf.mxu1 }
 0x159   : > { %2160 = vmatprep.mubr.f32.mxu0 %v2547_v50 }
 0x15a   : > { %v2819_v51 = vpop.f32.mrf.mxu0  ;;  %v4992_v47 = vadd.f32 %v2874_v43, %v2818_v57  ;;  %v2876_v1 = vpop.f32.mrf.mxu1 }
 0x15b   : > { %3381 = vmatmul.mubr.msk.f32.gmra.mxu1 %vm327_vm0, %v2548_v45  ;;  %v2877_v5 = vadd.f32 %v2876_v1, %v2875_v53 }
 0x15c   : > { %3383 = vmatprep.mubr.msk.f32.mxu1 %vm327_vm0, %v2555_v63  ;;  %v2820_v2 = vpop.f32.mrf.mxu0  ;;  %2161 = vmatmul.mubr.f32.gmra.mxu0 %v2546_v60 }
 0x15d   : > { %v2821_v9 = vadd.f32 %v2820_v2, %v2819_v51  ;;  %v2878_v11 = vpop.f32.mrf.mxu1  ;;  %2165 = vmatprep.mubr.f32.mxu0 %v2554_v46 }
 0x15e   : > { %v2822_v14 = vpop.f32.mrf.mxu0 }
 0x15f   : > { %3384 = vmatmul.mubr.msk.f32.gmra.mxu1 %vm327_vm0, %v2562_v55  ;;  %v1055_v13 = vadd.f32 %v2877_v5, %v2821_v9  ;;  %v2879_v15 = vpop.f32.mrf.mxu1 }
 0x160   : > { %3386 = vmatprep.mubr.msk.f32.mxu1 %vm327_vm0, %v2569_v7  ;;  %v2880_v18 = vadd.f32 %v2879_v15, %v2878_v11  ;;  %2166 = vmatmul.mubr.f32.gmra.mxu0 %v2553_v6  ;;  %v2823_v19 = vpop.f32.mrf.mxu0 }
 0x161   : > { %2170 = vmatprep.mubr.f32.mxu0 %v2561_v12  ;;  %v2824_v21 = vadd.f32 %v2823_v19, %v2822_v14 }
 0x163   : > { %3387 = vmatmul.mubr.msk.f32.gmra.mxu1 %vm327_vm0, %v2576_v17  ;;  %v1060_v22 = vadd.f32 %v2880_v18, %v2824_v21  ;;  %v2913_v24 = vpop.f32.mrf.mxu0  ;;  %v3339_v27 = vpop.f32.mrf.mxu1 }
 0x164   : > { %2171 = vmatmul.mubr.f32.gmra.mxu0 %v2560_v20 }
 0x165   : > { %v2914_v26 = vpop.f32.mrf.mxu0  ;;  %v1234_v49 = vpop.f32.mrf.mxu1 }
 0x166   : > { %v2915_v28 = vadd.f32 %v2914_v26, %v2913_v24 }
 0x168   : > { %v1130_v30 = vadd.f32 %v2915_v28, %v4931_v42 }
 0x169   : > { %v2916_v29 = vpop.f32.mrf.mxu0 }
 0x16a   : > { %v5005_v32 = vadd.f32 %v1234_v49, %v1130_v30 }
 0x16b   : > { %v2917_v31 = vpop.f32.mrf.mxu0 }
 0x16c   : > { %v2918_v33 = vadd.f32 %v2917_v31, %v2916_v29  ;;  %v1273_v34 = vmax.f32 %v4784_v0, %v5005_v32 }
 0x16e   : > { %v1135_v61 = vadd.f32 %v2918_v33, %v4945_v4  ;;  %v2919_v36 = vpop.f32.mrf.mxu0 }
 0x170   : > { %v5010_v39 = vadd.f32 %v3339_v27, %v1135_v61  ;;  %v2920_v62 = vpop.f32.mrf.mxu0 }
 0x171   : > { %v2921_v38 = vadd.f32 %v2920_v62, %v2919_v36 }
 0x172   : > { %v1274_v52 = vmax.f32 %v4815_v8, %v5010_v39 }
 0x173   : > { %v1140_v44 = vadd.f32 %v2921_v38, %v4955_v16  ;;  %v2922_v42 = vpop.f32.mrf.mxu0 }
 0x174   : > { %v3342_v58 = vpop.f32.mrf.mxu1 }
 0x175   : > { %v2923_v56 = vpop.f32.mrf.mxu0 }
 0x176   : > { %v1244_v41 = vpop.f32.mrf.mxu1  ;;  %v2924_v54 = vadd.f32 %v2923_v56, %v2922_v42 }
 0x177   : > { %v5015_v50 = vadd.f32 %v1244_v41, %v1140_v44 }
 0x178   : > { %v1145_v43 = vadd.f32 %v2924_v54, %v4969_v23 }
 0x179   : > { %v1275_v4 = vmax.f32 %v4834_v35, %v5015_v50  ;;  %v2925_v45 = vpop.f32.mrf.mxu0 }
 0x17a   : > { %v5020_v48 = vadd.f32 %v3342_v58, %v1145_v43 }
 0x17b   : > { %v2926_v63 = vpop.f32.mrf.mxu0 }
 0x17c   : > { %v2927_v57 = vadd.f32 %v2926_v63, %v2925_v45  ;;  %v1276_v16 = vmax.f32 %v4846_v40, %v5020_v48 }
 0x17e   : > { %v1150_v53 = vadd.f32 %v2927_v57, %v4982_v37  ;;  %v2928_v60 = vpop.f32.mrf.mxu0 }
 0x17f   : > { %v3345_v51 = vpop.f32.mrf.mxu1 }
 0x180   : > { %v2929_v46 = vpop.f32.mrf.mxu0 }
 0x181   : > { %v1254_v1 = vpop.f32.mrf.mxu1  ;;  %v2930_v55 = vadd.f32 %v2929_v46, %v2928_v60 }
 0x182   : > { %v5025_v2 = vadd.f32 %v1254_v1, %v1150_v53 }
 0x183   : > { %v1155_v23 = vadd.f32 %v2930_v55, %v4992_v47 }
 0x184   : > { %v1277_v5 = vmax.f32 %v4872_v3, %v5025_v2  ;;  %v2931_v7 = vpop.f32.mrf.mxu0 }
 0x185   : > { %v5030_v9 = vadd.f32 %v3345_v51, %v1155_v23 }
 0x186   : > { %v2932_v11 = vpop.f32.mrf.mxu0 }
 0x187   : > { %v2933_v6 = vadd.f32 %v2932_v11, %v2931_v7  ;;  %v1278_v37 = vmax.f32 %v4879_v10, %v5030_v9  ;;  %v3348_v12 = vpop.f32.mrf.mxu1 }
 0x189   : > { %v1160_v14 = vadd.f32 %v2933_v6, %v1055_v13  ;;  %v1264_v17 = vpop.f32.mrf.mxu1 }
 0x18a   : > { %v2934_v15 = vpop.f32.mrf.mxu0 }
 0x18b   : > { %v5034_v18 = vadd.f32 %v1264_v17, %v1160_v14 }
 0x18c   : > { %v2935_v19 = vpop.f32.mrf.mxu0 }
 0x18d   : > { %v2936_v20 = vadd.f32 %v2935_v19, %v2934_v15  ;;  %v1279_v47 = vmax.f32 %v4898_v25, %v5034_v18  ;;  %v3037_v21 = vpop.f32.mrf.mxu1 }
 0x18f   : > { %v1165_v24 = vadd.f32 %v2936_v20, %v1060_v22  ;;  %v2981_v27 = vpop.f32.mrf.mxu0  ;;  %v3038_v26 = vpop.f32.mrf.mxu1 }
 0x190   : > { %v3039_v49 = vadd.f32 %v3038_v26, %v3037_v21 }
 0x191   : > { %v5038_v28 = vadd.f32 %v3348_v12, %v1165_v24  ;;  %v2982_v29 = vpop.f32.mrf.mxu0  ;;  %v3040_v30 = vpop.f32.mrf.mxu1 }
 0x192   : > { %v2983_v31 = vadd.f32 %v2982_v29, %v2981_v27 }
 0x193   : > { %v1280_v13 = vmax.f32 %v4917_v59, %v5038_v28  ;;  %v3041_v61 = vpop.f32.mrf.mxu1 }
 0x194   : > { %v2984_v33 = vpop.f32.mrf.mxu0  ;;  %v1534_v36 = vadd.f32 %v3039_v49, %v2983_v31  ;;  %v3042_v62 = vadd.f32 %v3041_v61, %v3040_v30 }
 0x195   : > { %v3043_v44 = vpop.f32.mrf.mxu1 }
 0x196   : > { %v2985_v38 = vpop.f32.mrf.mxu0 }
 0x197   : > { %v2986_v42 = vadd.f32 %v2985_v38, %v2984_v33  ;;  %v3044_v58 = vpop.f32.mrf.mxu1 }
 0x198   : > { %v2987_v56 = vpop.f32.mrf.mxu0  ;;  %v3045_v41 = vadd.f32 %v3044_v58, %v3043_v44 }
 0x199   : > { %v1539_v22 = vadd.f32 %v3042_v62, %v2986_v42  ;;  %v3046_v54 = vpop.f32.mrf.mxu1 }
 0x19a   : > { %v2988_v43 = vpop.f32.mrf.mxu0 }
 0x19b   : > { %v2989_v45 = vadd.f32 %v2988_v43, %v2987_v56  ;;  %v3047_v63 = vpop.f32.mrf.mxu1 }
 0x19c   : > { %v3048_v53 = vadd.f32 %v3047_v63, %v3046_v54 }
 0x19d   : > { %v2990_v57 = vpop.f32.mrf.mxu0  ;;  %v1544_v60 = vadd.f32 %v3045_v41, %v2989_v45 }
 0x19e   : > { %v3049_v46 = vpop.f32.mrf.mxu1 }
 0x19f   : > { %v2991_v51 = vpop.f32.mrf.mxu0 }
 0x1a0   : > { %v2992_v1 = vadd.f32 %v2991_v51, %v2990_v57  ;;  %v3050_v55 = vpop.f32.mrf.mxu1 }
 0x1a1   : > { %v2993_v7 = vpop.f32.mrf.mxu0  ;;  %v3051_v11 = vadd.f32 %v3050_v55, %v3049_v46 }
 0x1a2   : > { %v1549_v23 = vadd.f32 %v3048_v53, %v2992_v1  ;;  %v3052_v6 = vpop.f32.mrf.mxu1 }
 0x1a3   : > { %v2994_v12 = vpop.f32.mrf.mxu0 }
 0x1a4   : > { %v2995_v14 = vadd.f32 %v2994_v12, %v2993_v7  ;;  %v3053_v15 = vpop.f32.mrf.mxu1 }
 0x1a5   : > { %v3054_v19 = vadd.f32 %v3053_v15, %v3052_v6 }
 0x1a6   : > { %v2996_v17 = vpop.f32.mrf.mxu0  ;;  %v1554_v20 = vadd.f32 %v3051_v11, %v2995_v14 }
 0x1a7   : > { %v3055_v24 = vpop.f32.mrf.mxu1 }
 0x1a8   : > { %v2997_v21 = vpop.f32.mrf.mxu0 }
 0x1a9   : > { %v2998_v27 = vadd.f32 %v2997_v21, %v2996_v17  ;;  %v3056_v26 = vpop.f32.mrf.mxu1 }
 0x1aa   : > { %v2999_v29 = vpop.f32.mrf.mxu0  ;;  %v3057_v30 = vadd.f32 %v3056_v26, %v3055_v24 }
 0x1ab   : > { %v1559_v49 = vadd.f32 %v3054_v19, %v2998_v27  ;;  %v3058_v31 = vpop.f32.mrf.mxu1 }
 0x1ac   : > { %v3000_v33 = vpop.f32.mrf.mxu0 }
 0x1ad   : > { %v3001_v61 = vadd.f32 %v3000_v33, %v2999_v29  ;;  %v3059_v62 = vpop.f32.mrf.mxu1 }
 0x1ae   : > { %v3060_v42 = vadd.f32 %v3059_v62, %v3058_v31 }
 0x1af   : > { %v3002_v38 = vpop.f32.mrf.mxu0  ;;  %v1564_v44 = vadd.f32 %v3057_v30, %v3001_v61 }
 0x1b1   : > { %v3003_v58 = vpop.f32.mrf.mxu0 }
 0x1b2   : > { %v3004_v56 = vadd.f32 %v3003_v58, %v3002_v38  ;;  %v3359_v43 = vpop.f32.mrf.mxu1 }
 0x1b4   : > { %v1569_v41 = vadd.f32 %v3060_v42, %v3004_v56  ;;  %v3093_v54 = vpop.f32.mrf.mxu0  ;;  %v1743_v57 = vpop.f32.mrf.mxu1 }
 0x1b6   : > { %v3094_v45 = vpop.f32.mrf.mxu0 }
 0x1b7   : > { %v3095_v63 = vadd.f32 %v3094_v45, %v3093_v54 }
 0x1b9   : > { %v3096_v53 = vpop.f32.mrf.mxu0  ;;  %v1639_v51 = vadd.f32 %v3095_v63, %v1534_v36 }
 0x1bb   : > { %v1744_v46 = vadd.f32 %v1743_v57, %v1639_v51  ;;  %v3097_v1 = vpop.f32.mrf.mxu0 }
 0x1bc   : > { %v3098_v55 = vadd.f32 %v3097_v1, %v3096_v53 }
 0x1bd   : > { %v5045_v7 = vmax.f32 %v1273_v34, %v1744_v46 }
 0x1be   : > { %v1644_v11 = vadd.f32 %v3098_v55, %v1539_v22  ;;  %v3099_v6 = vpop.f32.mrf.mxu0 }
 0x1c0   : > { %v1749_v12 = vadd.f32 %v3359_v43, %v1644_v11  ;;  %v3100_v14 = vpop.f32.mrf.mxu0 }
 0x1c1   : > { %v3101_v15 = vadd.f32 %v3100_v14, %v3099_v6 }
 0x1c2   : > { %v5050_v17 = vmax.f32 %v1274_v52, %v1749_v12 }
 0x1c3   : > { %v1649_v36 = vadd.f32 %v3101_v15, %v1544_v60 }
 0x1c4   : > { %v3102_v19 = vpop.f32.mrf.mxu0  ;;  %v3362_v21 = vpop.f32.mrf.mxu1 }
 0x1c6   : > { %v3103_v24 = vpop.f32.mrf.mxu0  ;;  %v1753_v26 = vpop.f32.mrf.mxu1 }
 0x1c7   : > { %v3104_v27 = vadd.f32 %v3103_v24, %v3102_v19  ;;  %v1754_v29 = vadd.f32 %v1753_v26, %v1649_v36 }
 0x1c9   : > { %v1654_v0 = vadd.f32 %v3104_v27, %v1549_v23  ;;  %v5055_v32 = vmax.f32 %v1275_v4, %v1754_v29  ;;  %v3105_v34 = vpop.f32.mrf.mxu0 }
 0x1cb   : > { %v1759_v22 = vadd.f32 %v3362_v21, %v1654_v0  ;;  %v3106_v30 = vpop.f32.mrf.mxu0 }
 0x1cc   : > { %v3107_v39 = vadd.f32 %v3106_v30, %v3105_v34 }
 0x1cd   : > { %v5060_v8 = vmax.f32 %v1276_v16, %v1759_v22 }
 0x1ce   : > { %v1659_v60 = vadd.f32 %v3107_v39, %v1554_v20 }
 0x1cf   : > { %v3108_v52 = vpop.f32.mrf.mxu0  ;;  %v3365_v31 = vpop.f32.mrf.mxu1 }
 0x1d1   : > { %v3109_v33 = vpop.f32.mrf.mxu0  ;;  %v1763_v23 = vpop.f32.mrf.mxu1 }
 0x1d2   : > { %v3110_v61 = vadd.f32 %v3109_v33, %v3108_v52  ;;  %v1764_v62 = vadd.f32 %v1763_v23, %v1659_v60 }
 0x1d4   : > { %v1664_v38 = vadd.f32 %v3110_v61, %v1559_v49  ;;  %v5065_v35 = vmax.f32 %v1277_v5, %v1764_v62  ;;  %v3111_v50 = vpop.f32.mrf.mxu0 }
 0x1d6   : > { %v1769_v4 = vadd.f32 %v3365_v31, %v1664_v38  ;;  %v3112_v40 = vpop.f32.mrf.mxu0 }
 0x1d7   : > { %v3368_v42 = vpop.f32.mrf.mxu1  ;;  %v3113_v16 = vadd.f32 %v3112_v40, %v3111_v50 }
 0x1d8   : > { %v5070_v48 = vmax.f32 %v1278_v37, %v1769_v4 }
 0x1d9   : > { %v1773_v20 = vpop.f32.mrf.mxu1  ;;  %v1669_v58 = vadd.f32 %v3113_v16, %v1564_v44 }
 0x1da   : > { %v3114_v56 = vpop.f32.mrf.mxu0 }
 0x1db   : > { %v1774_v54 = vadd.f32 %v1773_v20, %v1669_v58 }
 0x1dc   : > { %v3115_v43 = vpop.f32.mrf.mxu0 }
 0x1dd   : > { %v3217_v49 = vpop.f32.mrf.mxu1  ;;  %v5075_v3 = vmax.f32 %v1279_v47, %v1774_v54  ;;  %v3116_v2 = vadd.f32 %v3115_v43, %v3114_v56 }
 0x1df   : > { %v3218_v5 = vpop.f32.mrf.mxu1  ;;  %v1674_v45 = vadd.f32 %v3116_v2, %v1569_v41 }
 0x1e0   : > { %v3161_v63 = vpop.f32.mrf.mxu0  ;;  %v3219_v39 = vadd.f32 %v3218_v5, %v3217_v49 }
 0x1e1   : > { %v1779_v57 = vadd.f32 %v3368_v42, %v1674_v45 }
 0x1e2   : > { %v3162_v9 = vpop.f32.mrf.mxu0 }
 0x1e3   : > { %v3220_v10 = vpop.f32.mrf.mxu1  ;;  %v5080_v37 = vmax.f32 %v1280_v13, %v1779_v57  ;;  %v3163_v52 = vadd.f32 %v3162_v9, %v3161_v63  ;;  %v5096_v9 = vld [vmem:[%s5145_s2] ss:$0 sm:$0xff] }
 0x1e5   : > { %v3221_v44 = vpop.f32.mrf.mxu1  ;;  %v2043_v61 = vadd.f32 %v3219_v39, %v3163_v52 }
 0x1e6   : > { %v3164_v53 = vpop.f32.mrf.mxu0  ;;  %v3222_v23 = vadd.f32 %v3221_v44, %v3220_v10 }
 0x1e8   : > { %v3165_v46 = vpop.f32.mrf.mxu0 }
 0x1e9   : > { %v3223_v51 = vpop.f32.mrf.mxu1  ;;  %v3166_v62 = vadd.f32 %v3165_v46, %v3164_v53 }
 0x1eb   : > { %v3224_v1 = vpop.f32.mrf.mxu1  ;;  %v2048_v56 = vadd.f32 %v3222_v23, %v3166_v62 }
 0x1ec   : > { %v3167_v25 = vpop.f32.mrf.mxu0  ;;  %v3225_v40 = vadd.f32 %v3224_v1, %v3223_v51 }
 0x1ee   : > { %v3168_v47 = vpop.f32.mrf.mxu0 }
 0x1ef   : > { %v3226_v18 = vpop.f32.mrf.mxu1  ;;  %v3169_v16 = vadd.f32 %v3168_v47, %v3167_v25 }
 0x1f1   : > { %v3227_v55 = vpop.f32.mrf.mxu1  ;;  %v2053_v45 = vadd.f32 %v3225_v40, %v3169_v16 }
 0x1f2   : > { %v3170_v11 = vpop.f32.mrf.mxu0  ;;  %v3228_v63 = vadd.f32 %v3227_v55, %v3226_v18 }
 0x1f4   : > { %v3171_v6 = vpop.f32.mrf.mxu0 }
 0x1f5   : > { %v5082_v41 = vpop.f32.mrf.mxu1  ;;  %v3172_v57 = vadd.f32 %v3171_v6, %v3170_v11 }
 0x1f7   : > { %v3230_v12 = vpop.f32.mrf.mxu1 }
 0x1f8   : > { %v3173_v14 = vpop.f32.mrf.mxu0 }
 0x1fa   : > { %v3174_v59 = vpop.f32.mrf.mxu0 }
 0x1fb   : > { %v5084_v15 = vpop.f32.mrf.mxu1 }
 0x1fd   : > { %v5086_v28 = vpop.f32.mrf.mxu1 }
 0x1fe   : > { %v5088_v13 = vpop.f32.mrf.mxu0 }
 0x200   : > { %v5090_v36 = vpop.f32.mrf.mxu0 }
 0x201   : > { %v3235_v19 = vpop.f32.mrf.mxu1  ;;  %v3178_v40 = vadd.f32 %v5090_v36, %v5088_v13 }
 0x203   : > { %v3236_v21 = vpop.f32.mrf.mxu1 }
 0x204   : > { %v3179_v24 = vpop.f32.mrf.mxu0  ;;  %v3237_v47 = vadd.f32 %v3236_v21, %v3235_v19  ;;  %v3175_v19 = vadd.f32 %v3174_v59, %v3173_v14 }
 0x206   : > { %v3180_v26 = vpop.f32.mrf.mxu0 }
 0x207   : > { %v3238_v27 = vpop.f32.mrf.mxu1  ;;  %v3181_v39 = vadd.f32 %v3180_v26, %v3179_v24 }
 0x209   : > { %v3239_v29 = vpop.f32.mrf.mxu1 }
 0x20a   : > { %v3182_v0 = vpop.f32.mrf.mxu0  ;;  %v3240_v10 = vadd.f32 %v3239_v29, %v3238_v27 }
 0x20c   : > { %v3183_v22 = vpop.f32.mrf.mxu0 }
 0x20d   : > { %v3291_v34 = vpop.f32.mrf.mxu1  ;;  %v3184_v51 = vadd.f32 %v3183_v22, %v3182_v0  ;;  %v2058_v0 = vadd.f32 %v3228_v63, %v3172_v57 }
 0x20f   : > { %v3292_v30 = vpop.f32.mrf.mxu1  ;;  %v2078_v22 = vadd.f32 %v3240_v10, %v3184_v51 }
 0x210   : > { %v3273_v60 = vpop.f32.mrf.mxu0  ;;  %v3293_v21 = vadd.f32 %v3292_v30, %v3291_v34 }
 0x212   : > { %v3294_v31 = vpop.f32.mrf.mxu1  ;;  %v3274_v33 = vpop.f32.mrf.mxu0 }
 0x213   : > { %v3275_v38 = vadd.f32 %v3274_v33, %v3273_v60  ;;  %v2073_v33 = vadd.f32 %v3237_v47, %v3181_v39 }
 0x214   : > { %v3295_v50 = vpop.f32.mrf.mxu1  ;;  %v3276_v4 = vpop.f32.mrf.mxu0 }
 0x215   : > { %v2148_v42 = vadd.f32 %v3275_v38, %v2043_v61  ;;  %v3296_v11 = vadd.f32 %v3295_v50, %v3294_v31  ;;  %v2178_v30 = vadd.f32 %v3293_v21, %v2073_v33 }
 0x216   : > { %v3277_v58 = vpop.f32.mrf.mxu0 }
 0x217   : > { %v3379_v20 = vpop.f32.mrf.mxu1  ;;  %v3278_v54 = vadd.f32 %v3277_v58, %v3276_v4 }
 0x218   : > { %v3279_v49 = vpop.f32.mrf.mxu0 }
 0x219   : > { %v2252_v43 = vpop.f32.mrf.mxu1  ;;  %v2153_v2 = vadd.f32 %v3278_v54, %v2048_v56 }
 0x21a   : > { %v2253_v5 = vadd.f32 %v2252_v43, %v2148_v42  ;;  %v3280_v53 = vpop.f32.mrf.mxu0  ;;  %v3234_v42 = vadd.f32 %v5086_v28, %v5084_v15 }
 0x21b   : > { %v3382_v44 = vpop.f32.mrf.mxu1  ;;  %v2258_v46 = vadd.f32 %v3379_v20, %v2153_v2  ;;  %v3281_v25 = vadd.f32 %v3280_v53, %v3279_v49 }
 0x21c   : > { %v2291_v1 = vmax.f32 %v5045_v7, %v2253_v5  ;;  %v3282_v55 = vpop.f32.mrf.mxu0  ;;  %v3231_v7 = vadd.f32 %v3230_v12, %v5082_v41  ;;  %v2183_v12 = vadd.f32 %v3296_v11, %v2078_v22  ;;  %v2068_v49 = vadd.f32 %v3234_v42, %v3178_v40 }
 0x21d   : > { %v2262_v18 = vpop.f32.mrf.mxu1  ;;  %v2292_v6 = vmax.f32 %v5050_v17, %v2258_v46  ;;  %v2158_v29 = vadd.f32 %v3281_v25, %v2053_v45 }
 0x21e   : > { %v2306_v27 = vadd.f32 %v5096_v9, %v2291_v1  ;;  %v3283_v26 = vpop.f32.mrf.mxu0  ;;  %v2063_v14 = vadd.f32 %v3231_v7, %v3175_v19 }
 0x21f   : > { %v3385_v24 = vpop.f32.mrf.mxu1  ;;  %v2307_v52 = vadd.f32 %v5096_v9, %v2292_v6  ;;  %v2263_v60 = vadd.f32 %v2262_v18, %v2158_v29  ;;  %v3284_v31 = vadd.f32 %v3283_v26, %v3282_v55 }
 0x220   : > { %2314 = vst.msk [vmem:[%s5102_s6] sm:$0xff] %vm327_vm0, %v2306_v27  ;;  %v3285_v61 = vpop.f32.mrf.mxu0 }
 0x221   : > { %v2272_v17 = vpop.f32.mrf.mxu1  ;;  %2315 = vst.msk [vmem:[%s5102_s6 + $0x8] sm:$0xff] %vm327_vm0, %v2307_v52  ;;  %v2293_v23 = vmax.f32 %v5055_v32, %v2263_v60  ;;  %v2163_v41 = vadd.f32 %v3284_v31, %v2058_v0 }
 0x222   : > { %v3286_v34 = vpop.f32.mrf.mxu0 }
 0x223   : > { %v3388_v59 = vpop.f32.mrf.mxu1  ;;  %v2308_v62 = vadd.f32 %v5096_v9, %v2293_v23  ;;  %v2268_v38 = vadd.f32 %v3382_v44, %v2163_v41  ;;  %v3287_v4 = vadd.f32 %v3286_v34, %v3285_v61 }
 0x224   : > { %v2288_v50 = vadd.f32 %v3388_v59, %v2183_v12  ;;  %v3288_v16 = vpop.f32.mrf.mxu0 }
 0x225   : > { %v2282_v32 = vpop.f32.mrf.mxu1  ;;  %2316 = vst.msk [vmem:[%s5102_s6 + $0x10] sm:$0xff] %vm327_vm0, %v2308_v62  ;;  %v2294_v20 = vmax.f32 %v5060_v8, %v2268_v38  ;;  %v2168_v56 = vadd.f32 %v3287_v4, %v2063_v14 }
 0x226   : > { %v2298_v58 = vmax.f32 %v5080_v37, %v2288_v50  ;;  %v2283_v54 = vadd.f32 %v2282_v32, %v2178_v30  ;;  %v3289_v43 = vpop.f32.mrf.mxu0 }
 0x227   : > { %v2309_v15 = vadd.f32 %v5096_v9, %v2294_v20  ;;  %v2273_v13 = vadd.f32 %v2272_v17, %v2168_v56  ;;  %v3290_v2 = vadd.f32 %v3289_v43, %v3288_v16 }
 0x228   : > { %v2313_v28 = vadd.f32 %v5096_v9, %v2298_v58  ;;  %v2297_v36 = vmax.f32 %v5075_v3, %v2283_v54 }
 0x229   : > { %2317 = vst.msk [vmem:[%s5102_s6 + $0x18] sm:$0xff] %vm327_vm0, %v2309_v15  ;;  %v2295_v8 = vmax.f32 %v5065_v35, %v2273_v13  ;;  %v2173_v5 = vadd.f32 %v3290_v2, %v2068_v49 }
 0x22a   : > { %2321 = vst.msk [vmem:[%s5102_s6 + $0x38] sm:$0xff] %vm327_vm0, %v2313_v28  ;;  %v2312_v37 = vadd.f32 %v5096_v9, %v2297_v36 }
 0x22b   : > { %v2310_v45 = vadd.f32 %v5096_v9, %v2295_v8  ;;  %v2278_v63 = vadd.f32 %v3385_v24, %v2173_v5 }
 0x22c   : > { %2320 = vst.msk [vmem:[%s5102_s6 + $0x30] sm:$0xff] %vm327_vm0, %v2312_v37 }
 0x22d   : > { %2318 = vst.msk [vmem:[%s5102_s6 + $0x20] sm:$0xff] %vm327_vm0, %v2310_v45  ;;  %v2296_v3 = vmax.f32 %v5070_v48, %v2278_v63 }
 0x22f   : > { %v2311_v57 = vadd.f32 %v5096_v9, %v2296_v3 }
 0x231   : > { %2319 = vst.msk [vmem:[%s5102_s6 + $0x28] sm:$0xff] %vm327_vm0, %v2311_v57 }
 0x232 PF: > { %s13_s12 = sadd.s32 1, %s3536_s12  }
 0x233   : > { %p10_p4 = scmp.ge.s32.totalorder %s13_s12, 4  }
 0x235   :  { %12 = sbr.rel (!%p10_p4) target bundleno = 1 (0x1), region = 65 }

// kernel: tudui_forward.6
= control target key start
LH: loop header
LB: loop body
LE: loop exit
PB: predicated region body
PF: predicated region fallthrough
CT: control target
= control target key end

     0   :  { %s2262_s12 = smov 0   ;;  %s3309_s0 = inlined_call_operand.vmem [shape: f32[2,4,16,800], index: 0, kind: input, shape index: {}]   ;;  %s3310_s1 = inlined_call_operand.vmem [shape: f32[800,64], index: 1, kind: input, shape index: {}]   ;;  %s3311_s2 = inlined_call_operand.vmem [shape: f32[1,64], index: 2, kind: input, shape index: {}]   ;;  %s3312_s3 = inlined_call_operand.vmem [shape: f32[2,16,64], index: 3, kind: output, shape index: {}]  }
   0x1 LB: > { %s1628_s13 = sadd.s32 4294967295, %s2240_s12   ;;  %p1632_p0 = scmp.ge.s32.totalorder %s2240_s12, 1  ;;  %s2240_s12 = sphi %s2262_s12, %s13_s12  }
   0x2   : > { %p137_p1 = scmp.lt.s32.totalorder %s2240_s12, 3 }
   0x4   : > { %p138_p2 = pnand %p1632_p0, %p137_p1 }
   0x6   : > { %141 = sbr.rel (%p138_p2) target bundleno = 455 (0x1c7), region = 32 }
   0xb   : > { %v2273_v0 = vld [vmem:[%s3310_s1 + $0xf8] sm:$0xff]  ;;  %v2295_v4 = vld [vmem:[%s3310_s1 + $0xf0] sm:$0xff]  ;;  %v2317_v8 = vld [vmem:[%s3310_s1 + $0xe8] sm:$0xff]  ;;  %p2470_p3 = scmp.lt.s32.totalorder %s1628_s13, 1  ;;  %vm285_vm0 = vcmask 261120   ;;  %vm1570_vm1 = vcmask 523264  }
   0xc   : > { %3449 = vst [vmem:[#allocation2_spill] sm:$0xff] %v2273_v0  ;;  %v2278_v1 = vld [vmem:[%s3310_s1 + $0x1f8] sm:$0xff]  ;;  %1690 = vmatprep.subr.mxu0 %v2273_v0  ;;  %3451 = vst [vmem:[#allocation4_spill] sm:$0xff] %v2295_v4  ;;  %v2300_v5 = vld [vmem:[%s3310_s1 + $0x1f0] sm:$0xff] }
   0xd   : > { %v2283_v2 = vld [vmem:[%s3310_s1 + $0x78] sm:$0xff]  ;;  %1728 = vmatprep.subr.mxu1 %v2278_v1  ;;  %v2307_v6 = vld [vmem:[%s3310_s1 + $0x70] sm:$0xff]  ;;  %3453 = vst [vmem:[#allocation6_spill] sm:$0xff] %v2317_v8  ;;  %v2324_v9 = vld [vmem:[%s3310_s1 + $0x1e8] sm:$0xff]  ;;  %s3590_s13 = smov (!%p2470_p3, %s1628_s13), 1 }
   0xe   : > { %3450 = vst [vmem:[#allocation3_spill] sm:$0xff] %v2283_v2  ;;  %v2290_v3 = vld [vmem:[%s3310_s1 + $0x178] sm:$0xff]  ;;  %1691 = vmatpush3.msra.mxu0 %v2283_v2  ;;  %3452 = vst [vmem:[#allocation5_spill] sm:$0xff] %v2307_v6  ;;  %v2312_v7 = vld [vmem:[%s3310_s1 + $0x170] sm:$0xff]  ;;  %s2214_s15 = smul.u32 448, %s3590_s13 }
   0xf   : > { %1729 = vmatpush3.msra.mxu1 %v2290_v3  ;;  %1692 = vmatprep.subr.mxu0 %v2295_v4  ;;  %v2329_v10 = vld [vmem:[%s3310_s1 + $0x68] sm:$0xff]  ;;  %v2341_v12 = vld [vmem:[%s3310_s1 + $0xe0] sm:$0xff]  ;;  %v2365_v16 = vld [vmem:[%s3310_s1 + $0xd8] sm:$0xff] }
  0x10   : > { %1730 = vmatprep.subr.mxu1 %v2300_v5  ;;  %3454 = vst [vmem:[#allocation7_spill] sm:$0xff] %v2329_v10  ;;  %v2334_v11 = vld [vmem:[%s3310_s1 + $0x168] sm:$0xff]  ;;  %1693 = vmatpush3.msra.mxu0 %v2307_v6  ;;  %3455 = vst [vmem:[#allocation8_spill] sm:$0xff] %v2341_v12  ;;  %v2346_v13 = vld [vmem:[%s3310_s1 + $0x1e0] sm:$0xff]  ;;  %s2628_s7 = scalar_lea.vmem %s3309_s0, %s2214_s15 }
  0x11   : > { %1731 = vmatpush3.msra.mxu1 %v2312_v7  ;;  %1694 = vmatprep.subr.mxu0 %v2317_v8  ;;  %v2353_v14 = vld [vmem:[%s3310_s1 + $0x60] sm:$0xff]  ;;  %3457 = vst [vmem:[#allocation10_spill] sm:$0xff] %v2365_v16  ;;  %v2370_v17 = vld [vmem:[%s3310_s1 + $0x1d8] sm:$0xff]  ;;  %v2389_v20 = vld [vmem:[%s3310_s1 + $0xd0] sm:$0xff] }
  0x12   : > { %1732 = vmatprep.subr.mxu1 %v2324_v9  ;;  %3456 = vst [vmem:[#allocation9_spill] sm:$0xff] %v2353_v14  ;;  %v2358_v15 = vld [vmem:[%s3310_s1 + $0x160] sm:$0xff]  ;;  %1695 = vmatpush3.msra.mxu0 %v2329_v10  ;;  %v2377_v18 = vld [vmem:[%s3310_s1 + $0x58] sm:$0xff]  ;;  %3459 = vst [vmem:[#allocation12_spill] sm:$0xff] %v2389_v20 }
  0x13   : > { %1733 = vmatpush3.msra.mxu1 %v2334_v11  ;;  %1696 = vmatprep.subr.mxu0 %v2341_v12  ;;  %3458 = vst [vmem:[#allocation11_spill] sm:$0xff] %v2377_v18  ;;  %v2382_v19 = vld [vmem:[%s3310_s1 + $0x158] sm:$0xff]  ;;  %v2394_v21 = vld [vmem:[%s3310_s1 + $0x1d0] sm:$0xff]  ;;  %v2413_v24 = vld [vmem:[%s3310_s1 + $0xc8] sm:$0xff] }
  0x14   : > { %1734 = vmatprep.subr.mxu1 %v2346_v13  ;;  %1697 = vmatpush3.msra.mxu0 %v2353_v14  ;;  %v2401_v22 = vld [vmem:[%s3310_s1 + $0x50] sm:$0xff]  ;;  %3461 = vst [vmem:[#allocation14_spill] sm:$0xff] %v2413_v24  ;;  %v2418_v25 = vld [vmem:[%s3310_s1 + $0x1c8] sm:$0xff]  ;;  %v2437_v28 = vld [vmem:[%s3310_s1 + $0xc0] sm:$0xff] }
  0x15   : > { %1735 = vmatpush3.msra.mxu1 %v2358_v15  ;;  %1698 = vmatprep.subr.mxu0 %v2365_v16  ;;  %3460 = vst [vmem:[#allocation13_spill] sm:$0xff] %v2401_v22  ;;  %v2406_v23 = vld [vmem:[%s3310_s1 + $0x150] sm:$0xff]  ;;  %v2425_v26 = vld [vmem:[%s3310_s1 + $0x48] sm:$0xff]  ;;  %3464 = vst [vmem:[#allocation17_spill] sm:$0xff] %v2437_v28 }
  0x16   : > { %1736 = vmatprep.subr.mxu1 %v2370_v17  ;;  %1699 = vmatpush3.msra.mxu0 %v2377_v18  ;;  %3462 = vst [vmem:[#allocation15_spill] sm:$0xff] %v2425_v26  ;;  %v2430_v27 = vld [vmem:[%s3310_s1 + $0x148] sm:$0xff]  ;;  %v2442_v29 = vld [vmem:[%s3310_s1 + $0x1c0] sm:$0xff]  ;;  %v2461_v32 = vld [vmem:[%s3310_s1 + $0xb8] sm:$0xff] }
  0x17   : > { %1737 = vmatpush3.msra.mxu1 %v2382_v19  ;;  %1700 = vmatprep.subr.mxu0 %v2389_v20  ;;  %3463 = vst [vmem:[#allocation16_spill] sm:$0xff] %v2430_v27  ;;  %3465 = vst [vmem:[#allocation18_spill] sm:$0xff] %v2442_v29  ;;  %v2449_v30 = vld [vmem:[%s3310_s1 + $0x40] sm:$0xff]  ;;  %v2466_v33 = vld [vmem:[%s3310_s1 + $0x1b8] sm:$0xff] }
  0x18   : > { %1738 = vmatprep.subr.mxu1 %v2394_v21  ;;  %1701 = vmatpush3.msra.mxu0 %v2401_v22  ;;  %3466 = vst [vmem:[#allocation19_spill] sm:$0xff] %v2449_v30  ;;  %v2454_v31 = vld [vmem:[%s3310_s1 + $0x140] sm:$0xff]  ;;  %3467 = vst [vmem:[#allocation20_spill] sm:$0xff] %v2461_v32  ;;  %v2479_v34 = vld [vmem:[%s3310_s1 + $0x38] sm:$0xff] }
  0x19   : > { %1739 = vmatpush3.msra.mxu1 %v2406_v23  ;;  %1702 = vmatprep.subr.mxu0 %v2413_v24  ;;  %3468 = vst [vmem:[#allocation21_spill] sm:$0xff] %v2466_v33  ;;  %3470 = vst [vmem:[#allocation22_spill] sm:$0xff] %v2479_v34  ;;  %v2484_v35 = vld [vmem:[%s3310_s1 + $0x138] sm:$0xff]  ;;  %v2491_v36 = vld [vmem:[%s3310_s1 + $0xb0] sm:$0xff] }
  0x1a   : > { %1740 = vmatprep.subr.mxu1 %v2418_v25  ;;  %1703 = vmatpush3.msra.mxu0 %v2425_v26  ;;  %3471 = vst [vmem:[#allocation23_spill] sm:$0xff] %v2491_v36  ;;  %v2496_v37 = vld [vmem:[%s3310_s1 + $0x1b0] sm:$0xff]  ;;  %v2515_v40 = vld [vmem:[%s3310_s1 + $0xa8] sm:$0xff]  ;;  %v2545_v44 = vld [vmem:[%s3310_s1 + $0xa0] sm:$0xff] }
  0x1b   : > { %1741 = vmatpush3.msra.mxu1 %v2430_v27  ;;  %1704 = vmatprep.subr.mxu0 %v2437_v28  ;;  %3472 = vst [vmem:[#allocation24_spill] sm:$0xff] %v2496_v37  ;;  %v2503_v38 = vld [vmem:[%s3310_s1 + $0x30] sm:$0xff]  ;;  %3475 = vst [vmem:[#allocation27_spill] sm:$0xff] %v2515_v40  ;;  %v2520_v41 = vld [vmem:[%s3310_s1 + $0x1a8] sm:$0xff] }
  0x1c   : > { %1742 = vmatprep.subr.mxu1 %v2442_v29  ;;  %1705 = vmatpush3.msra.mxu0 %v2449_v30  ;;  %3473 = vst [vmem:[#allocation25_spill] sm:$0xff] %v2503_v38  ;;  %v2508_v39 = vld [vmem:[%s3310_s1 + $0x130] sm:$0xff]  ;;  %3476 = vst [vmem:[#allocation28_spill] sm:$0xff] %v2520_v41  ;;  %v2533_v42 = vld [vmem:[%s3310_s1 + $0x28] sm:$0xff] }
  0x1d   : > { %1743 = vmatpush3.msra.mxu1 %v2454_v31  ;;  %1706 = vmatprep.subr.mxu0 %v2461_v32  ;;  %3474 = vst [vmem:[#allocation26_spill] sm:$0xff] %v2508_v39  ;;  %v2538_v43 = vld [vmem:[%s3310_s1 + $0x128] sm:$0xff]  ;;  %3478 = vst [vmem:[#allocation30_spill] sm:$0xff] %v2545_v44  ;;  %v2550_v45 = vld [vmem:[%s3310_s1 + $0x1a0] sm:$0xff] }
  0x1e   : > { %1744 = vmatprep.subr.mxu1 %v2466_v33  ;;  %1707 = vmatpush3.msra.mxu0 %v2479_v34  ;;  %3477 = vst [vmem:[#allocation29_spill] sm:$0xff] %v2538_v43  ;;  %3479 = vst [vmem:[#allocation31_spill] sm:$0xff] %v2550_v45  ;;  %v2557_v46 = vld [vmem:[%s3310_s1 + $0x20] sm:$0xff]  ;;  %v2569_v48 = vld [vmem:[%s3310_s1 + $0x98] sm:$0xff] }
  0x1f   : > { %1745 = vmatpush3.msra.mxu1 %v2484_v35  ;;  %1708 = vmatprep.subr.mxu0 %v2491_v36  ;;  %v2562_v47 = vld [vmem:[%s3310_s1 + $0x120] sm:$0xff]  ;;  %v2574_v49 = vld [vmem:[%s3310_s1 + $0x198] sm:$0xff]  ;;  %v2594_v52 = vld [vmem:[%s3310_s1 + $0x90] sm:$0xff] }
  0x20   : > { %1746 = vmatprep.subr.mxu1 %v2496_v37  ;;  %1709 = vmatpush3.msra.mxu0 %v2503_v38  ;;  %3480 = vst [vmem:[#allocation32_spill] sm:$0xff] %v2562_v47  ;;  %3481 = vst [vmem:[#allocation33_spill] sm:$0xff] %v2574_v49  ;;  %v2582_v50 = vld [vmem:[%s3310_s1 + $0x18] sm:$0xff]  ;;  %v2599_v53 = vld [vmem:[%s3310_s1 + $0x190] sm:$0xff] }
  0x21   : > { %1747 = vmatpush3.msra.mxu1 %v2508_v39  ;;  %1710 = vmatprep.subr.mxu0 %v2515_v40  ;;  %v2587_v51 = vld [vmem:[%s3310_s1 + $0x118] sm:$0xff]  ;;  %3483 = vst [vmem:[#allocation35_spill] sm:$0xff] %v2599_v53  ;;  %v2606_v54 = vld [vmem:[%s3310_s1 + $0x10] sm:$0xff]  ;;  %v2618_v56 = vld [vmem:[%s3310_s1 + $0x88] sm:$0xff] }
  0x22   : > { %1748 = vmatprep.subr.mxu1 %v2520_v41  ;;  %1711 = vmatpush3.msra.mxu0 %v2533_v42  ;;  %3482 = vst [vmem:[#allocation34_spill] sm:$0xff] %v2587_v51  ;;  %v2611_v55 = vld [vmem:[%s3310_s1 + $0x110] sm:$0xff]  ;;  %v2623_v57 = vld [vmem:[%s3310_s1 + $0x188] sm:$0xff]  ;;  %v2647_v60 = vld [vmem:[%s3310_s1 + $0x80] sm:$0xff] }
  0x23   : > { %1749 = vmatpush3.msra.mxu1 %v2538_v43  ;;  %1712 = vmatprep.subr.mxu0 %v2545_v44  ;;  %3484 = vst [vmem:[#allocation36_spill] sm:$0xff] %v2611_v55  ;;  %3485 = vst [vmem:[#allocation37_spill] sm:$0xff] %v2623_v57  ;;  %v2635_v58 = vld [vmem:[%s3310_s1 + $0x8] sm:$0xff]  ;;  %v2652_v61 = vld [vmem:[%s3310_s1 + $0x180] sm:$0xff] }
  0x24   : > { %1750 = vmatprep.subr.mxu1 %v2550_v45  ;;  %1713 = vmatpush3.msra.mxu0 %v2557_v46  ;;  %v2640_v59 = vld [vmem:[%s3310_s1 + $0x108] sm:$0xff]  ;;  %3487 = vst [vmem:[#allocation39_spill] sm:$0xff] %v2652_v61  ;;  %v2659_v62 = vld [vmem:[%s3310_s1] sm:$0xff]  ;;  %v2773_v37 = vld [vmem:[%s3310_s1 + $0x2d0] sm:$0xff] }
  0x25   : > { %1751 = vmatpush3.msra.mxu1 %v2562_v47  ;;  %1714 = vmatprep.subr.mxu0 %v2569_v48  ;;  %3486 = vst [vmem:[#allocation38_spill] sm:$0xff] %v2640_v59  ;;  %v272_v63 = vld [vmem:[%s2628_s7 + $0x8] sm:$0xff]  ;;  %v2699_v47 = vld [vmem:[%s3310_s1 + $0x310] sm:$0xff]  ;;  %v2741_v41 = vld [vmem:[%s3310_s1 + $0x300] sm:$0xff] }
  0x26   : > { %1752 = vmatprep.subr.mxu1 %v2574_v49  ;;  %1715 = vmatpush3.msra.mxu0 %v2582_v50  ;;  %v2683_v49 = vld [vmem:[%s3310_s1 + $0x318] sm:$0xff]  ;;  %3490 = vst [vmem:[#allocation42_spill] sm:$0xff] %v2699_v47  ;;  %v280_v45 = vld [vmem:[%s2628_s7 + $0x48] sm:$0xff]  ;;  %3493 = vst [vmem:[#allocation45_spill] sm:$0xff] %v2741_v41 }
  0x27   : > { %1753 = vmatpush3.msra.mxu1 %v2587_v51  ;;  %1716 = vmatprep.subr.mxu0 %v2594_v52  ;;  %v273_v51 = vld [vmem:[%s2628_s7 + $0x10] sm:$0xff]  ;;  %3489 = vst [vmem:[#allocation41_spill] sm:$0xff] %v2683_v49  ;;  %v2719_v43 = vld [vmem:[%s3310_s1 + $0x2e8] sm:$0xff]  ;;  %3497 = vst [vmem:[#allocation49_spill] sm:$0xff] %v2773_v37 }
  0x28   : > { %1754 = vmatprep.subr.mxu1 %v2599_v53  ;;  %1717 = vmatpush3.msra.mxu0 %v2606_v54  ;;  %v274_v53 = vld [vmem:[%s2628_s7 + $0x18] sm:$0xff]  ;;  %v284_v39 = vld [vmem:[%s2628_s7 + $0x68] sm:$0xff] }
  0x29   : > { %1755 = vmatpush3.msra.mxu1 %v2611_v55  ;;  %1718 = vmatprep.subr.mxu0 %v2618_v56  ;;  %v2667_v55 = vld [vmem:[%s3310_s1 + $0x100] sm:$0xff] }
  0x2a   : > { %1756 = vmatprep.subr.mxu1 %v2623_v57  ;;  %1719 = vmatpush3.msra.mxu0 %v2635_v58  ;;  %3488 = vst [vmem:[#allocation40_spill] sm:$0xff] %v2667_v55  ;;  %v271_v57 = vld [vmem:[%s2628_s7] sm:$0xff] }
  0x2b   : > { %1757 = vmatpush3.msra.mxu1 %v2640_v59  ;;  %1720 = vmatprep.subr.mxu0 %v2647_v60  ;;  %v2678_v59 = vld [vmem:[%s3310_s1 + $0x2f8] sm:$0xff] }
  0x2c   : > { %1758 = vmatprep.subr.mxu1 %v2652_v61  ;;  %1721 = vmatpush3.msra.mxu0 %v2659_v62  ;;  %v2689_v61 = vld [vmem:[%s3310_s1 + $0x278] sm:$0xff] }
  0x2d   : > { %356 = vmatprep.mubr.f32.mxu0 %v272_v63  ;;  %1759 = vmatpush3.msra.mxu1 %v2667_v55  ;;  %v2694_v63 = vld [vmem:[%s3310_s1 + $0x2f0] sm:$0xff] }
  0x2e   : > { %431 = vmatprep.mubr.f32.mxu1 %v274_v53  ;;  %357 = vmatmul.mubr.f32.vlgmr.msra.gmra.mxu0 %v271_v57  ;;  %v279_v53 = vld [vmem:[%s2628_s7 + $0x40] sm:$0xff]  ;;  %v281_v55 = vld [vmem:[%s2628_s7 + $0x50] sm:$0xff]  ;;  %v278_v57 = vld [vmem:[%s2628_s7 + $0x38] sm:$0xff] }
  0x2f   : > { %432 = vmatmul.mubr.f32.vlgmr.msra.gmra.mxu1 %v273_v51  ;;  %1766 = vmatprep.subr.mxu0 %v2678_v59  ;;  %v2710_v51 = vld [vmem:[%s3310_s1 + $0x270] sm:$0xff] }
  0x30   : > { %2170 = vmatprep.subr.mxu1 %v2683_v49  ;;  %1767 = vmatpush3.msra.mxu0 %v2689_v61 }
  0x31   : > { %2171 = vmatpush3.msra.mxu1 %v2683_v49  ;;  %1768 = vmatprep.subr.mxu0 %v2694_v63  ;;  %v2724_v49 = vld [vmem:[%s3310_s1 + $0x308] sm:$0xff] }
  0x32   : > { %2172 = vmatprep.subr.mxu1 %v2699_v47  ;;  %361 = vmatprep.mubr.f32.mxu0 %v279_v53  ;;  %3491 = vst [vmem:[#allocation43_spill] sm:$0xff] %v2724_v49  ;;  %v2731_v53 = vld [vmem:[%s3310_s1 + $0x268] sm:$0xff] }
  0x33   : > { %436 = vmatprep.mubr.f32.mxu1 %v281_v55  ;;  %1769 = vmatpush3.msra.mxu0 %v2710_v51  ;;  %v2736_v55 = vld [vmem:[%s3310_s1 + $0x2e0] sm:$0xff] }
  0x34   : > { %2173 = vmatpush3.msra.mxu1 %v2699_v47  ;;  %362 = vmatmul.mubr.f32.gmra.mxu0 %v278_v57  ;;  %3492 = vst [vmem:[#allocation44_spill] sm:$0xff] %v2736_v55  ;;  %v2748_v47 = vld [vmem:[%s3310_s1 + $0x260] sm:$0xff]  ;;  %v2756_v57 = vld [vmem:[%s3310_s1 + $0x2d8] sm:$0xff] }
  0x35   : > { %437 = vmatmul.mubr.f32.gmra.mxu1 %v280_v45  ;;  %1770 = vmatprep.subr.mxu0 %v2719_v43  ;;  %3494 = vst [vmem:[#allocation46_spill] sm:$0xff] %v2748_v47  ;;  %v277_v45 = vld [vmem:[%s2628_s7 + $0x30] sm:$0xff]  ;;  %3495 = vst [vmem:[#allocation47_spill] sm:$0xff] %v2756_v57 }
  0x36   : > { %2174 = vmatprep.subr.mxu1 %v2724_v49  ;;  %1771 = vmatpush3.msra.mxu0 %v2731_v53 }
  0x37   : > { %2175 = vmatpush3.msra.mxu1 %v2724_v49  ;;  %1772 = vmatprep.subr.mxu0 %v2736_v55  ;;  %v2766_v49 = vld [vmem:[%s3310_s1 + $0x258] sm:$0xff] }
  0x38   : > { %2176 = vmatprep.subr.mxu1 %v2741_v41  ;;  %1773 = vmatpush3.msra.mxu0 %v2748_v47  ;;  %3496 = vst [vmem:[#allocation48_spill] sm:$0xff] %v2766_v49 }
  0x39   : > { %2177 = vmatpush3.msra.mxu1 %v2741_v41  ;;  %2178 = vmatprep.mubr.msk.f32.mxu1 %vm285_vm0, %v277_v45  ;;  %v2780_v41 = vld [vmem:[%s3310_s1 + $0x250] sm:$0xff]  ;;  %v2787_v45 = vld [vmem:[%s3310_s1 + $0x2c8] sm:$0xff] }
  0x3a   : > { %1774 = vmatprep.subr.mxu0 %v2756_v57  ;;  %2179 = vmatmul.mubr.msk.f32.vlgmr.msra.gmra.mxu1 %vm285_vm0, %v284_v39  ;;  %3498 = vst [vmem:[#allocation50_spill] sm:$0xff] %v2780_v41  ;;  %3499 = vst [vmem:[#allocation51_spill] sm:$0xff] %v2787_v45  ;;  %v2794_v39 = vld [vmem:[%s3310_s1 + $0x248] sm:$0xff] }
  0x3b   : > { %1810 = vmatprep.subr.mxu1 %v2273_v0  ;;  %1775 = vmatpush3.msra.mxu0 %v2766_v49  ;;  %3500 = vst [vmem:[#allocation52_spill] sm:$0xff] %v2794_v39  ;;  %v276_v0 = vld [vmem:[%s2628_s7 + $0x28] sm:$0xff] }
  0x3c   : > { %1811 = vmatpush3.msra.mxu1 %v2283_v2  ;;  %1776 = vmatprep.subr.mxu0 %v2773_v37  ;;  %v2801_v2 = vld [vmem:[%s3310_s1 + $0x2c0] sm:$0xff] }
  0x3d   : > { %1812 = vmatprep.subr.mxu1 %v2295_v4  ;;  %1777 = vmatpush3.msra.mxu0 %v2780_v41  ;;  %3501 = vst [vmem:[#allocation53_spill] sm:$0xff] %v2801_v2  ;;  %v2808_v4 = vld [vmem:[%s3310_s1 + $0x240] sm:$0xff] }
  0x3e   : > { %1813 = vmatpush3.msra.mxu1 %v2307_v6  ;;  %1778 = vmatprep.subr.mxu0 %v2787_v45  ;;  %3502 = vst [vmem:[#allocation54_spill] sm:$0xff] %v2808_v4  ;;  %v2815_v6 = vld [vmem:[%s3310_s1 + $0x2b8] sm:$0xff] }
  0x3f   : > { %1814 = vmatprep.subr.mxu1 %v2317_v8  ;;  %1779 = vmatpush3.msra.mxu0 %v2794_v39  ;;  %3503 = vst [vmem:[#allocation55_spill] sm:$0xff] %v2815_v6  ;;  %v2822_v8 = vld [vmem:[%s3310_s1 + $0x238] sm:$0xff] }
  0x40   : > { %1815 = vmatpush3.msra.mxu1 %v2329_v10  ;;  %1780 = vmatprep.subr.mxu0 %v2801_v2  ;;  %3504 = vst [vmem:[#allocation56_spill] sm:$0xff] %v2822_v8  ;;  %v2829_v10 = vld [vmem:[%s3310_s1 + $0x2b0] sm:$0xff] }
  0x41   : > { %1816 = vmatprep.subr.mxu1 %v2341_v12  ;;  %1781 = vmatpush3.msra.mxu0 %v2808_v4  ;;  %3505 = vst [vmem:[#allocation57_spill] sm:$0xff] %v2829_v10  ;;  %v2836_v12 = vld [vmem:[%s3310_s1 + $0x230] sm:$0xff] }
  0x42   : > { %1817 = vmatpush3.msra.mxu1 %v2353_v14  ;;  %1782 = vmatprep.subr.mxu0 %v2815_v6  ;;  %3506 = vst [vmem:[#allocation58_spill] sm:$0xff] %v2836_v12  ;;  %v2843_v14 = vld [vmem:[%s3310_s1 + $0x2a8] sm:$0xff] }
  0x43   : > { %1818 = vmatprep.subr.mxu1 %v2365_v16  ;;  %1783 = vmatpush3.msra.mxu0 %v2822_v8  ;;  %3507 = vst [vmem:[#allocation59_spill] sm:$0xff] %v2843_v14  ;;  %v2850_v16 = vld [vmem:[%s3310_s1 + $0x228] sm:$0xff] }
  0x44   : > { %1819 = vmatpush3.msra.mxu1 %v2377_v18  ;;  %1784 = vmatprep.subr.mxu0 %v2829_v10  ;;  %v2857_v18 = vld [vmem:[%s3310_s1 + $0x2a0] sm:$0xff] }
  0x45   : > { %1820 = vmatprep.subr.mxu1 %v2389_v20  ;;  %1785 = vmatpush3.msra.mxu0 %v2836_v12  ;;  %3508 = vst [vmem:[#allocation60_spill] sm:$0xff] %v2857_v18  ;;  %v2864_v20 = vld [vmem:[%s3310_s1 + $0x220] sm:$0xff] }
  0x46   : > { %1821 = vmatpush3.msra.mxu1 %v2401_v22  ;;  %1786 = vmatprep.subr.mxu0 %v2843_v14  ;;  %v2871_v22 = vld [vmem:[%s3310_s1 + $0x298] sm:$0xff] }
  0x47   : > { %1822 = vmatprep.subr.mxu1 %v2413_v24  ;;  %1787 = vmatpush3.msra.mxu0 %v2850_v16  ;;  %3509 = vst [vmem:[#allocation61_spill] sm:$0xff] %v2871_v22  ;;  %v2878_v24 = vld [vmem:[%s3310_s1 + $0x218] sm:$0xff] }
  0x48   : > { %1823 = vmatpush3.msra.mxu1 %v2425_v26  ;;  %1788 = vmatprep.subr.mxu0 %v2857_v18  ;;  %3510 = vst [vmem:[#allocation62_spill] sm:$0xff] %v2878_v24  ;;  %v2885_v26 = vld [vmem:[%s3310_s1 + $0x290] sm:$0xff] }
  0x49   : > { %1824 = vmatprep.subr.mxu1 %v2437_v28  ;;  %1789 = vmatpush3.msra.mxu0 %v2864_v20  ;;  %v2892_v28 = vld [vmem:[%s3310_s1 + $0x210] sm:$0xff] }
  0x4a   : > { %1825 = vmatpush3.msra.mxu1 %v2449_v30  ;;  %1790 = vmatprep.subr.mxu0 %v2871_v22  ;;  %3511 = vst [vmem:[#allocation63_spill] sm:$0xff] %v2892_v28  ;;  %v2899_v30 = vld [vmem:[%s3310_s1 + $0x288] sm:$0xff] }
  0x4b   : > { %1826 = vmatprep.subr.mxu1 %v2461_v32  ;;  %1791 = vmatpush3.msra.mxu0 %v2878_v24  ;;  %3512 = vst [vmem:[#allocation64_spill] sm:$0xff] %v2899_v30  ;;  %v2906_v32 = vld [vmem:[%s3310_s1 + $0x208] sm:$0xff] }
  0x4c   : > { %1827 = vmatpush3.msra.mxu1 %v2479_v34  ;;  %1792 = vmatprep.subr.mxu0 %v2885_v26  ;;  %3513 = vst [vmem:[#allocation65_spill] sm:$0xff] %v2906_v32  ;;  %v2913_v34 = vld [vmem:[%s3310_s1 + $0x280] sm:$0xff] }
  0x4d   : > { %1828 = vmatprep.subr.mxu1 %v2491_v36  ;;  %1793 = vmatpush3.msra.mxu0 %v2892_v28  ;;  %3514 = vst [vmem:[#allocation66_spill] sm:$0xff] %v2913_v34  ;;  %v2920_v36 = vld [vmem:[%s3310_s1 + $0x200] sm:$0xff] }
  0x4e   : > { %1829 = vmatpush3.msra.mxu1 %v2503_v38  ;;  %1794 = vmatprep.subr.mxu0 %v2899_v30  ;;  %v275_v38 = vld [vmem:[%s2628_s7 + $0x20] sm:$0xff] }
  0x4f   : > { %1830 = vmatprep.subr.mxu1 %v2515_v40  ;;  %1795 = vmatpush3.msra.mxu0 %v2906_v32  ;;  %v283_v40 = vld [vmem:[%s2628_s7 + $0x60] sm:$0xff] }
  0x50   : > { %1831 = vmatpush3.msra.mxu1 %v2533_v42  ;;  %1796 = vmatprep.subr.mxu0 %v2913_v34 }
  0x51   : > { %1832 = vmatprep.subr.mxu1 %v2545_v44  ;;  %1797 = vmatpush3.msra.mxu0 %v2920_v36  ;;  %v282_v44 = vld [vmem:[%s2628_s7 + $0x58] sm:$0xff] }
  0x52   : > { %506 = vmatprep.mubr.f32.mxu0 %v276_v0  ;;  %1833 = vmatpush3.msra.mxu1 %v2557_v46  ;;  %v1639_v0 = vld [vmem:[%s2628_s7 + $0x78] sm:$0xff] }
  0x53   : > { %507 = vmatmul.mubr.f32.vlgmr.msra.gmra.mxu0 %v275_v38  ;;  %1834 = vmatprep.subr.mxu1 %v2569_v48  ;;  %v1638_v38 = vld [vmem:[%s2628_s7 + $0x70] sm:$0xff] }
  0x54   : > { %1848 = vmatprep.subr.mxu0 %v2278_v1  ;;  %1835 = vmatpush3.msra.mxu1 %v2582_v50 }
  0x55   : > { %1849 = vmatpush3.msra.mxu0 %v2290_v3  ;;  %1836 = vmatprep.subr.mxu1 %v2594_v52 }
  0x56   : > { %1850 = vmatprep.subr.mxu0 %v2300_v5  ;;  %511 = vmatprep.mubr.f32.mxu0 %v283_v40  ;;  %v3515_v40 = vld [vmem:[#allocation24_spill] sm:$0xff] }
  0x57   : > { %1837 = vmatpush3.msra.mxu1 %v2606_v54  ;;  %1851 = vmatpush3.msra.mxu0 %v2312_v7 }
  0x58   : > { %1838 = vmatprep.subr.mxu1 %v2618_v56  ;;  %512 = vmatmul.mubr.f32.gmra.mxu0 %v282_v44  ;;  %v3516_v44 = vld [vmem:[#allocation26_spill] sm:$0xff] }
  0x59   : > { %1852 = vmatprep.subr.mxu0 %v2324_v9  ;;  %1839 = vmatpush3.msra.mxu1 %v2635_v58 }
  0x5a   : > { %1853 = vmatpush3.msra.mxu0 %v2334_v11  ;;  %1840 = vmatprep.subr.mxu1 %v2647_v60 }
  0x5b   : > { %1854 = vmatprep.subr.mxu0 %v2346_v13  ;;  %1841 = vmatpush3.msra.mxu1 %v2659_v62 }
  0x5c   : > { %677 = vmatprep.mubr.f32.mxu1 %v1639_v0  ;;  %1855 = vmatpush3.msra.mxu0 %v2358_v15  ;;  %v3517_v0 = vld [vmem:[#allocation28_spill] sm:$0xff] }
  0x5d   : > { %678 = vmatmul.mubr.f32.vlgmr.msra.gmra.mxu1 %v1638_v38  ;;  %1856 = vmatprep.subr.mxu0 %v2370_v17  ;;  %v3518_v38 = vld [vmem:[#allocation29_spill] sm:$0xff] }
  0x5e   : > { %1886 = vmatprep.subr.mxu1 %v2678_v59  ;;  %1857 = vmatpush3.msra.mxu0 %v2382_v19 }
  0x5f   : > { %1887 = vmatpush3.msra.mxu1 %v2689_v61  ;;  %1858 = vmatprep.subr.mxu0 %v2394_v21 }
  0x60   : > { %1888 = vmatprep.subr.mxu1 %v2694_v63  ;;  %1859 = vmatpush3.msra.mxu0 %v2406_v23 }
  0x61   : > { %1889 = vmatpush3.msra.mxu1 %v2710_v51  ;;  %1860 = vmatprep.subr.mxu0 %v2418_v25 }
  0x62   : > { %1890 = vmatprep.subr.mxu1 %v2719_v43  ;;  %1861 = vmatpush3.msra.mxu0 %v2430_v27 }
  0x63   : > { %1891 = vmatpush3.msra.mxu1 %v2731_v53  ;;  %1862 = vmatprep.subr.mxu0 %v2442_v29 }
  0x64   : > { %1892 = vmatprep.subr.mxu1 %v2736_v55  ;;  %1863 = vmatpush3.msra.mxu0 %v2454_v31  ;;  %v1645_v55 = vld [vmem:[%s2628_s7 + $0xa8] sm:$0xff] }
  0x65   : > { %1893 = vmatpush3.msra.mxu1 %v2748_v47  ;;  %1864 = vmatprep.subr.mxu0 %v2466_v33  ;;  %v3527_v47 = vld [vmem:[#allocation39_spill] sm:$0xff] }
  0x66   : > { %1894 = vmatprep.subr.mxu1 %v2756_v57  ;;  %1865 = vmatpush3.msra.mxu0 %v2484_v35  ;;  %v3519_v57 = vld [vmem:[#allocation31_spill] sm:$0xff] }
  0x67   : > { %1895 = vmatpush3.msra.mxu1 %v2766_v49  ;;  %1866 = vmatprep.subr.mxu0 %v3515_v40  ;;  %v3520_v49 = vld [vmem:[#allocation32_spill] sm:$0xff] }
  0x68   : > { %1896 = vmatprep.subr.mxu1 %v2773_v37  ;;  %1867 = vmatpush3.msra.mxu0 %v3516_v44  ;;  %v3521_v37 = vld [vmem:[#allocation33_spill] sm:$0xff] }
  0x69   : > { %1897 = vmatpush3.msra.mxu1 %v2780_v41  ;;  %1868 = vmatprep.subr.mxu0 %v3517_v0  ;;  %v3522_v41 = vld [vmem:[#allocation34_spill] sm:$0xff] }
  0x6a   : > { %1898 = vmatprep.subr.mxu1 %v2787_v45  ;;  %1869 = vmatpush3.msra.mxu0 %v3518_v38  ;;  %v3523_v45 = vld [vmem:[#allocation35_spill] sm:$0xff] }
  0x6b   : > { %1899 = vmatpush3.msra.mxu1 %v2794_v39  ;;  %1870 = vmatprep.subr.mxu0 %v3519_v57  ;;  %v3524_v39 = vld [vmem:[#allocation36_spill] sm:$0xff] }
  0x6c   : > { %1900 = vmatprep.subr.mxu1 %v2801_v2  ;;  %1871 = vmatpush3.msra.mxu0 %v3520_v49  ;;  %v3525_v2 = vld [vmem:[#allocation37_spill] sm:$0xff] }
  0x6d   : > { %1901 = vmatpush3.msra.mxu1 %v2808_v4  ;;  %1872 = vmatprep.subr.mxu0 %v3521_v37  ;;  %v1641_v4 = vld [vmem:[%s2628_s7 + $0x88] sm:$0xff] }
  0x6e   : > { %1902 = vmatprep.subr.mxu1 %v2815_v6  ;;  %1873 = vmatpush3.msra.mxu0 %v3522_v41  ;;  %v3526_v6 = vld [vmem:[#allocation38_spill] sm:$0xff] }
  0x6f   : > { %1903 = vmatpush3.msra.mxu1 %v2822_v8  ;;  %1874 = vmatprep.subr.mxu0 %v3523_v45  ;;  %v1640_v8 = vld [vmem:[%s2628_s7 + $0x80] sm:$0xff] }
  0x70   : > { %1904 = vmatprep.subr.mxu1 %v2829_v10  ;;  %1875 = vmatpush3.msra.mxu0 %v3524_v39  ;;  %v3528_v10 = vld [vmem:[#allocation40_spill] sm:$0xff] }
  0x71   : > { %1905 = vmatpush3.msra.mxu1 %v2836_v12  ;;  %1876 = vmatprep.subr.mxu0 %v3525_v2  ;;  %v1646_v12 = vld [vmem:[%s2628_s7 + $0xb0] sm:$0xff] }
  0x72   : > { %1906 = vmatprep.subr.mxu1 %v2843_v14  ;;  %1877 = vmatpush3.msra.mxu0 %v3526_v6  ;;  %v3529_v14 = vld [vmem:[#allocation41_spill] sm:$0xff] }
  0x73   : > { %1907 = vmatpush3.msra.mxu1 %v2850_v16  ;;  %1878 = vmatprep.subr.mxu0 %v3527_v47 }
  0x74   : > { %1908 = vmatprep.subr.mxu1 %v2857_v18  ;;  %1879 = vmatpush3.msra.mxu0 %v3528_v10  ;;  %v1648_v18 = vld [vmem:[%s2628_s7 + $0xc0] sm:$0xff] }
  0x75   : > { %752 = vmatprep.mubr.f32.mxu0 %v1641_v4  ;;  %1909 = vmatpush3.msra.mxu1 %v2864_v20  ;;  %v3530_v4 = vld [vmem:[#allocation42_spill] sm:$0xff] }
  0x76   : > { %753 = vmatmul.mubr.f32.vlgmr.msra.gmra.mxu0 %v1640_v8  ;;  %1910 = vmatprep.subr.mxu1 %v2871_v22  ;;  %v1647_v8 = vld [vmem:[%s2628_s7 + $0xb8] sm:$0xff] }
  0x77   : > { %2181 = vmatprep.subr.mxu0 %v3529_v14  ;;  %1911 = vmatpush3.msra.mxu1 %v2878_v24  ;;  %v3531_v24 = vld [vmem:[#allocation43_spill] sm:$0xff]  ;;  %v1643_v22 = vld [vmem:[%s2628_s7 + $0x98] sm:$0xff] }
  0x78   : > { %2182 = vmatpush3.msra.mxu0 %v3529_v14  ;;  %682 = vmatprep.mubr.f32.mxu1 %v1646_v12  ;;  %v1642_v12 = vld [vmem:[%s2628_s7 + $0x90] sm:$0xff] }
  0x79   : > { %1912 = vmatprep.subr.mxu1 %v2885_v26  ;;  %2183 = vmatprep.subr.mxu0 %v3530_v4 }
  0x7a   : > { %683 = vmatmul.mubr.f32.gmra.mxu1 %v1645_v55  ;;  %757 = vmatprep.mubr.f32.mxu0 %v1648_v18  ;;  %v3532_v55 = vld [vmem:[#allocation45_spill] sm:$0xff]  ;;  %v1644_v18 = vld [vmem:[%s2628_s7 + $0xa0] sm:$0xff] }
  0x7b   : > { %1913 = vmatpush3.msra.mxu1 %v2892_v28  ;;  %2184 = vmatpush3.msra.mxu0 %v3530_v4  ;;  %v3535_v28 = vld [vmem:[#allocation4_spill] sm:$0xff] }
  0x7c   : > { %1914 = vmatprep.subr.mxu1 %v2899_v30  ;;  %758 = vmatmul.mubr.f32.gmra.mxu0 %v1647_v8  ;;  %v1651_v30 = vld [vmem:[%s2628_s7 + $0xd8] sm:$0xff]  ;;  %v3533_v8 = vld [vmem:[#allocation2_spill] sm:$0xff] }
  0x7d   : > { %2185 = vmatprep.subr.mxu0 %v3531_v24  ;;  %1915 = vmatpush3.msra.mxu1 %v2906_v32  ;;  %v3534_v32 = vld [vmem:[#allocation3_spill] sm:$0xff] }
  0x7e   : > { %2186 = vmatpush3.msra.mxu0 %v3531_v24  ;;  %1916 = vmatprep.subr.mxu1 %v2913_v34  ;;  %v1650_v34 = vld [vmem:[%s2628_s7 + $0xd0] sm:$0xff] }
  0x7f   : > { %2187 = vmatprep.subr.mxu0 %v3532_v55  ;;  %1917 = vmatpush3.msra.mxu1 %v2920_v36 }
  0x80   : > { %827 = vmatprep.mubr.f32.mxu1 %v1643_v22  ;;  %2188 = vmatpush3.msra.mxu0 %v3532_v55  ;;  %v1649_v22 = vld [vmem:[%s2628_s7 + $0xc8] sm:$0xff] }
  0x81   : > { %828 = vmatmul.mubr.f32.vlgmr.msra.gmra.mxu1 %v1642_v12  ;;  %2189 = vmatprep.mubr.msk.f32.mxu0 %vm285_vm0, %v1644_v18  ;;  %v3536_v12 = vld [vmem:[#allocation5_spill] sm:$0xff]  ;;  %v3537_v18 = vld [vmem:[#allocation6_spill] sm:$0xff] }
  0x82   : > { %1930 = vmatprep.subr.mxu0 %v3533_v8  ;;  %1968 = vmatprep.subr.mxu1 %v2278_v1  ;;  %v3538_v1 = vld [vmem:[#allocation7_spill] sm:$0xff] }
  0x83   : > { %2190 = vmatmul.mubr.msk.f32.vlgmr.msra.gmra.mxu0 %vm285_vm0, %v1651_v30  ;;  %1969 = vmatpush3.msra.mxu1 %v2290_v3  ;;  %v3539_v3 = vld [vmem:[#allocation8_spill] sm:$0xff]  ;;  %v3541_v30 = vld [vmem:[#allocation10_spill] sm:$0xff] }
  0x84   : > { %1931 = vmatpush3.msra.mxu0 %v3534_v32  ;;  %1970 = vmatprep.subr.mxu1 %v2300_v5  ;;  %v3540_v5 = vld [vmem:[#allocation9_spill] sm:$0xff] }
  0x85   : > { %1932 = vmatprep.subr.mxu0 %v3535_v28  ;;  %832 = vmatprep.mubr.f32.mxu1 %v1650_v34  ;;  %v3550_v34 = vld [vmem:[#allocation22_spill] sm:$0xff] }
  0x86   : > { %1933 = vmatpush3.msra.mxu0 %v3536_v12  ;;  %1971 = vmatpush3.msra.mxu1 %v2312_v7  ;;  %v3542_v7 = vld [vmem:[#allocation11_spill] sm:$0xff] }
  0x87   : > { %1934 = vmatprep.subr.mxu0 %v3537_v18  ;;  %833 = vmatmul.mubr.f32.gmra.mxu1 %v1649_v22  ;;  %v3551_v22 = vld [vmem:[#allocation23_spill] sm:$0xff] }
  0x88   : > { %1972 = vmatprep.subr.mxu1 %v2324_v9  ;;  %1935 = vmatpush3.msra.mxu0 %v3538_v1  ;;  %v3543_v9 = vld [vmem:[#allocation12_spill] sm:$0xff] }
  0x89   : > { %1973 = vmatpush3.msra.mxu1 %v2334_v11  ;;  %1936 = vmatprep.subr.mxu0 %v3539_v3  ;;  %v3544_v11 = vld [vmem:[#allocation13_spill] sm:$0xff] }
  0x8a   : > { %1974 = vmatprep.subr.mxu1 %v2346_v13  ;;  %1937 = vmatpush3.msra.mxu0 %v3540_v5  ;;  %v3545_v13 = vld [vmem:[#allocation14_spill] sm:$0xff] }
  0x8b   : > { %1975 = vmatpush3.msra.mxu1 %v2358_v15  ;;  %1938 = vmatprep.subr.mxu0 %v3541_v30  ;;  %v3546_v15 = vld [vmem:[#allocation15_spill] sm:$0xff] }
  0x8c   : > { %1976 = vmatprep.subr.mxu1 %v2370_v17  ;;  %1939 = vmatpush3.msra.mxu0 %v3542_v7  ;;  %v3547_v17 = vld [vmem:[#allocation17_spill] sm:$0xff] }
  0x8d   : > { %1977 = vmatpush3.msra.mxu1 %v2382_v19  ;;  %1940 = vmatprep.subr.mxu0 %v3543_v9  ;;  %v3548_v19 = vld [vmem:[#allocation19_spill] sm:$0xff] }
  0x8e   : > { %1978 = vmatprep.subr.mxu1 %v2394_v21  ;;  %1941 = vmatpush3.msra.mxu0 %v3544_v11  ;;  %v3549_v21 = vld [vmem:[#allocation20_spill] sm:$0xff] }
  0x8f   : > { %1979 = vmatpush3.msra.mxu1 %v2406_v23  ;;  %1942 = vmatprep.subr.mxu0 %v3545_v13 }
  0x90   : > { %1980 = vmatprep.subr.mxu1 %v2418_v25  ;;  %1943 = vmatpush3.msra.mxu0 %v3546_v15 }
  0x91   : > { %1981 = vmatpush3.msra.mxu1 %v2430_v27  ;;  %1944 = vmatprep.subr.mxu0 %v3547_v17  ;;  %v3552_v27 = vld [vmem:[#allocation25_spill] sm:$0xff] }
  0x92   : > { %1982 = vmatprep.subr.mxu1 %v2442_v29  ;;  %1945 = vmatpush3.msra.mxu0 %v3548_v19  ;;  %v3553_v29 = vld [vmem:[#allocation27_spill] sm:$0xff] }
  0x93   : > { %1983 = vmatpush3.msra.mxu1 %v2454_v31  ;;  %1946 = vmatprep.subr.mxu0 %v3549_v21 }
  0x94   : > { %1984 = vmatprep.subr.mxu1 %v2466_v33  ;;  %1947 = vmatpush3.msra.mxu0 %v3550_v34  ;;  %v3554_v33 = vld [vmem:[#allocation30_spill] sm:$0xff] }
  0x95   : > { %1985 = vmatpush3.msra.mxu1 %v2484_v35  ;;  %1948 = vmatprep.subr.mxu0 %v3551_v22 }
  0x96   : > { %1986 = vmatprep.subr.mxu1 %v3515_v40  ;;  %1949 = vmatpush3.msra.mxu0 %v3552_v27 }
  0x97   : > { %1987 = vmatpush3.msra.mxu1 %v3516_v44  ;;  %1950 = vmatprep.subr.mxu0 %v3553_v29 }
  0x98   : > { %1988 = vmatprep.subr.mxu1 %v3517_v0  ;;  %1951 = vmatpush3.msra.mxu0 %v2533_v42 }
  0x99   : > { %1989 = vmatpush3.msra.mxu1 %v3518_v38  ;;  %1952 = vmatprep.subr.mxu0 %v3554_v33 }
  0x9a   : > { %1990 = vmatprep.subr.mxu1 %v3519_v57  ;;  %1953 = vmatpush3.msra.mxu0 %v2557_v46 }
  0x9b   : > { %1991 = vmatpush3.msra.mxu1 %v3520_v49  ;;  %1954 = vmatprep.subr.mxu0 %v2569_v48  ;;  %v1655_v49 = vld [vmem:[%s2628_s7 + $0xe8] sm:$0xff] }
  0x9c   : > { %1992 = vmatprep.subr.mxu1 %v3521_v37  ;;  %1955 = vmatpush3.msra.mxu0 %v2582_v50  ;;  %v1656_v37 = vld [vmem:[%s2628_s7 + $0xf0] sm:$0xff] }
  0x9d   : > { %1993 = vmatpush3.msra.mxu1 %v3522_v41  ;;  %1956 = vmatprep.subr.mxu0 %v2594_v52  ;;  %v1657_v41 = vld [vmem:[%s2628_s7 + $0xf8] sm:$0xff] }
  0x9e   : > { %1994 = vmatprep.subr.mxu1 %v3523_v45  ;;  %1957 = vmatpush3.msra.mxu0 %v2606_v54  ;;  %v1654_v45 = vld [vmem:[%s2628_s7 + $0xe0] sm:$0xff] }
  0x9f   : > { %1995 = vmatpush3.msra.mxu1 %v3524_v39  ;;  %1958 = vmatprep.subr.mxu0 %v2618_v56 }
  0xa0   : > { %1996 = vmatprep.subr.mxu1 %v3525_v2  ;;  %1959 = vmatpush3.msra.mxu0 %v2635_v58  ;;  %v1664_v2 = vld [vmem:[%s2628_s7 + $0x130] sm:$0xff] }
  0xa1   : > { %1997 = vmatpush3.msra.mxu1 %v3526_v6  ;;  %1960 = vmatprep.subr.mxu0 %v2647_v60  ;;  %v1662_v6 = vld [vmem:[%s2628_s7 + $0x120] sm:$0xff] }
  0xa2   : > { %1998 = vmatprep.subr.mxu1 %v3527_v47  ;;  %1961 = vmatpush3.msra.mxu0 %v2659_v62 }
  0xa3   : > { %1000 = vmatprep.mubr.f32.mxu0 %v1655_v49  ;;  %1999 = vmatpush3.msra.mxu1 %v3528_v10  ;;  %v1661_v49 = vld [vmem:[%s2628_s7 + $0x118] sm:$0xff] }
  0xa4   : > { %1075 = vmatprep.mubr.f32.mxu1 %v1657_v41  ;;  %1001 = vmatmul.mubr.f32.vlgmr.msra.gmra.mxu0 %v1654_v45  ;;  %v1663_v41 = vld [vmem:[%s2628_s7 + $0x128] sm:$0xff]  ;;  %v3555_v45 = vld [vmem:[#allocation44_spill] sm:$0xff] }
  0xa5   : > { %1076 = vmatmul.mubr.f32.vlgmr.msra.gmra.mxu1 %v1656_v37  ;;  %2006 = vmatprep.subr.mxu0 %v2678_v59  ;;  %v1660_v37 = vld [vmem:[%s2628_s7 + $0x110] sm:$0xff] }
  0xa6   : > { %2192 = vmatprep.subr.mxu1 %v3529_v14  ;;  %2007 = vmatpush3.msra.mxu0 %v2689_v61 }
  0xa7   : > { %2193 = vmatpush3.msra.mxu1 %v3529_v14  ;;  %2008 = vmatprep.subr.mxu0 %v2694_v63 }
  0xa8   : > { %2194 = vmatprep.subr.mxu1 %v3530_v4  ;;  %1005 = vmatprep.mubr.f32.mxu0 %v1662_v6  ;;  %v3556_v6 = vld [vmem:[#allocation46_spill] sm:$0xff] }
  0xa9   : > { %1080 = vmatprep.mubr.f32.mxu1 %v1664_v2  ;;  %2009 = vmatpush3.msra.mxu0 %v2710_v51  ;;  %v1667_v2 = vld [vmem:[%s2628_s7 + $0x148] sm:$0xff] }
  0xaa   : > { %2195 = vmatpush3.msra.mxu1 %v3530_v4  ;;  %1006 = vmatmul.mubr.f32.gmra.mxu0 %v1661_v49  ;;  %v3557_v49 = vld [vmem:[#allocation47_spill] sm:$0xff]  ;;  %v3560_v4 = vld [vmem:[#allocation50_spill] sm:$0xff] }
  0xab   : > { %1081 = vmatmul.mubr.f32.gmra.mxu1 %v1663_v41  ;;  %2010 = vmatprep.subr.mxu0 %v2719_v43  ;;  %v3558_v41 = vld [vmem:[#allocation48_spill] sm:$0xff] }
  0xac   : > { %2196 = vmatprep.subr.mxu1 %v3531_v24  ;;  %2011 = vmatpush3.msra.mxu0 %v2731_v53 }
  0xad   : > { %2197 = vmatpush3.msra.mxu1 %v3531_v24  ;;  %2012 = vmatprep.subr.mxu0 %v3555_v45  ;;  %v3559_v24 = vld [vmem:[#allocation49_spill] sm:$0xff] }
  0xae   : > { %2198 = vmatprep.subr.mxu1 %v3532_v55  ;;  %2013 = vmatpush3.msra.mxu0 %v3556_v6 }
  0xaf   : > { %2199 = vmatpush3.msra.mxu1 %v3532_v55  ;;  %2200 = vmatprep.mubr.msk.f32.mxu1 %vm285_vm0, %v1660_v37  ;;  %v3561_v55 = vld [vmem:[#allocation51_spill] sm:$0xff]  ;;  %v3562_v37 = vld [vmem:[#allocation52_spill] sm:$0xff] }
  0xb0   : > { %2014 = vmatprep.subr.mxu0 %v3557_v49  ;;  %2201 = vmatmul.mubr.msk.f32.vlgmr.msra.gmra.mxu1 %vm285_vm0, %v1667_v2 }
  0xb1   : > { %2050 = vmatprep.subr.mxu1 %v3533_v8  ;;  %2015 = vmatpush3.msra.mxu0 %v3558_v41  ;;  %v3563_v8 = vld [vmem:[#allocation53_spill] sm:$0xff] }
  0xb2   : > { %2051 = vmatpush3.msra.mxu1 %v3534_v32  ;;  %2016 = vmatprep.subr.mxu0 %v3559_v24  ;;  %v3564_v32 = vld [vmem:[#allocation54_spill] sm:$0xff] }
  0xb3   : > { %2052 = vmatprep.subr.mxu1 %v3535_v28  ;;  %2017 = vmatpush3.msra.mxu0 %v3560_v4  ;;  %v3565_v28 = vld [vmem:[#allocation55_spill] sm:$0xff] }
  0xb4   : > { %2053 = vmatpush3.msra.mxu1 %v3536_v12  ;;  %2018 = vmatprep.subr.mxu0 %v3561_v55  ;;  %v3566_v12 = vld [vmem:[#allocation56_spill] sm:$0xff] }
  0xb5   : > { %2054 = vmatprep.subr.mxu1 %v3537_v18  ;;  %2019 = vmatpush3.msra.mxu0 %v3562_v37  ;;  %v3567_v18 = vld [vmem:[#allocation57_spill] sm:$0xff] }
  0xb6   : > { %2055 = vmatpush3.msra.mxu1 %v3538_v1  ;;  %2020 = vmatprep.subr.mxu0 %v3563_v8  ;;  %v3568_v1 = vld [vmem:[#allocation58_spill] sm:$0xff] }
  0xb7   : > { %2056 = vmatprep.subr.mxu1 %v3539_v3  ;;  %2021 = vmatpush3.msra.mxu0 %v3564_v32  ;;  %v3569_v3 = vld [vmem:[#allocation59_spill] sm:$0xff] }
  0xb8   : > { %2057 = vmatpush3.msra.mxu1 %v3540_v5  ;;  %2022 = vmatprep.subr.mxu0 %v3565_v28  ;;  %v3570_v5 = vld [vmem:[#allocation60_spill] sm:$0xff] }
  0xb9   : > { %2058 = vmatprep.subr.mxu1 %v3541_v30  ;;  %2023 = vmatpush3.msra.mxu0 %v3566_v12  ;;  %v3571_v30 = vld [vmem:[#allocation61_spill] sm:$0xff] }
  0xba   : > { %2059 = vmatpush3.msra.mxu1 %v3542_v7  ;;  %2024 = vmatprep.subr.mxu0 %v3567_v18  ;;  %v3572_v7 = vld [vmem:[#allocation62_spill] sm:$0xff] }
  0xbb   : > { %2060 = vmatprep.subr.mxu1 %v3543_v9  ;;  %2025 = vmatpush3.msra.mxu0 %v3568_v1  ;;  %v3573_v9 = vld [vmem:[#allocation63_spill] sm:$0xff] }
  0xbc   : > { %2061 = vmatpush3.msra.mxu1 %v3544_v11  ;;  %2026 = vmatprep.subr.mxu0 %v3569_v3  ;;  %v3574_v11 = vld [vmem:[#allocation64_spill] sm:$0xff] }
  0xbd   : > { %2062 = vmatprep.subr.mxu1 %v3545_v13  ;;  %2027 = vmatpush3.msra.mxu0 %v2850_v16  ;;  %v1659_v13 = vld [vmem:[%s2628_s7 + $0x108] sm:$0xff] }
  0xbe   : > { %2063 = vmatpush3.msra.mxu1 %v3546_v15  ;;  %2028 = vmatprep.subr.mxu0 %v3570_v5  ;;  %v3575_v15 = vld [vmem:[#allocation65_spill] sm:$0xff] }
  0xbf   : > { %2064 = vmatprep.subr.mxu1 %v3547_v17  ;;  %2029 = vmatpush3.msra.mxu0 %v2864_v20  ;;  %v1658_v17 = vld [vmem:[%s2628_s7 + $0x100] sm:$0xff] }
  0xc0   : > { %2065 = vmatpush3.msra.mxu1 %v3548_v19  ;;  %2030 = vmatprep.subr.mxu0 %v3571_v30  ;;  %v3576_v19 = vld [vmem:[#allocation66_spill] sm:$0xff] }
  0xc1   : > { %2066 = vmatprep.subr.mxu1 %v3549_v21  ;;  %2031 = vmatpush3.msra.mxu0 %v3572_v7  ;;  %v1670_v21 = vld [vmem:[%s2628_s7 + $0x150] sm:$0xff] }
  0xc2   : > { %2067 = vmatpush3.msra.mxu1 %v3550_v34  ;;  %2032 = vmatprep.subr.mxu0 %v2885_v26  ;;  %v2231_v34 = vld [vmem:[%s3310_s1 + $0x1d8] sm:$0xff] }
  0xc3   : > { %2068 = vmatprep.subr.mxu1 %v3551_v22  ;;  %2033 = vmatpush3.msra.mxu0 %v3573_v9 }
  0xc4   : > { %2069 = vmatpush3.msra.mxu1 %v3552_v27  ;;  %2034 = vmatprep.subr.mxu0 %v3574_v11  ;;  %v2223_v27 = vld [vmem:[%s3310_s1 + $0x1f8] sm:$0xff] }
  0xc5   : > { %2070 = vmatprep.subr.mxu1 %v3553_v29  ;;  %2035 = vmatpush3.msra.mxu0 %v3575_v15  ;;  %v1666_v29 = vld [vmem:[%s2628_s7 + $0x140] sm:$0xff] }
  0xc6   : > { %2071 = vmatpush3.msra.mxu1 %v2533_v42  ;;  %2036 = vmatprep.subr.mxu0 %v3576_v19  ;;  %v2225_v42 = vld [vmem:[%s3310_s1 + $0x1f0] sm:$0xff] }
  0xc7   : > { %2072 = vmatprep.subr.mxu1 %v3554_v33  ;;  %2037 = vmatpush3.msra.mxu0 %v2920_v36  ;;  %v2224_v33 = vld [vmem:[%s3310_s1 + $0x178] sm:$0xff] }
  0xc8   : > { %1150 = vmatprep.mubr.f32.mxu0 %v1659_v13  ;;  %2073 = vmatpush3.msra.mxu1 %v2557_v46  ;;  %v1665_v46 = vld [vmem:[%s2628_s7 + $0x138] sm:$0xff] }
  0xc9   : > { %1151 = vmatmul.mubr.f32.vlgmr.msra.gmra.mxu0 %v1658_v17  ;;  %2074 = vmatprep.subr.mxu1 %v2569_v48  ;;  %v2226_v48 = vld [vmem:[%s3310_s1 + $0x170] sm:$0xff] }
  0xca   : > { %2088 = vmatprep.subr.mxu0 %v2223_v27  ;;  %2075 = vmatpush3.msra.mxu1 %v2582_v50  ;;  %v2227_v50 = vld [vmem:[%s3310_s1 + $0x1e8] sm:$0xff] }
  0xcb   : > { %2089 = vmatpush3.msra.mxu0 %v2224_v33  ;;  %2076 = vmatprep.subr.mxu1 %v2594_v52  ;;  %v1671_v52 = vld [vmem:[%s2628_s7 + $0x158] sm:$0xff] }
  0xcc   : > { %2090 = vmatprep.subr.mxu0 %v2225_v42  ;;  %1155 = vmatprep.mubr.f32.mxu0 %v1666_v29 }
  0xcd   : > { %2077 = vmatpush3.msra.mxu1 %v2606_v54  ;;  %2091 = vmatpush3.msra.mxu0 %v2226_v48  ;;  %v2228_v54 = vld [vmem:[%s3310_s1 + $0x168] sm:$0xff] }
  0xce   : > { %2078 = vmatprep.subr.mxu1 %v2618_v56  ;;  %1156 = vmatmul.mubr.f32.gmra.mxu0 %v1665_v46  ;;  %v2229_v56 = vld [vmem:[%s3310_s1 + $0x1e0] sm:$0xff] }
  0xcf   : > { %2092 = vmatprep.subr.mxu0 %v2227_v50  ;;  %2079 = vmatpush3.msra.mxu1 %v2635_v58  ;;  %v2230_v58 = vld [vmem:[%s3310_s1 + $0x160] sm:$0xff] }
  0xd0   : > { %2093 = vmatpush3.msra.mxu0 %v2228_v54  ;;  %2080 = vmatprep.subr.mxu1 %v2647_v60  ;;  %v2232_v60 = vld [vmem:[%s3310_s1 + $0x158] sm:$0xff] }
  0xd1   : > { %2094 = vmatprep.subr.mxu0 %v2229_v56  ;;  %2081 = vmatpush3.msra.mxu1 %v2659_v62  ;;  %v2233_v62 = vld [vmem:[%s3310_s1 + $0x1d0] sm:$0xff] }
  0xd2   : > { %1323 = vmatprep.mubr.f32.mxu1 %v1671_v52  ;;  %2095 = vmatpush3.msra.mxu0 %v2230_v58 }
  0xd3   : > { %1324 = vmatmul.mubr.f32.vlgmr.msra.gmra.mxu1 %v1670_v21  ;;  %2096 = vmatprep.subr.mxu0 %v2231_v34 }
  0xd4   : > { %2126 = vmatprep.subr.mxu1 %v2678_v59  ;;  %2097 = vmatpush3.msra.mxu0 %v2232_v60  ;;  %v3577_v59 = vld [vmem:[#allocation16_spill] sm:$0xff] }
  0xd5   : > { %2127 = vmatpush3.msra.mxu1 %v2689_v61  ;;  %2098 = vmatprep.subr.mxu0 %v2233_v62  ;;  %v3578_v61 = vld [vmem:[#allocation18_spill] sm:$0xff] }
  0xd6   : > { %2128 = vmatprep.subr.mxu1 %v2694_v63  ;;  %2099 = vmatpush3.msra.mxu0 %v2406_v23  ;;  %v3579_v63 = vld [vmem:[#allocation21_spill] sm:$0xff]  ;;  %v3580_v23 = vld [vmem:[#allocation32_spill] sm:$0xff] }
  0xd7   : > { %2129 = vmatpush3.msra.mxu1 %v2710_v51  ;;  %2100 = vmatprep.subr.mxu0 %v2418_v25  ;;  %v3582_v25 = vld [vmem:[#allocation34_spill] sm:$0xff] }
  0xd8   : > { %2130 = vmatprep.subr.mxu1 %v2719_v43  ;;  %2101 = vmatpush3.msra.mxu0 %v3577_v59  ;;  %v1673_v43 = vld [vmem:[%s2628_s7 + $0x168] sm:$0xff]  ;;  %v3585_v51 = vld [vmem:[#allocation38_spill] sm:$0xff] }
  0xd9   : > { %2131 = vmatpush3.msra.mxu1 %v2731_v53  ;;  %2102 = vmatprep.subr.mxu0 %v3578_v61  ;;  %v1672_v53 = vld [vmem:[%s2628_s7 + $0x160] sm:$0xff] }
  0xda   : > { %2132 = vmatprep.subr.mxu1 %v3555_v45  ;;  %2103 = vmatpush3.msra.mxu0 %v2454_v31  ;;  %v3583_v31 = vld [vmem:[#allocation35_spill] sm:$0xff] }
  0xdb   : > { %2133 = vmatpush3.msra.mxu1 %v3556_v6  ;;  %2104 = vmatprep.subr.mxu0 %v3579_v63 }
  0xdc   : > { %2134 = vmatprep.subr.mxu1 %v3557_v49  ;;  %2105 = vmatpush3.msra.mxu0 %v2484_v35  ;;  %v3584_v35 = vld [vmem:[#allocation37_spill] sm:$0xff] }
  0xdd   : > { %2135 = vmatpush3.msra.mxu1 %v3558_v41  ;;  %2106 = vmatprep.subr.mxu0 %v3515_v40  ;;  %v1677_v40 = vld [vmem:[%s2628_s7 + $0x188] sm:$0xff] }
  0xde   : > { %2136 = vmatprep.subr.mxu1 %v3559_v24  ;;  %2107 = vmatpush3.msra.mxu0 %v3516_v44  ;;  %v3581_v24 = vld [vmem:[#allocation33_spill] sm:$0xff]  ;;  %v1676_v44 = vld [vmem:[%s2628_s7 + $0x180] sm:$0xff] }
  0xdf   : > { %2137 = vmatpush3.msra.mxu1 %v3560_v4  ;;  %2108 = vmatprep.subr.mxu0 %v3517_v0  ;;  %v3587_v0 = vld [vmem:[#allocation43_spill] sm:$0xff]  ;;  %v3588_v4 = vld [vmem:[#allocation45_spill] sm:$0xff] }
  0xe0   : > { %2138 = vmatprep.subr.mxu1 %v3561_v55  ;;  %2109 = vmatpush3.msra.mxu0 %v3518_v38  ;;  %v1681_v38 = vld [vmem:[%s2628_s7 + $0x1a8] sm:$0xff] }
  0xe1   : > { %2139 = vmatpush3.msra.mxu1 %v3562_v37  ;;  %2110 = vmatprep.subr.mxu0 %v3519_v57  ;;  %v1678_v57 = vld [vmem:[%s2628_s7 + $0x190] sm:$0xff] }
  0xe2   : > { %2140 = vmatprep.subr.mxu1 %v3563_v8  ;;  %2111 = vmatpush3.msra.mxu0 %v3580_v23 }
  0xe3   : > { %2141 = vmatpush3.msra.mxu1 %v3564_v32  ;;  %2112 = vmatprep.subr.mxu0 %v3581_v24 }
  0xe4   : > { %2142 = vmatprep.subr.mxu1 %v3565_v28  ;;  %2113 = vmatpush3.msra.mxu0 %v3582_v25 }
  0xe5   : > { %2143 = vmatpush3.msra.mxu1 %v3566_v12  ;;  %2114 = vmatprep.subr.mxu0 %v3583_v31 }
  0xe6   : > { %2144 = vmatprep.subr.mxu1 %v3567_v18  ;;  %2115 = vmatpush3.msra.mxu0 %v3524_v39  ;;  %v1680_v39 = vld [vmem:[%s2628_s7 + $0x1a0] sm:$0xff] }
  0xe7   : > { %2145 = vmatpush3.msra.mxu1 %v3568_v1  ;;  %2116 = vmatprep.subr.mxu0 %v3584_v35 }
  0xe8   : > { %2146 = vmatprep.subr.mxu1 %v3569_v3  ;;  %2117 = vmatpush3.msra.mxu0 %v3585_v51 }
  0xe9   : > { %2147 = vmatpush3.msra.mxu1 %v2850_v16  ;;  %2118 = vmatprep.subr.mxu0 %v3527_v47  ;;  %v1679_v16 = vld [vmem:[%s2628_s7 + $0x198] sm:$0xff]  ;;  %v3586_v47 = vld [vmem:[#allocation42_spill] sm:$0xff] }
  0xea   : > { %2148 = vmatprep.subr.mxu1 %v3570_v5  ;;  %2119 = vmatpush3.msra.mxu0 %v3528_v10  ;;  %v1675_v10 = vld [vmem:[%s2628_s7 + $0x178] sm:$0xff] }
  0xeb   : > { %1398 = vmatprep.mubr.f32.mxu0 %v1673_v43  ;;  %2149 = vmatpush3.msra.mxu1 %v2864_v20  ;;  %v1674_v20 = vld [vmem:[%s2628_s7 + $0x170] sm:$0xff] }
  0xec   : > { %1399 = vmatmul.mubr.f32.vlgmr.msra.gmra.mxu0 %v1672_v53  ;;  %2150 = vmatprep.subr.mxu1 %v3571_v30 }
  0xed   : > { %1328 = vmatprep.mubr.f32.mxu1 %v1678_v57  ;;  %2151 = vmatpush3.msra.mxu1 %v3572_v7 }
  0xee   : > { %1403 = vmatprep.mubr.f32.mxu0 %v1680_v39  ;;  %1329 = vmatmul.mubr.f32.gmra.mxu1 %v1677_v40 }
  0xef   : > { %2152 = vmatprep.subr.mxu1 %v2885_v26  ;;  %2203 = vmatprep.subr.mxu0 %v3529_v14  ;;  %v1682_v26 = vld [vmem:[%s2628_s7 + $0x1b0] sm:$0xff]  ;;  %v1760_v55 = vpop.f32.mrf.mxu1 }
  0xf0   : > { %2153 = vmatpush3.msra.mxu1 %v3573_v9  ;;  %1404 = vmatmul.mubr.f32.gmra.mxu0 %v1679_v16 }
  0xf1   : > { %2154 = vmatprep.subr.mxu1 %v3574_v11  ;;  %2204 = vmatpush3.msra.mxu0 %v3529_v14  ;;  %v1683_v14 = vld [vmem:[%s2628_s7 + $0x1b8] sm:$0xff]  ;;  %v1761_v45 = vpop.f32.mrf.mxu1  ;;  %s1689_s7 = sshll.u32 %s3590_s13, 4 }
  0xf2   : > { %2155 = vmatpush3.msra.mxu1 %v3575_v15  ;;  %2205 = vmatprep.subr.mxu0 %v3586_v47  ;;  %v1762_v35 = vadd.f32 %v1761_v45, %v1760_v55  ;;  %s170_s24 = scalar_lea.vmem %s3312_s3, %s1689_s7 }
  0xf3   : > { %2156 = vmatprep.subr.mxu1 %v3576_v19  ;;  %1473 = vmatprep.mubr.f32.mxu1 %v1675_v10 }
  0xf4   : > { %2157 = vmatpush3.msra.mxu1 %v2920_v36  ;;  %2206 = vmatpush3.msra.mxu0 %v3586_v47  ;;  %v1722_v36 = vpop.f32.mrf.mxu0 }
  0xf5   : > { %1474 = vmatmul.mubr.f32.vlgmr.msra.gmra.mxu1 %v1674_v20  ;;  %2207 = vmatprep.subr.mxu0 %v3587_v0  ;;  %v1763_v6 = vpop.f32.mrf.mxu1 }
  0xf6   : > { %1478 = vmatprep.mubr.f32.mxu1 %v1682_v26  ;;  %2208 = vmatpush3.msra.mxu0 %v3587_v0  ;;  %v1723_v22 = vpop.f32.mrf.mxu0 }
  0xf7   : > { %2211 = vmatprep.mubr.msk.f32.mxu0 %vm285_vm0, %v1676_v44  ;;  %2209 = vmatprep.subr.mxu0 %v3588_v4  ;;  %v1764_v41 = vpop.f32.mrf.mxu1  ;;  %v1724_v31 = vadd.f32 %v1723_v22, %v1722_v36 }
  0xf8   : > { %2210 = vmatpush3.msra.mxu0 %v3588_v4  ;;  %v1725_v2 = vpop.f32.mrf.mxu0  ;;  %v1765_v47 = vadd.f32 %v1764_v41, %v1763_v6 }
  0xf9   : > { %1479 = vmatmul.mubr.f32.gmra.mxu1 %v1681_v38  ;;  %2212 = vmatmul.mubr.msk.f32.vlgmr.msra.gmra.mxu0 %vm285_vm0, %v1683_v14 }
  0xfa   : > { %v1726_v49 = vpop.f32.mrf.mxu0  ;;  %v3290_v8 = vpop.f32.mrf.mxu1 }
  0xfb   : > { %v1727_v16 = vadd.f32 %v1726_v49, %v1725_v2 }
  0xfc   : > { %v3292_v28 = vpop.f32.mrf.mxu1 }
 0x113   : > { %v1798_v37 = vpop.f32.mrf.mxu0 }
 0x115   : > { %v1799_v32 = vpop.f32.mrf.mxu0 }
 0x116   : > { %v1800_v26 = vadd.f32 %v1799_v32, %v1798_v37 }
 0x118   : > { %v1801_v12 = vpop.f32.mrf.mxu0 }
 0x11a   : > { %v1802_v1 = vpop.f32.mrf.mxu0 }
 0x11b   : > { %v1803_v36 = vadd.f32 %v1802_v1, %v1801_v12 }
 0x11d   : > { %v1842_v18 = vpop.f32.mrf.mxu1 }
 0x11f   : > { %v1843_v3 = vpop.f32.mrf.mxu1 }
 0x120   : > { %v1844_v51 = vadd.f32 %v1843_v3, %v1842_v18 }
 0x136   : > { %v1880_v5 = vpop.f32.mrf.mxu0 }
 0x138   : > { %v1881_v7 = vpop.f32.mrf.mxu0 }
 0x139   : > { %v1882_v24 = vadd.f32 %v1881_v7, %v1880_v5  ;;  %v434_v7 = vadd.f32 %v1762_v35, %v1724_v31 }
 0x13a   : > { %v1845_v30 = vpop.f32.mrf.mxu1 }
 0x13b   : > { %v755_v44 = vadd.f32 %v1882_v24, %v1844_v51  ;;  %v509_v2 = vadd.f32 %v1800_v26, %v434_v7 }
 0x13c   : > { %v1846_v9 = vpop.f32.mrf.mxu1  ;;  %v1883_v11 = vpop.f32.mrf.mxu0 }
 0x13d   : > { %v1847_v10 = vadd.f32 %v1846_v9, %v1845_v30 }
 0x13e   : > { %v1884_v15 = vpop.f32.mrf.mxu0 }
 0x13f   : > { %v1885_v20 = vadd.f32 %v1884_v15, %v1883_v11 }
 0x141   : > { %v1918_v13 = vpop.f32.mrf.mxu1  ;;  %v760_v18 = vadd.f32 %v1885_v20, %v1847_v10 }
 0x143   : > { %v1919_v17 = vpop.f32.mrf.mxu1  ;;  %v3294_v19 = vpop.f32.mrf.mxu0 }
 0x144   : > { %v1920_v53 = vadd.f32 %v1919_v17, %v1918_v13  ;;  %v439_v17 = vadd.f32 %v1765_v47, %v1727_v16 }
 0x145   : > { %v904_v29 = vpop.f32.mrf.mxu0 }
 0x146   : > { %v830_v55 = vadd.f32 %v1920_v53, %v755_v44  ;;  %v514_v9 = vadd.f32 %v1803_v36, %v439_v17 }
 0x147   : > { %v1921_v27 = vpop.f32.mrf.mxu1 }
 0x148   : > { %v905_v11 = vadd.f32 %v904_v29, %v830_v55 }
 0x149   : > { %v1922_v42 = vpop.f32.mrf.mxu1 }
 0x14a   : > { %v1923_v14 = vadd.f32 %v1922_v42, %v1921_v27  ;;  %v584_v42 = vadd.f32 %v3292_v28, %v509_v2 }
 0x14c   : > { %v835_v41 = vadd.f32 %v1923_v14, %v760_v18 }
 0x164   : > { %v1962_v33 = vpop.f32.mrf.mxu0 }
 0x165   : > { %v2000_v46 = vpop.f32.mrf.mxu1 }
 0x166   : > { %v1963_v48 = vpop.f32.mrf.mxu0 }
 0x167   : > { %v2001_v50 = vpop.f32.mrf.mxu1  ;;  %v1964_v57 = vadd.f32 %v1963_v48, %v1962_v33 }
 0x168   : > { %v2002_v39 = vadd.f32 %v2001_v50, %v2000_v46  ;;  %v910_v50 = vadd.f32 %v3294_v19, %v835_v41  ;;  %v1686_v19 = vld [vmem:[%s3311_s2] ss:$0 sm:$0xff] }
 0x16a   : > { %v1965_v52 = vpop.f32.mrf.mxu0  ;;  %v1078_v22 = vadd.f32 %v2002_v39, %v1964_v57 }
 0x16b   : > { %v2003_v54 = vpop.f32.mrf.mxu1 }
 0x16c   : > { %v1966_v21 = vpop.f32.mrf.mxu0 }
 0x16d   : > { %v2004_v58 = vpop.f32.mrf.mxu1  ;;  %v1967_v4 = vadd.f32 %v1966_v21, %v1965_v52 }
 0x16e   : > { %v2005_v5 = vadd.f32 %v2004_v58, %v2003_v54 }
 0x170   : > { %v2202_v60 = vpop.f32.mrf.mxu1  ;;  %v1083_v37 = vadd.f32 %v2005_v5, %v1967_v4 }
 0x172   : > { %v1227_v59 = vpop.f32.mrf.mxu1 }
 0x189   : > { %v2038_v56 = vpop.f32.mrf.mxu0 }
 0x18b   : > { %v2039_v34 = vpop.f32.mrf.mxu0 }
 0x18c   : > { %v2040_v0 = vadd.f32 %v2039_v34, %v2038_v56  ;;  %v913_v56 = vmax.f32 %v584_v42, %v905_v11  ;;  %v589_v34 = vadd.f32 %v3290_v8, %v514_v9 }
 0x18e   : > { %v2041_v62 = vpop.f32.mrf.mxu0  ;;  %v1153_v49 = vadd.f32 %v2040_v0, %v1078_v22 }
 0x190   : > { %v2042_v63 = vpop.f32.mrf.mxu0  ;;  %v1228_v46 = vadd.f32 %v1227_v59, %v1153_v49 }
 0x191   : > { %v2043_v3 = vadd.f32 %v2042_v63, %v2041_v62 }
 0x193   : > { %v2082_v61 = vpop.f32.mrf.mxu1  ;;  %v1158_v27 = vadd.f32 %v2043_v3, %v1083_v37 }
 0x195   : > { %v2083_v25 = vpop.f32.mrf.mxu1  ;;  %v1233_v29 = vadd.f32 %v2202_v60, %v1158_v27 }
 0x196   : > { %v2084_v32 = vadd.f32 %v2083_v25, %v2082_v61  ;;  %v914_v25 = vmax.f32 %v589_v34, %v910_v50 }
 0x198   : > { %v1237_v31 = vmax.f32 %v914_v25, %v1233_v29 }
 0x1ac   : > { %v2120_v23 = vpop.f32.mrf.mxu0 }
 0x1ae   : > { %v2121_v43 = vpop.f32.mrf.mxu0  ;;  %v2085_v40 = vpop.f32.mrf.mxu1 }
 0x1af   : > { %v2122_v13 = vadd.f32 %v2121_v43, %v2120_v23  ;;  %v1236_v23 = vmax.f32 %v913_v56, %v1228_v46 }
 0x1b0   : > { %v2123_v38 = vpop.f32.mrf.mxu0  ;;  %v2086_v45 = vpop.f32.mrf.mxu1 }
 0x1b1   : > { %v1401_v33 = vadd.f32 %v2122_v13, %v2084_v32  ;;  %v2087_v52 = vadd.f32 %v2086_v45, %v2085_v40 }
 0x1b2   : > { %v2124_v30 = vpop.f32.mrf.mxu0 }
 0x1b3   : > { %v2125_v12 = vadd.f32 %v2124_v30, %v2123_v38 }
 0x1b5   : > { %v2158_v6 = vpop.f32.mrf.mxu1  ;;  %v1406_v62 = vadd.f32 %v2125_v12, %v2087_v52 }
 0x1b7   : > { %v2159_v15 = vpop.f32.mrf.mxu1 }
 0x1b8   : > { %v2160_v1 = vadd.f32 %v2159_v15, %v2158_v6 }
 0x1b9   : > { %v2161_v48 = vpop.f32.mrf.mxu1  ;;  %v2213_v54 = vpop.f32.mrf.mxu0 }
 0x1ba   : > { %v1476_v21 = vadd.f32 %v2160_v1, %v1401_v33 }
 0x1bb   : > { %v2162_v58 = vpop.f32.mrf.mxu1  ;;  %v1550_v63 = vpop.f32.mrf.mxu0 }
 0x1bc   : > { %v2163_v61 = vadd.f32 %v2162_v58, %v2161_v48  ;;  %v1551_v24 = vadd.f32 %v1550_v63, %v1476_v21 }
 0x1be   : > { %v1481_v28 = vadd.f32 %v2163_v61, %v1406_v62  ;;  %v1559_v59 = vmax.f32 %v1236_v23, %v1551_v24 }
 0x1c0   : > { %v1556_v35 = vadd.f32 %v2213_v54, %v1481_v28  ;;  %v1568_v8 = vadd.f32 %v1686_v19, %v1559_v59 }
 0x1c2   : > { %v1560_v60 = vmax.f32 %v1237_v31, %v1556_v35  ;;  %1571 = vst.msk [vmem:[%s170_s24] sm:$0xff] %vm1570_vm1, %v1568_v8 }
 0x1c4   : > { %v1569_v43 = vadd.f32 %v1686_v19, %v1560_v60 }
 0x1c6   : > { %1572 = vst.msk [vmem:[%s170_s24 + $0x8] sm:$0xff] %vm1570_vm1, %v1569_v43 }
 0x1c7 PF: > { %s13_s12 = sadd.s32 1, %s2240_s12  }
 0x1c8   : > { %p10_p4 = scmp.ge.s32.totalorder %s13_s12, 4  }
 0x1ca   :  { %12 = sbr.rel (!%p10_p4) target bundleno = 1 (0x1), region = 65 }

// kernel: tudui_forward.7
= control target key start
LH: loop header
LB: loop body
LE: loop exit
PB: predicated region body
PF: predicated region fallthrough
CT: control target
= control target key end

     0   :  { %v786_v30 = vmov 1983009808   ;;  %v164_v32 = vlaneseq  ;;  %s1249_s0 = inlined_call_operand.vmem [shape: f32[2,1024], index: 0, kind: input, shape index: {}]   ;;  %s1250_s1 = inlined_call_operand.vmem [shape: f32[1024,64], index: 1, kind: input, shape index: {}]   ;;  %s1251_s2 = inlined_call_operand.vmem [shape: f32[1,64], index: 2, kind: input, shape index: {}]   ;;  %s1252_s3 = inlined_call_operand.vmem [shape: f32[64,10], index: 3, kind: input, shape index: {}]   ;;  %s1253_s4 = inlined_call_operand.vmem [shape: f32[1,10], index: 4, kind: input, shape index: {}]   ;;  %s1254_s5 = inlined_call_operand.hbm [shape: f32[2,10], index: 5, kind: output, shape index: {}]  }
   0x1   :  { %v54_v0 = vld [vmem:[%s1250_s1 + $0xf8] sm:$0xff]  ;;  %v53_v4 = vld [vmem:[%s1250_s1 + $0xf0] sm:$0xff]  ;;  %v52_v8 = vld [vmem:[%s1250_s1 + $0xe8] sm:$0xff]  ;;  %v162_v31 = vunpack.c.l.s4 %v786_v30 }
   0x2   :  { %v86_v1 = vld [vmem:[%s1250_s1 + $0x1f8] sm:$0xff]  ;;  %590 = vmatprep.subr.mxu0 %v54_v0  ;;  %v85_v5 = vld [vmem:[%s1250_s1 + $0x1f0] sm:$0xff]  ;;  %v84_v9 = vld [vmem:[%s1250_s1 + $0x1e8] sm:$0xff]  ;;  %v165_v42 = vshrl.u32 %v164_v32, 7 }
   0x3   :  { %v38_v2 = vld [vmem:[%s1250_s1 + $0x78] sm:$0xff]  ;;  %625 = vmatprep.subr.mxu1 %v86_v1  ;;  %v37_v6 = vld [vmem:[%s1250_s1 + $0x70] sm:$0xff]  ;;  %v36_v10 = vld [vmem:[%s1250_s1 + $0x68] sm:$0xff]  ;;  %v163_v41 = vunpack.c.0.s8 %v162_v31 }
   0x4   :  { %v70_v3 = vld [vmem:[%s1250_s1 + $0x178] sm:$0xff]  ;;  %591 = vmatpush3.msra.mxu0 %v38_v2  ;;  %v69_v7 = vld [vmem:[%s1250_s1 + $0x170] sm:$0xff]  ;;  %v68_v11 = vld [vmem:[%s1250_s1 + $0x168] sm:$0xff] }
   0x5   :  { %626 = vmatpush3.msra.mxu1 %v70_v3  ;;  %592 = vmatprep.subr.mxu0 %v53_v4  ;;  %v51_v12 = vld [vmem:[%s1250_s1 + $0xe0] sm:$0xff]  ;;  %v50_v16 = vld [vmem:[%s1250_s1 + $0xd8] sm:$0xff]  ;;  %v49_v20 = vld [vmem:[%s1250_s1 + $0xd0] sm:$0xff]  ;;  %v958_v51 = vsub.s32 %v163_v41, %v165_v42 }
   0x6   :  { %627 = vmatprep.subr.mxu1 %v85_v5  ;;  %593 = vmatpush3.msra.mxu0 %v37_v6  ;;  %v83_v13 = vld [vmem:[%s1250_s1 + $0x1e0] sm:$0xff]  ;;  %v82_v17 = vld [vmem:[%s1250_s1 + $0x1d8] sm:$0xff]  ;;  %v81_v21 = vld [vmem:[%s1250_s1 + $0x1d0] sm:$0xff] }
   0x7   :  { %628 = vmatpush3.msra.mxu1 %v69_v7  ;;  %594 = vmatprep.subr.mxu0 %v52_v8  ;;  %v35_v14 = vld [vmem:[%s1250_s1 + $0x60] sm:$0xff]  ;;  %v34_v18 = vld [vmem:[%s1250_s1 + $0x58] sm:$0xff]  ;;  %v33_v22 = vld [vmem:[%s1250_s1 + $0x50] sm:$0xff] }
   0x8   :  { %629 = vmatprep.subr.mxu1 %v84_v9  ;;  %v67_v15 = vld [vmem:[%s1250_s1 + $0x160] sm:$0xff]  ;;  %595 = vmatpush3.msra.mxu0 %v36_v10  ;;  %v66_v19 = vld [vmem:[%s1250_s1 + $0x158] sm:$0xff]  ;;  %v65_v23 = vld [vmem:[%s1250_s1 + $0x150] sm:$0xff] }
   0x9   :  { %630 = vmatpush3.msra.mxu1 %v68_v11  ;;  %596 = vmatprep.subr.mxu0 %v51_v12  ;;  %v48_v24 = vld [vmem:[%s1250_s1 + $0xc8] sm:$0xff]  ;;  %v47_v28 = vld [vmem:[%s1250_s1 + $0xc0] sm:$0xff]  ;;  %v46_v35 = vld [vmem:[%s1250_s1 + $0xb8] sm:$0xff] }
   0xa   :  { %631 = vmatprep.subr.mxu1 %v83_v13  ;;  %597 = vmatpush3.msra.mxu0 %v35_v14  ;;  %v80_v25 = vld [vmem:[%s1250_s1 + $0x1c8] sm:$0xff]  ;;  %v79_v29 = vld [vmem:[%s1250_s1 + $0x1c0] sm:$0xff]  ;;  %v78_v36 = vld [vmem:[%s1250_s1 + $0x1b8] sm:$0xff] }
   0xb   :  { %632 = vmatpush3.msra.mxu1 %v67_v15  ;;  %598 = vmatprep.subr.mxu0 %v50_v16  ;;  %v32_v26 = vld [vmem:[%s1250_s1 + $0x48] sm:$0xff]  ;;  %v31_v33 = vld [vmem:[%s1250_s1 + $0x40] sm:$0xff]  ;;  %v30_v37 = vld [vmem:[%s1250_s1 + $0x38] sm:$0xff] }
   0xc   :  { %633 = vmatprep.subr.mxu1 %v82_v17  ;;  %599 = vmatpush3.msra.mxu0 %v34_v18  ;;  %v64_v27 = vld [vmem:[%s1250_s1 + $0x148] sm:$0xff]  ;;  %v63_v34 = vld [vmem:[%s1250_s1 + $0x140] sm:$0xff]  ;;  %v62_v38 = vld [vmem:[%s1250_s1 + $0x138] sm:$0xff] }
   0xd   :  { %634 = vmatpush3.msra.mxu1 %v66_v19  ;;  %600 = vmatprep.subr.mxu0 %v49_v20  ;;  %v45_v39 = vld [vmem:[%s1250_s1 + $0xb0] sm:$0xff]  ;;  %v44_v45 = vld [vmem:[%s1250_s1 + $0xa8] sm:$0xff]  ;;  %v43_v49 = vld [vmem:[%s1250_s1 + $0xa0] sm:$0xff] }
   0xe   :  { %635 = vmatprep.subr.mxu1 %v81_v21  ;;  %601 = vmatpush3.msra.mxu0 %v33_v22  ;;  %v77_v40 = vld [vmem:[%s1250_s1 + $0x1b0] sm:$0xff]  ;;  %v76_v46 = vld [vmem:[%s1250_s1 + $0x1a8] sm:$0xff]  ;;  %v75_v50 = vld [vmem:[%s1250_s1 + $0x1a0] sm:$0xff] }
   0xf   :  { %636 = vmatpush3.msra.mxu1 %v65_v23  ;;  %602 = vmatprep.subr.mxu0 %v48_v24  ;;  %v29_v43 = vld [vmem:[%s1250_s1 + $0x30] sm:$0xff]  ;;  %v28_v47 = vld [vmem:[%s1250_s1 + $0x28] sm:$0xff]  ;;  %v27_v52 = vld [vmem:[%s1250_s1 + $0x20] sm:$0xff] }
  0x10   :  { %637 = vmatprep.subr.mxu1 %v80_v25  ;;  %603 = vmatpush3.msra.mxu0 %v32_v26  ;;  %v61_v44 = vld [vmem:[%s1250_s1 + $0x130] sm:$0xff]  ;;  %v60_v48 = vld [vmem:[%s1250_s1 + $0x128] sm:$0xff]  ;;  %v59_v53 = vld [vmem:[%s1250_s1 + $0x120] sm:$0xff] }
  0x11   :  { %638 = vmatpush3.msra.mxu1 %v64_v27  ;;  %604 = vmatprep.subr.mxu0 %v47_v28  ;;  %v21_v54 = vld [vmem:[%s1249_s0] sm:$0xff]  ;;  %v42_v55 = vld [vmem:[%s1250_s1 + $0x98] sm:$0xff]  ;;  %v41_v60 = vld [vmem:[%s1250_s1 + $0x90] sm:$0xff] }
  0x12   :  { %639 = vmatprep.subr.mxu1 %v79_v29  ;;  %605 = vmatpush3.msra.mxu0 %v31_v33  ;;  %v74_v56 = vld [vmem:[%s1250_s1 + $0x198] sm:$0xff]  ;;  %v160_v57 = vcombine.high %v21_v54, %v21_v54  ;;  %v73_v61 = vld [vmem:[%s1250_s1 + $0x190] sm:$0xff]  ;;  %v167_v62 = vrot.slane %v21_v54, %v958_v51  ;;  %v40_v1 = vld [vmem:[%s1250_s1 + $0x88] sm:$0xff] }
  0x13   :  { %640 = vmatpush3.msra.mxu1 %v63_v34  ;;  %606 = vmatprep.subr.mxu0 %v46_v35  ;;  %v26_v58 = vld [vmem:[%s1250_s1 + $0x18] sm:$0xff]  ;;  %v25_v63 = vld [vmem:[%s1250_s1 + $0x10] sm:$0xff]  ;;  %v72_v2 = vld [vmem:[%s1250_s1 + $0x188] sm:$0xff] }
  0x14   :  { %641 = vmatprep.subr.mxu1 %v78_v36  ;;  %607 = vmatpush3.msra.mxu0 %v30_v37  ;;  %v58_v59 = vld [vmem:[%s1250_s1 + $0x118] sm:$0xff]  ;;  %v57_v0 = vld [vmem:[%s1250_s1 + $0x110] sm:$0xff]  ;;  %v174_v3 = vrot.slane %v160_v57, %v958_v51  ;;  %v24_v4 = vld [vmem:[%s1250_s1 + $0x8] sm:$0xff]  ;;  %v175_v8 = vcombine.high %v167_v62, %v167_v62 }
  0x15   :  { %642 = vmatpush3.msra.mxu1 %v62_v38  ;;  %608 = vmatprep.subr.mxu0 %v45_v39  ;;  %v56_v5 = vld [vmem:[%s1250_s1 + $0x108] sm:$0xff]  ;;  %v39_v6 = vld [vmem:[%s1250_s1 + $0x80] sm:$0xff]  ;;  %v118_v12 = vld [vmem:[%s1250_s1 + $0x2f8] sm:$0xff] }
  0x16   :  { %643 = vmatprep.subr.mxu1 %v77_v40  ;;  %609 = vmatpush3.msra.mxu0 %v29_v43  ;;  %v71_v7 = vld [vmem:[%s1250_s1 + $0x180] sm:$0xff]  ;;  %v176_v11 = vcombine.high %v174_v3, %v174_v3  ;;  %v150_v13 = vld [vmem:[%s1250_s1 + $0x3f8] sm:$0xff]  ;;  %v117_v16 = vld [vmem:[%s1250_s1 + $0x2f0] sm:$0xff] }
  0x17   :  { %644 = vmatpush3.msra.mxu1 %v61_v44  ;;  %610 = vmatprep.subr.mxu0 %v44_v45  ;;  %v23_v9 = vld [vmem:[%s1250_s1] sm:$0xff]  ;;  %v102_v14 = vld [vmem:[%s1250_s1 + $0x278] sm:$0xff]  ;;  %v149_v17 = vld [vmem:[%s1250_s1 + $0x3f0] sm:$0xff] }
  0x18   :  { %645 = vmatprep.subr.mxu1 %v76_v46  ;;  %611 = vmatpush3.msra.mxu0 %v28_v47  ;;  %v55_v10 = vld [vmem:[%s1250_s1 + $0x100] sm:$0xff]  ;;  %v134_v15 = vld [vmem:[%s1250_s1 + $0x378] sm:$0xff]  ;;  %v101_v18 = vld [vmem:[%s1250_s1 + $0x270] sm:$0xff] }
  0x19   :  { %646 = vmatpush3.msra.mxu1 %v60_v48  ;;  %612 = vmatprep.subr.mxu0 %v43_v49  ;;  %v133_v19 = vld [vmem:[%s1250_s1 + $0x370] sm:$0xff]  ;;  %v116_v20 = vld [vmem:[%s1250_s1 + $0x2e8] sm:$0xff]  ;;  %v115_v24 = vld [vmem:[%s1250_s1 + $0x2e0] sm:$0xff] }
  0x1a   :  { %647 = vmatprep.subr.mxu1 %v75_v50  ;;  %613 = vmatpush3.msra.mxu0 %v27_v52  ;;  %v148_v21 = vld [vmem:[%s1250_s1 + $0x3e8] sm:$0xff]  ;;  %v147_v25 = vld [vmem:[%s1250_s1 + $0x3e0] sm:$0xff]  ;;  %v114_v28 = vld [vmem:[%s1250_s1 + $0x2d8] sm:$0xff] }
  0x1b   :  { %648 = vmatpush3.msra.mxu1 %v59_v53  ;;  %614 = vmatprep.subr.mxu0 %v42_v55  ;;  %v100_v22 = vld [vmem:[%s1250_s1 + $0x268] sm:$0xff]  ;;  %v99_v26 = vld [vmem:[%s1250_s1 + $0x260] sm:$0xff]  ;;  %v146_v29 = vld [vmem:[%s1250_s1 + $0x3d8] sm:$0xff] }
  0x1c   :  { %649 = vmatprep.subr.mxu1 %v74_v56  ;;  %615 = vmatpush3.msra.mxu0 %v26_v58  ;;  %v132_v23 = vld [vmem:[%s1250_s1 + $0x368] sm:$0xff]  ;;  %v131_v27 = vld [vmem:[%s1250_s1 + $0x360] sm:$0xff]  ;;  %v98_v30 = vld [vmem:[%s1250_s1 + $0x258] sm:$0xff] }
  0x1d   :  { %650 = vmatpush3.msra.mxu1 %v58_v59  ;;  %616 = vmatprep.subr.mxu0 %v41_v60  ;;  %v130_v31 = vld [vmem:[%s1250_s1 + $0x358] sm:$0xff]  ;;  %v113_v32 = vld [vmem:[%s1250_s1 + $0x2d0] sm:$0xff] }
  0x1e   :  { %651 = vmatprep.subr.mxu1 %v73_v61  ;;  %617 = vmatpush3.msra.mxu0 %v25_v63  ;;  %v145_v33 = vld [vmem:[%s1250_s1 + $0x3d0] sm:$0xff] }
  0x1f   :  { %652 = vmatpush3.msra.mxu1 %v57_v0  ;;  %618 = vmatprep.subr.mxu0 %v40_v1  ;;  %v97_v34 = vld [vmem:[%s1250_s1 + $0x250] sm:$0xff] }
  0x20   :  { %653 = vmatprep.subr.mxu1 %v72_v2  ;;  %619 = vmatpush3.msra.mxu0 %v24_v4  ;;  %v129_v35 = vld [vmem:[%s1250_s1 + $0x350] sm:$0xff] }
  0x21   :  { %654 = vmatpush3.msra.mxu1 %v56_v5  ;;  %620 = vmatprep.subr.mxu0 %v39_v6 }
  0x22   :  { %655 = vmatprep.subr.mxu1 %v71_v7  ;;  %621 = vmatpush3.msra.mxu0 %v23_v9 }
  0x23   :  { %266 = vmatprep.mubr.f32.mxu0 %v175_v8  ;;  %656 = vmatpush3.msra.mxu1 %v55_v10 }
  0x24   :  { %267 = vmatmul.mubr.f32.vlgmr.msra.gmra.mxu0 %v167_v62  ;;  %336 = vmatprep.mubr.f32.mxu1 %v176_v11 }
  0x25   :  { %660 = vmatprep.subr.mxu0 %v118_v12  ;;  %695 = vmatprep.subr.mxu1 %v150_v13 }
  0x26   :  { %337 = vmatmul.mubr.f32.vlgmr.msra.gmra.mxu1 %v174_v3  ;;  %661 = vmatpush3.msra.mxu0 %v102_v14 }
  0x27   :  { %696 = vmatpush3.msra.mxu1 %v134_v15  ;;  %662 = vmatprep.subr.mxu0 %v117_v16 }
  0x28   :  { %697 = vmatprep.subr.mxu1 %v149_v17  ;;  %663 = vmatpush3.msra.mxu0 %v101_v18 }
  0x29   :  { %698 = vmatpush3.msra.mxu1 %v133_v19  ;;  %664 = vmatprep.subr.mxu0 %v116_v20 }
  0x2a   :  { %699 = vmatprep.subr.mxu1 %v148_v21  ;;  %665 = vmatpush3.msra.mxu0 %v100_v22 }
  0x2b   :  { %700 = vmatpush3.msra.mxu1 %v132_v23  ;;  %666 = vmatprep.subr.mxu0 %v115_v24 }
  0x2c   :  { %701 = vmatprep.subr.mxu1 %v147_v25  ;;  %667 = vmatpush3.msra.mxu0 %v99_v26 }
  0x2d   :  { %702 = vmatpush3.msra.mxu1 %v131_v27  ;;  %668 = vmatprep.subr.mxu0 %v114_v28 }
  0x2e   :  { %703 = vmatprep.subr.mxu1 %v146_v29 }
  0x2f   :  { %10 = vsyncpa [#allocation3], 0  ;;  %669 = vmatpush3.msra.mxu0 %v98_v30  ;;  %704 = vmatpush3.msra.mxu1 %v130_v31  ;;  %v112_v36 = vld [vmem:[%s1250_s1 + $0x2c8] sm:$0xff]  ;;  %v111_v40 = vld [vmem:[%s1250_s1 + $0x2c0] sm:$0xff]  ;;  %v787_v19 = vmov 0.0   ;;  %vm788_vm0 = vmmov 0  }
  0x30   :  { %v144_v37 = vld [vmem:[%s1250_s1 + $0x3c8] sm:$0xff]  ;;  %670 = vmatprep.subr.mxu0 %v113_v32  ;;  %705 = vmatprep.subr.mxu1 %v145_v33  ;;  %v143_v41 = vld [vmem:[%s1250_s1 + $0x3c0] sm:$0xff]  ;;  %v110_v44 = vld [vmem:[%s1250_s1 + $0x2b8] sm:$0xff]  ;;  %vm497_vm1 = vcmask 523264   ;;  %s789_s18 = smov [#allocation2]   ;;  %vm571_vm2 = vcmask 74752  }
  0x31   :  { %v96_v38 = vld [vmem:[%s1250_s1 + $0x248] sm:$0xff]  ;;  %671 = vmatpush3.msra.mxu0 %v97_v34  ;;  %706 = vmatpush3.msra.mxu1 %v129_v35  ;;  %v95_v42 = vld [vmem:[%s1250_s1 + $0x240] sm:$0xff]  ;;  %v142_v45 = vld [vmem:[%s1250_s1 + $0x3b8] sm:$0xff] }
  0x32   :  { %v128_v39 = vld [vmem:[%s1250_s1 + $0x348] sm:$0xff]  ;;  %672 = vmatprep.subr.mxu0 %v112_v36  ;;  %707 = vmatprep.subr.mxu1 %v144_v37  ;;  %v127_v43 = vld [vmem:[%s1250_s1 + $0x340] sm:$0xff]  ;;  %v94_v46 = vld [vmem:[%s1250_s1 + $0x238] sm:$0xff] }
  0x33   :  { %673 = vmatpush3.msra.mxu0 %v96_v38  ;;  %708 = vmatpush3.msra.mxu1 %v128_v39  ;;  %v126_v47 = vld [vmem:[%s1250_s1 + $0x338] sm:$0xff]  ;;  %v109_v48 = vld [vmem:[%s1250_s1 + $0x2b0] sm:$0xff]  ;;  %v108_v53 = vld [vmem:[%s1250_s1 + $0x2a8] sm:$0xff] }
  0x34   :  { %674 = vmatprep.subr.mxu0 %v111_v40  ;;  %709 = vmatprep.subr.mxu1 %v143_v41  ;;  %v141_v49 = vld [vmem:[%s1250_s1 + $0x3b0] sm:$0xff]  ;;  %v140_v54 = vld [vmem:[%s1250_s1 + $0x3a8] sm:$0xff]  ;;  %v107_v58 = vld [vmem:[%s1250_s1 + $0x2a0] sm:$0xff] }
  0x35   :  { %675 = vmatpush3.msra.mxu0 %v95_v42  ;;  %710 = vmatpush3.msra.mxu1 %v127_v43  ;;  %v93_v50 = vld [vmem:[%s1250_s1 + $0x230] sm:$0xff]  ;;  %v22_v55 = vld [vmem:[%s1249_s0 + $0x8] sm:$0xff]  ;;  %v139_v59 = vld [vmem:[%s1250_s1 + $0x3a0] sm:$0xff] }
  0x36   :  { %676 = vmatprep.subr.mxu0 %v110_v44  ;;  %711 = vmatprep.subr.mxu1 %v142_v45  ;;  %v125_v52 = vld [vmem:[%s1250_s1 + $0x330] sm:$0xff]  ;;  %v92_v56 = vld [vmem:[%s1250_s1 + $0x228] sm:$0xff]  ;;  %v91_v60 = vld [vmem:[%s1250_s1 + $0x220] sm:$0xff]  ;;  %v177_v62 = vcombine.high %v22_v55, %v22_v55  ;;  %v184_v5 = vrot.slane %v22_v55, %v958_v51 }
  0x37   :  { %677 = vmatpush3.msra.mxu0 %v94_v46  ;;  %712 = vmatpush3.msra.mxu1 %v126_v47  ;;  %v124_v57 = vld [vmem:[%s1250_s1 + $0x328] sm:$0xff]  ;;  %v123_v61 = vld [vmem:[%s1250_s1 + $0x320] sm:$0xff]  ;;  %v106_v63 = vld [vmem:[%s1250_s1 + $0x298] sm:$0xff] }
  0x38   :  { %678 = vmatprep.subr.mxu0 %v109_v48  ;;  %713 = vmatprep.subr.mxu1 %v141_v49  ;;  %v138_v0 = vld [vmem:[%s1250_s1 + $0x398] sm:$0xff]  ;;  %v105_v3 = vld [vmem:[%s1250_s1 + $0x290] sm:$0xff]  ;;  %v191_v8 = vrot.slane %v177_v62, %v958_v51  ;;  %v104_v9 = vld [vmem:[%s1250_s1 + $0x288] sm:$0xff]  ;;  %v192_v14 = vcombine.high %v184_v5, %v184_v5 }
  0x39   :  { %679 = vmatpush3.msra.mxu0 %v93_v50  ;;  %714 = vmatpush3.msra.mxu1 %v125_v52  ;;  %v90_v1 = vld [vmem:[%s1250_s1 + $0x218] sm:$0xff]  ;;  %v137_v4 = vld [vmem:[%s1250_s1 + $0x390] sm:$0xff]  ;;  %v136_v10 = vld [vmem:[%s1250_s1 + $0x388] sm:$0xff] }
  0x3a   :  { %680 = vmatprep.subr.mxu0 %v108_v53  ;;  %715 = vmatprep.subr.mxu1 %v140_v54  ;;  %v122_v2 = vld [vmem:[%s1250_s1 + $0x318] sm:$0xff]  ;;  %v89_v6 = vld [vmem:[%s1250_s1 + $0x210] sm:$0xff]  ;;  %v88_v11 = vld [vmem:[%s1250_s1 + $0x208] sm:$0xff]  ;;  %v193_v16 = vcombine.high %v191_v8, %v191_v8 }
  0x3b   :  { %681 = vmatpush3.msra.mxu0 %v92_v56  ;;  %716 = vmatpush3.msra.mxu1 %v124_v57  ;;  %v121_v7 = vld [vmem:[%s1250_s1 + $0x310] sm:$0xff]  ;;  %v120_v51 = vld [vmem:[%s1250_s1 + $0x308] sm:$0xff]  ;;  %v103_v12 = vld [vmem:[%s1250_s1 + $0x280] sm:$0xff] }
  0x3c   :  { %682 = vmatprep.subr.mxu0 %v107_v58  ;;  %717 = vmatprep.subr.mxu1 %v139_v59  ;;  %v135_v13 = vld [vmem:[%s1250_s1 + $0x380] sm:$0xff]  ;;  %v489_v18 = vld [vmem:[%s1252_s3 + $0x38] sm:$0xff]  ;;  %v488_v20 = vld [vmem:[%s1252_s3 + $0x30] sm:$0xff] }
  0x3d   :  { %683 = vmatpush3.msra.mxu0 %v91_v60  ;;  %718 = vmatpush3.msra.mxu1 %v123_v61  ;;  %v87_v15 = vld [vmem:[%s1250_s1 + $0x200] sm:$0xff]  ;;  %v487_v21 = vld [vmem:[%s1252_s3 + $0x28] sm:$0xff]  ;;  %v485_v23 = vld [vmem:[%s1252_s3 + $0x18] sm:$0xff] }
  0x3e   :  { %684 = vmatprep.subr.mxu0 %v106_v63  ;;  %719 = vmatprep.subr.mxu1 %v138_v0  ;;  %v119_v17 = vld [vmem:[%s1250_s1 + $0x300] sm:$0xff]  ;;  %v484_v24 = vld [vmem:[%s1252_s3 + $0x10] sm:$0xff]  ;;  %v483_v25 = vld [vmem:[%s1252_s3 + $0x8] sm:$0xff] }
  0x3f   :  { %685 = vmatpush3.msra.mxu0 %v90_v1  ;;  %720 = vmatpush3.msra.mxu1 %v122_v2  ;;  %v486_v22 = vld [vmem:[%s1252_s3 + $0x20] sm:$0xff] }
  0x40   :  { %686 = vmatprep.subr.mxu0 %v105_v3  ;;  %721 = vmatprep.subr.mxu1 %v137_v4  ;;  %v482_v26 = vld [vmem:[%s1252_s3] sm:$0xff] }
  0x41   :  { %687 = vmatpush3.msra.mxu0 %v89_v6  ;;  %722 = vmatpush3.msra.mxu1 %v121_v7  ;;  %v587_v31 = vld [vmem:[%s1251_s2] ss:$0 sm:$0xff]  ;;  %s579_s2 = sshll.u32 %s789_s18, 4  ;;  %s580_s2 = int_to_ptr.vmem [resolvable:$true] %s579_s2 }
  0x42   :  { %688 = vmatprep.subr.mxu0 %v104_v9  ;;  %723 = vmatprep.subr.mxu1 %v136_v10  ;;  %v588_v44 = vld [vmem:[%s1253_s4] ss:$0 sm:$0xff]  ;;  %s764_s19 = scalar_lea.vmem %s580_s2, 32  ;;  %p769_p1 = scmp.lt.s32.totalorder %s580_s2, %s580_s2 }
  0x43   :  { %689 = vmatpush3.msra.mxu0 %v88_v11  ;;  %724 = vmatpush3.msra.mxu1 %v120_v51  ;;  %p765_p0 = scmp.ne.s32.totalorder %s580_s2, %s764_s19  ;;  %p770_p2 = scmp.lt.s32.totalorder %s764_s19, %s764_s19 }
  0x44   :  { %690 = vmatprep.subr.mxu0 %v103_v12  ;;  %725 = vmatprep.subr.mxu1 %v135_v13 }
  0x45   :  { %691 = vmatpush3.msra.mxu0 %v87_v15  ;;  %406 = vmatprep.mubr.f32.mxu0 %v192_v14  ;;  %p771_p3 = por %p770_p2, %p769_p1 }
  0x46   :  { %726 = vmatpush3.msra.mxu1 %v119_v17  ;;  %476 = vmatprep.mubr.f32.mxu1 %v193_v16 }
  0x47   :  { %407 = vmatmul.mubr.f32.vlgmr.msra.gmra.mxu0 %v184_v5  ;;  %477 = vmatmul.mubr.f32.vlgmr.msra.gmra.mxu1 %v191_v8  ;;  %p772_p4 = pnand %p771_p3, %p765_p0 }
  0x48   :  { %739 = vmatprep.subr.mxu0 %v787_v19  ;;  %755 = vmatprep.mubr.msk.f32.mxu0 %vm788_vm0, %v787_v19 }
  0x49   :  { %740 = vmatpush3.msra.mxu0 %v489_v18 }
  0x4a   :  { %741 = vmatprep.subr.mxu0 %v787_v19 }
  0x4b   :  { %742 = vmatpush3.msra.mxu0 %v488_v20 }
  0x4c   :  { %743 = vmatprep.subr.mxu0 %v787_v19 }
  0x4d   :  { %744 = vmatpush3.msra.mxu0 %v487_v21 }
  0x4e   :  { %745 = vmatprep.subr.mxu0 %v787_v19 }
  0x4f   :  { %746 = vmatpush3.msra.mxu0 %v486_v22 }
  0x50   :  { %747 = vmatprep.subr.mxu0 %v787_v19 }
  0x51   :  { %748 = vmatpush3.msra.mxu0 %v485_v23 }
  0x52   :  { %749 = vmatprep.subr.mxu0 %v787_v19 }
  0x53   :  { %750 = vmatpush3.msra.mxu0 %v484_v24 }
  0x54   :  { %751 = vmatprep.subr.mxu0 %v787_v19 }
  0x55   :  { %752 = vmatpush3.msra.mxu0 %v483_v25 }
  0x56   :  { %753 = vmatprep.subr.mxu0 %v787_v19 }
  0x57   :  { %754 = vmatpush3.msra.mxu0 %v482_v26 }
  0xe4   :  { %v622_v27 = vpop.f32.mrf.mxu0 }
  0xe6   :  { %v657_v28 = vpop.f32.mrf.mxu1  ;;  %v623_v29 = vpop.f32.mrf.mxu0 }
  0xe7   :  { %v624_v30 = vadd.f32 %v623_v29, %v622_v27 }
  0xe8   :  { %v658_v32 = vpop.f32.mrf.mxu1 }
  0xe9   :  { %v269_v33 = vadd.f32 %v624_v30, %v587_v31  ;;  %v659_v34 = vadd.f32 %v658_v32, %v657_v28 }
  0xeb   :  { %v339_v39 = vadd.f32 %v659_v34, %v269_v33 }
 0x107   :  { %v692_v35 = vpop.f32.mrf.mxu0  ;;  %v727_v36 = vpop.f32.mrf.mxu1 }
 0x109   :  { %v693_v37 = vpop.f32.mrf.mxu0  ;;  %v728_v38 = vpop.f32.mrf.mxu1 }
 0x10a   :  { %v694_v40 = vadd.f32 %v693_v37, %v692_v35  ;;  %v729_v42 = vadd.f32 %v728_v38, %v727_v36 }
 0x10c   :  { %v409_v41 = vadd.f32 %v694_v40, %v339_v39 }
 0x10e   :  { %v479_v43 = vadd.f32 %v729_v42, %v409_v41 }
 0x110   :  { %756 = vmatmul.mubr.msk.f32.vlgmr.msra.gmra.mxu0 %vm497_vm1, %v479_v43 }
 0x1d0   :  { %v567_v45 = vpop.f32.mrf.mxu0 }
 0x1d1   :  { %v568_v46 = vadd.f32 %v588_v44, %v567_v45 }
 0x1d2   :  { %v757_v47 = vpop.f32.mrf.mxu0 }
 0x1d3   :  { %572 = vst.msk [vmem:[#allocation2] sm:$0x3] %vm571_vm2, %v568_v46 }
 0x1d4   :  { %775 = shalt.err (!%p772_p4)
}
 0x1d5   :  { %582 = dma.vmem_to_hbm [thread:$0]  %s580_s2, 32, %s1254_s5, [#allocation3]  }
 0x1d6   :  { %784 = dma.done.wait [#allocation3], 32  }
 0x1d7   :  { %785 = vsyncadd [#allocation3], 4294967264 }
 0x1d8   :  { %586 = vsyncpa [#allocation3], 1 }

</bundles_post_ra>
